<compile_context>
chip_gen: v7x
topology: tpu7x:2x2x1
jax: 0.10.0
libtpu: 0.0.40
codegen_flags: <defaults>
</compile_context>

<pallas_src>
import numpy as np

import jax
import jax.numpy as jnp
from jax import lax
from jax.experimental import pallas as pl
from jax.experimental.pallas import tpu as pltpu

# ------------------------------------------------------------------ config ---
NUM_CLASSES = 20          # AlexNet head in the reference has num_classes=20
RESIZE = 16               # small-scale stand-in for the 227x227 Resize
REGIONS = [               # synthetic (left, top, width, height) proposals
    (0, 0, 20, 20),
    (8, 8, 24, 24),
]

CONV1_K = 32              # conv1 im2col K: 27 tap*cin + 1 bias/validity + 4 pad
C1P = 128                 # conv1 output channels (16 -> 128, lane-dense)
C2P = 128                 # conv2 output channels (32 -> 128)
F1P = 128                 # fc1 features          (64 -> 128)
CLSP = 128                # classes               (20 -> 128)
NEG_BIG = -1e30           # bias for padded class lanes (argmax never picks them)

P1 = RESIZE // 2          # spatial after pool1 (8)
P2 = RESIZE // 4          # spatial after pool2 (4)


# ------------------------------------------------- host-side im2col (conv1) --
def _conv1_gather_plan():
    """Static numpy gather indices + validity mask for conv1's pool-parity im2col.

    For X1[e, q, s, r, a, b, dy, dx, c]:
        row[e, q, a, dy] = 2*(2a + q - 1) + (e // 2) + dy   (clipped)
        col[e, s, b, dx] = 2*(2b + s - 1) + (e %  2) + dx   (clipped)
        valid[q, s, a, b] = 1 iff (2a+q-1, 2b+s-1) lies inside the pooled h1 map
    so that after the conv1 dot + max over e, the result row (q, s, r, a, b) is
    exactly h1pad[r, 2a+q, 2b+s] (the zero-padded, pooled conv1 output), i.e. the
    parity-decomposed layout conv2 reads with contiguous slices.
    """
    q = np.arange(4); s = np.arange(4)
    a = np.arange(4); b = np.arange(4)
    dy = np.arange(3); dx = np.arange(3)
    eh = np.arange(4) // 2
    ew = np.arange(4) % 2

    ih = 2 * a[None, :] + q[:, None] - 1               # [q, a] pooled-h1 row
    iw = 2 * b[None, :] + s[:, None] - 1               # [s, b] pooled-h1 col
    vh = (ih >= 0) & (ih < P1)
    vw = (iw >= 0) & (iw < P1)

    row = (2 * ih)[None, :, :, None] + eh[:, None, None, None] + dy[None, None, None, :]
    col = (2 * iw)[None, :, :, None] + ew[:, None, None, None] + dx[None, None, None, :]
    row = np.clip(row, 0, RESIZE + 1).astype(np.int32)  # [e, q, a, dy]
    col = np.clip(col, 0, RESIZE + 1).astype(np.int32)  # [e, s, b, dx]

    valid = (vh[:, None, :, None] & vw[None, :, None, :]).astype(np.float32)  # [q,s,a,b]
    row_b = row[:, :, None, :, None, :, None]            # [e, q, 1, a, 1, dy, 1]
    col_b = col[:, None, :, None, :, None, :]             # [e, 1, s, 1, b, 1, dx]
    return row_b, col_b, valid


_ROW_B, _COL_B, _VALID = _conv1_gather_plan()


def conv1_im2col(x_nhwc):
    """[R, 16, 16, 3] f32 -> [4, 16, R, 16, 32] bf16 pool-parity im2col for conv1.

    Channel layout: k = (dy*3 + dx)*3 + c for k < 27; k == 27 is the
    bias/validity channel (1.0 on valid rows); k in [28, 32) is zero padding.
    """
    R = x_nhwc.shape[0]
    xp = jnp.pad(x_nhwc, ((0, 0), (1, 1), (1, 1), (0, 0)))      # [R, 18, 18, 3]
    g = xp[:, _ROW_B, _COL_B, :]                                # [R,4,4,4,4,4,3,3,3]
    g = jnp.transpose(g, (1, 2, 3, 0, 4, 5, 6, 7, 8))           # [e,q,s,R,a,b,dy,dx,c]
    v = jnp.asarray(_VALID, x_nhwc.dtype)
    g = g * v[None, :, :, None, :, :, None, None, None]         # zero invalid rows
    g = g.reshape(4, 16, R, 16, 27)
    ones = jnp.broadcast_to(v.reshape(1, 16, 1, 16, 1), (4, 16, R, 16, 1))
    g = jnp.concatenate([g, ones], axis=-1)                     # [..., 28]
    g = jnp.pad(g, ((0, 0), (0, 0), (0, 0), (0, 0), (0, CONV1_K - 28)))
    return g.astype(jnp.bfloat16)


# ----------------------------------------------------------- fused kernel ----
def _rcnn_fused_kernel(x1_ref, w1_ref, w2c_ref, b2c_ref,
                       w1f_ref, b1f_ref, w2f_ref, b2f_ref,
                       pred_ref, h1q_ref, h2_ref):
    """Whole per-region network; all regions of the batch in one block.

    x1_ref : [4, 16, RB, 16, 32] bf16  pool-parity im2col of the resized crops
    w1_ref : [32, 128] bf16            conv1 weights, row 27 = conv1 bias
    w2c_ref: [9, 128, 128] bf16        conv2 weights, tap-major (dy*3+dx)
    b2c_ref: [1, 128] f32              conv2 bias
    w1f_ref: [16, 128, 128] bf16       fc1 weights, spatial(ab)-major
    b1f_ref: [1, 128] f32              fc1 bias
    w2f_ref: [128, 128] f32            fc2 weights
    b2f_ref: [1, 128] f32              fc2 bias (-1e30 on padded class lanes)
    pred_ref: [RB, 128] int32          argmax prediction broadcast across lanes
    h1q_ref: [4, 4, RB*16, 128] bf16   scratch: parity-decomposed zero-padded h1
    h2_ref : [RB, 16, 128] bf16        scratch: pooled conv2 activations
    """
    RB = x1_ref.shape[2]
    M1 = 16 * RB * 16                       # (q,s) x regions x (a,b)
    M2 = 4 * RB * 16                        # pool parity x regions x (a,b)

    # ---- conv1 + bias + ReLU + 2x2 maxpool (pool parities merged into M) ----
    w1 = w1_ref[...]
    pooled1 = None
    for e in range(4):                      # pool parity (eh, ew) = (e // 2, e % 2)
        lhs = x1_ref[e].reshape(M1, CONV1_K)
        acc = jnp.dot(lhs, w1, preferred_element_type=jnp.float32)
        pooled1 = acc if pooled1 is None else jnp.maximum(pooled1, acc)
    # conv1 bias rides the validity channel, so padded h1 rows stay exactly 0.
    h1q_ref[...] = jnp.maximum(pooled1, 0.0).astype(jnp.bfloat16).reshape(
        4, 4, RB * 16, C1P)

    # ---- conv2 + bias + ReLU + 2x2 maxpool (9 taps, parities merged into M) ----
    acc2 = jnp.zeros((M2, C2P), jnp.float32)
    for dy in range(3):
        for dx in range(3):
            lhs = h1q_ref[pl.ds(dy, 2), pl.ds(dx, 2), :, :].reshape(M2, C1P)
            acc2 = acc2 + jnp.dot(lhs, w2c_ref[dy * 3 + dx],
                                  preferred_element_type=jnp.float32)
    pooled2 = jnp.max(acc2.reshape(4, RB * 16, C2P), axis=0)       # 2x2 maxpool
    h2_ref[...] = jnp.maximum(pooled2 + b2c_ref[...], 0.0).astype(
        jnp.bfloat16).reshape(RB, P2 * P2, C2P)

    # ---- fc1 + ReLU (16 spatial positions accumulated like conv taps) ----
    accf = jnp.zeros((RB, F1P), jnp.float32)
    for ab in range(P2 * P2):
        accf = accf + jnp.dot(h2_ref[:, ab, :], w1f_ref[ab],
                              preferred_element_type=jnp.float32)
    hf = jnp.maximum(accf + b1f_ref[...], 0.0)

    # ---- fc2 + argmax (f32 head) ----
    logits = jnp.dot(hf, w2f_ref[...], preferred_element_type=jnp.float32)
    logits = logits + b2f_ref[...]
    ids = lax.broadcasted_iota(jnp.int32, logits.shape, 1)
    m = jnp.max(logits, axis=-1, keepdims=True)
    idx = jnp.min(jnp.where(logits == m, ids, jnp.int32(logits.shape[-1])),
                  axis=-1, keepdims=True)
    pred_ref[...] = jnp.broadcast_to(idx, pred_ref.shape)          # lane-dense int32


def rcnn_fused(x1, params):
    """x1: [4, 16, R, 16, 32] bf16 im2col -> [R] int32 class predictions."""
    R = x1.shape[2]
    # All R regions in a single grid step (R is tiny); for realistic proposal
    # counts, block the region axis (multiple of 8 per step, "parallel" semantics)
    # and size the block for v7x's 64 MiB VMEM.
    preds = pl.pallas_call(
        _rcnn_fused_kernel,
        out_shape=jax.ShapeDtypeStruct((R, CLSP), jnp.int32),
        grid=(1,),
        in_specs=[
            pl.BlockSpec((4, 16, R, 16, CONV1_K), lambda i: (0, 0, 0, 0, 0)),
            pl.BlockSpec((CONV1_K, C1P), lambda i: (0, 0)),
            pl.BlockSpec((9, C1P, C2P), lambda i: (0, 0, 0)),
            pl.BlockSpec((1, C2P), lambda i: (0, 0)),
            pl.BlockSpec((P2 * P2, C2P, F1P), lambda i: (0, 0, 0)),
            pl.BlockSpec((1, F1P), lambda i: (0, 0)),
            pl.BlockSpec((F1P, CLSP), lambda i: (0, 0)),
            pl.BlockSpec((1, CLSP), lambda i: (0, 0)),
        ],
        out_specs=pl.BlockSpec((R, CLSP), lambda i: (0, 0)),
        scratch_shapes=[
            pltpu.VMEM((4, 4, R * 16, C1P), jnp.bfloat16),   # parity-decomposed h1
            pltpu.VMEM((R, P2 * P2, C2P), jnp.bfloat16),      # pooled conv2 out
        ],
        compiler_params=pltpu.CompilerParams(
            dimension_semantics=("arbitrary",),
            vmem_limit_bytes=32 * 1024 * 1024),
    )(x1, params["w1"], params["w2c"], params["b2c"],
      params["w1f"], params["b1f"], params["w2f"], params["b2f"])
    return preds[:, 0]


# ------------------------------------------------------------- JAX "glue" ----
def crop_resize(image_chw, rect, size):
    """torchvision.transforms.functional.crop + Resize (bilinear)."""
    left, top, width, height = rect
    crop = image_chw[:, top:top + height, left:left + width]
    # TODO(synk): torchvision Resize uses antialiased bilinear for tensors; plain
    # bilinear resize is used here.
    return jax.image.resize(crop, (image_chw.shape[0], size, size),
                            method="bilinear")


# ---------------------------------------------------------------- params -----
def init_params(key):
    ks = jax.random.split(key, 8)

    def w(kk, shape, scale):
        return jax.random.normal(kk, shape, jnp.float32) * scale

    # logical shapes: conv1 3->16, conv2 16->32, fc1 (4*4*32)->64, fc2 64->20
    conv1_w = w(ks[0], (27, 16), 0.10)            # rows k = (dy*3+dx)*3 + c
    conv1_b = w(ks[1], (16,), 0.05)
    conv2_w = w(ks[2], (9, 16, 32), 0.05)         # (tap, cin, cout)
    conv2_b = w(ks[3], (32,), 0.05)
    fc1_w = w(ks[4], (P2 * P2, 32, 64), 0.05)     # (spatial ab=H*W, cin, cout)
    fc1_b = w(ks[5], (64,), 0.05)
    fc2_w = w(ks[6], (64, NUM_CLASSES), 0.05)
    fc2_b = w(ks[7], (NUM_CLASSES,), 0.05)

    # TODO(synk): loading real PyTorch weights requires permuting Conv2d
    # (Cout,Cin,kh,kw) -> (kh*kw, Cin, Cout) and the Linear flatten order
    # (C,H,W) -> (H*W, C) before this zero-padding.
    w1 = jnp.zeros((CONV1_K, C1P), jnp.float32)
    w1 = w1.at[:27, :16].set(conv1_w).at[27, :16].set(conv1_b)   # bias on k=27
    w2c = jnp.zeros((9, C1P, C2P), jnp.float32).at[:, :16, :32].set(conv2_w)
    b2c = jnp.zeros((1, C2P), jnp.float32).at[0, :32].set(conv2_b)
    w1f = jnp.zeros((P2 * P2, C2P, F1P), jnp.float32).at[:, :32, :64].set(fc1_w)
    b1f = jnp.zeros((1, F1P), jnp.float32).at[0, :64].set(fc1_b)
    w2f = jnp.zeros((F1P, CLSP), jnp.float32).at[:64, :NUM_CLASSES].set(fc2_w)
    # padded class lanes get a huge negative bias so argmax never selects them
    b2f = jnp.full((1, CLSP), NEG_BIG, jnp.float32).at[0, :NUM_CLASSES].set(fc2_b)

    return {
        "w1": w1.astype(jnp.bfloat16),
        "w2c": w2c.astype(jnp.bfloat16), "b2c": b2c,
        "w1f": w1f.astype(jnp.bfloat16), "b1f": b1f,
        "w2f": w2f, "b2f": b2f,            # fc2 head kept in f32
    }


# -------------------------------------------------------------- forward ------
def rcnn_forward(images_nchw, params):
    """Returns (labeled_images, predictions), mirroring RCNN.forward."""
    B, C, H, W = images_nchw.shape
    NR = len(REGIONS)

    # batched proposal crop+resize: one vmapped resize per (static) rect
    crops = [jax.vmap(lambda img, r=rect: crop_resize(img, r, RESIZE))(images_nchw)
             for rect in REGIONS]                      # NR x [B, 3, RESIZE, RESIZE]
    x = jnp.stack(crops, axis=1).reshape(B * NR, C, RESIZE, RESIZE)
    x = jnp.transpose(x, (0, 2, 3, 1))                 # NHWC, [R, 16, 16, 3]

    x1 = conv1_im2col(x)                               # [4, 16, R, 16, 32] bf16
    preds = rcnn_fused(x1, params)                     # [R] int32
    predictions = preds.reshape(B, NR)                 # predictions[i][j]

    # labeled_images: [R, G, B, label] extended image (label plane is synthetic)
    label_plane = jnp.zeros((B, 1, H, W), images_nchw.dtype)
    labeled_images = jnp.concatenate([images_nchw, label_plane], axis=1)
    return labeled_images, predictions


# ------------------------------------------------------------------ main -----
if __name__ == "__main__":
    key = jax.random.PRNGKey(0)
    k_img, k_par = jax.random.split(key)

    images = jax.random.uniform(k_img, (2, 3, 32, 32), jnp.float32)  # NCHW
    params = init_params(k_par)

    fwd = jax.jit(rcnn_forward)
    labeled_images, predictions = fwd(images, params)
    jax.block_until_ready((labeled_images, predictions))

    assert labeled_images.shape == (2, 4, 32, 32)
    assert predictions.shape == (2, len(REGIONS))
    assert predictions.dtype == jnp.int32
    assert bool(jnp.all(predictions >= 0)) and bool(jnp.all(predictions < NUM_CLASSES))

    print("KERNEL_OK")
</pallas_src>

<mosaic_0001>
module attributes {stable_mosaic.version = 11 : i64} {
  func.func @_rcnn_fused_kernel(%arg0: i32, %arg1: memref<4x16x4x16x32xbf16, #tpu.memory_space<vmem>>, %arg2: memref<32x128xbf16, #tpu.memory_space<vmem>>, %arg3: memref<9x128x128xbf16, #tpu.memory_space<vmem>>, %arg4: memref<1x128xf32, #tpu.memory_space<vmem>>, %arg5: memref<16x128x128xbf16, #tpu.memory_space<vmem>>, %arg6: memref<1x128xf32, #tpu.memory_space<vmem>>, %arg7: memref<128x128xf32, #tpu.memory_space<vmem>>, %arg8: memref<1x128xf32, #tpu.memory_space<vmem>>, %arg9: memref<4x128xi32, #tpu.memory_space<vmem>>, %arg10: memref<4x4x64x128xbf16, #tpu.memory_space<vmem>>, %arg11: memref<4x16x128xbf16, #tpu.memory_space<vmem>>) attributes {dimension_semantics = [#tpu.dimension_semantics<arbitrary>], iteration_bounds = array<i64: 1>, scalar_prefetch = 0 : i64, scratch_operands = 2 : i64, tpu.core_type = #tpu.core_type<tc>, window_params = [{pipeline_mode = #tpu.pipeline_mode<synchronous>, transform_indices = @transform_0, window_bounds = array<i64: 4, 16, 4, 16, 32>}, {pipeline_mode = #tpu.pipeline_mode<synchronous>, transform_indices = @transform_1, window_bounds = array<i64: 32, 128>}, {pipeline_mode = #tpu.pipeline_mode<synchronous>, transform_indices = @transform_2, window_bounds = array<i64: 9, 128, 128>}, {pipeline_mode = #tpu.pipeline_mode<synchronous>, transform_indices = @transform_3, window_bounds = array<i64: 1, 128>}, {pipeline_mode = #tpu.pipeline_mode<synchronous>, transform_indices = @transform_4, window_bounds = array<i64: 16, 128, 128>}, {pipeline_mode = #tpu.pipeline_mode<synchronous>, transform_indices = @transform_5, window_bounds = array<i64: 1, 128>}, {pipeline_mode = #tpu.pipeline_mode<synchronous>, transform_indices = @transform_6, window_bounds = array<i64: 128, 128>}, {pipeline_mode = #tpu.pipeline_mode<synchronous>, transform_indices = @transform_7, window_bounds = array<i64: 1, 128>}, {pipeline_mode = #tpu.pipeline_mode<synchronous>, transform_indices = @transform_8, window_bounds = array<i64: 4, 128>}]} {
    %c0 = arith.constant 0 : index
    %c0_0 = arith.constant 0 : index
    %0 = vector.load %arg2[%c0, %c0_0] : memref<32x128xbf16, #tpu.memory_space<vmem>>, vector<32x128xbf16>
    %c0_1 = arith.constant 0 : index
    %c0_2 = arith.constant 0 : index
    %c0_3 = arith.constant 0 : index
    %c0_4 = arith.constant 0 : index
    %c0_5 = arith.constant 0 : index
    %1 = vector.load %arg1[%c0_1, %c0_2, %c0_3, %c0_4, %c0_5] : memref<4x16x4x16x32xbf16, #tpu.memory_space<vmem>>, vector<1x16x4x16x32xbf16>
    %2 = vector.shape_cast %1 : vector<1x16x4x16x32xbf16> to vector<16x4x16x32xbf16>
    %3 = vector.shape_cast %2 : vector<16x4x16x32xbf16> to vector<1024x32xbf16>
    %cst = arith.constant dense<0.000000e+00> : vector<1024x128xf32>
    %4 = tpu.matmul %3, %0, %cst {dimension_numbers = #tpu.dot_dimension_numbers<[1], [0], [0], [1], [0, 0, 1, 1], [], []>} : vector<1024x32xbf16>, vector<32x128xbf16>, vector<1024x128xf32> -> vector<1024x128xf32>
    %c1 = arith.constant 1 : index
    %c0_6 = arith.constant 0 : index
    %c0_7 = arith.constant 0 : index
    %c0_8 = arith.constant 0 : index
    %c0_9 = arith.constant 0 : index
    %5 = vector.load %arg1[%c1, %c0_6, %c0_7, %c0_8, %c0_9] : memref<4x16x4x16x32xbf16, #tpu.memory_space<vmem>>, vector<1x16x4x16x32xbf16>
    %6 = vector.shape_cast %5 : vector<1x16x4x16x32xbf16> to vector<16x4x16x32xbf16>
    %7 = vector.shape_cast %6 : vector<16x4x16x32xbf16> to vector<1024x32xbf16>
    %cst_10 = arith.constant dense<0.000000e+00> : vector<1024x128xf32>
    %8 = tpu.matmul %7, %0, %cst_10 {dimension_numbers = #tpu.dot_dimension_numbers<[1], [0], [0], [1], [0, 0, 1, 1], [], []>} : vector<1024x32xbf16>, vector<32x128xbf16>, vector<1024x128xf32> -> vector<1024x128xf32>
    %9 = arith.maximumf %4, %8 : vector<1024x128xf32>
    %c2 = arith.constant 2 : index
    %c0_11 = arith.constant 0 : index
    %c0_12 = arith.constant 0 : index
    %c0_13 = arith.constant 0 : index
    %c0_14 = arith.constant 0 : index
    %10 = vector.load %arg1[%c2, %c0_11, %c0_12, %c0_13, %c0_14] : memref<4x16x4x16x32xbf16, #tpu.memory_space<vmem>>, vector<1x16x4x16x32xbf16>
    %11 = vector.shape_cast %10 : vector<1x16x4x16x32xbf16> to vector<16x4x16x32xbf16>
    %12 = vector.shape_cast %11 : vector<16x4x16x32xbf16> to vector<1024x32xbf16>
    %cst_15 = arith.constant dense<0.000000e+00> : vector<1024x128xf32>
    %13 = tpu.matmul %12, %0, %cst_15 {dimension_numbers = #tpu.dot_dimension_numbers<[1], [0], [0], [1], [0, 0, 1, 1], [], []>} : vector<1024x32xbf16>, vector<32x128xbf16>, vector<1024x128xf32> -> vector<1024x128xf32>
    %14 = arith.maximumf %9, %13 : vector<1024x128xf32>
    %c3 = arith.constant 3 : index
    %c0_16 = arith.constant 0 : index
    %c0_17 = arith.constant 0 : index
    %c0_18 = arith.constant 0 : index
    %c0_19 = arith.constant 0 : index
    %15 = vector.load %arg1[%c3, %c0_16, %c0_17, %c0_18, %c0_19] : memref<4x16x4x16x32xbf16, #tpu.memory_space<vmem>>, vector<1x16x4x16x32xbf16>
    %16 = vector.shape_cast %15 : vector<1x16x4x16x32xbf16> to vector<16x4x16x32xbf16>
    %17 = vector.shape_cast %16 : vector<16x4x16x32xbf16> to vector<1024x32xbf16>
    %cst_20 = arith.constant dense<0.000000e+00> : vector<1024x128xf32>
    %18 = tpu.matmul %17, %0, %cst_20 {dimension_numbers = #tpu.dot_dimension_numbers<[1], [0], [0], [1], [0, 0, 1, 1], [], []>} : vector<1024x32xbf16>, vector<32x128xbf16>, vector<1024x128xf32> -> vector<1024x128xf32>
    %19 = arith.maximumf %14, %18 : vector<1024x128xf32>
    %cst_21 = arith.constant 0.000000e+00 : f32
    %20 = vector.broadcast %cst_21 : f32 to vector<1024x128xf32>
    %21 = arith.maximumf %19, %20 : vector<1024x128xf32>
    %22 = arith.truncf %21 : vector<1024x128xf32> to vector<1024x128xbf16>
    %23 = vector.shape_cast %22 : vector<1024x128xbf16> to vector<4x4x64x128xbf16>
    %c0_22 = arith.constant 0 : index
    %c0_23 = arith.constant 0 : index
    %c0_24 = arith.constant 0 : index
    %c0_25 = arith.constant 0 : index
    %24 = vector.load %arg10[%c0_22, %c0_23, %c0_24, %c0_25] : memref<4x4x64x128xbf16, #tpu.memory_space<vmem>>, vector<4x4x64x128xbf16>
    tpu.vector_store %arg10[%c0_22, %c0_23, %c0_24, %c0_25], %23 {strides = array<i32>} : memref<4x4x64x128xbf16, #tpu.memory_space<vmem>>, vector<4x4x64x128xbf16>,
    %cst_26 = arith.constant 0.000000e+00 : f32
    %25 = vector.broadcast %cst_26 : f32 to vector<256x128xf32>
    %c0_27 = arith.constant 0 : index
    %c0_28 = arith.constant 0 : index
    %c0_29 = arith.constant 0 : index
    %c0_30 = arith.constant 0 : index
    %26 = vector.load %arg10[%c0_27, %c0_28, %c0_29, %c0_30] : memref<4x4x64x128xbf16, #tpu.memory_space<vmem>>, vector<2x2x64x128xbf16>
    %27 = vector.shape_cast %26 : vector<2x2x64x128xbf16> to vector<256x128xbf16>
    %c0_31 = arith.constant 0 : index
    %c0_32 = arith.constant 0 : index
    %c0_33 = arith.constant 0 : index
    %28 = vector.load %arg3[%c0_31, %c0_32, %c0_33] : memref<9x128x128xbf16, #tpu.memory_space<vmem>>, vector<1x128x128xbf16>
    %29 = vector.shape_cast %28 : vector<1x128x128xbf16> to vector<128x128xbf16>
    %cst_34 = arith.constant dense<0.000000e+00> : vector<256x128xf32>
    %30 = tpu.matmul %27, %29, %cst_34 {dimension_numbers = #tpu.dot_dimension_numbers<[1], [0], [0], [1], [0, 0, 1, 1], [], []>} : vector<256x128xbf16>, vector<128x128xbf16>, vector<256x128xf32> -> vector<256x128xf32>
    %31 = arith.addf %25, %30 : vector<256x128xf32>
    %c0_35 = arith.constant 0 : index
    %c1_36 = arith.constant 1 : index
    %c0_37 = arith.constant 0 : index
    %c0_38 = arith.constant 0 : index
    %32 = vector.load %arg10[%c0_35, %c1_36, %c0_37, %c0_38] : memref<4x4x64x128xbf16, #tpu.memory_space<vmem>>, vector<2x2x64x128xbf16>
    %33 = vector.shape_cast %32 : vector<2x2x64x128xbf16> to vector<256x128xbf16>
    %c1_39 = arith.constant 1 : index
    %c0_40 = arith.constant 0 : index
    %c0_41 = arith.constant 0 : index
    %34 = vector.load %arg3[%c1_39, %c0_40, %c0_41] : memref<9x128x128xbf16, #tpu.memory_space<vmem>>, vector<1x128x128xbf16>
    %35 = vector.shape_cast %34 : vector<1x128x128xbf16> to vector<128x128xbf16>
    %cst_42 = arith.constant dense<0.000000e+00> : vector<256x128xf32>
    %36 = tpu.matmul %33, %35, %cst_42 {dimension_numbers = #tpu.dot_dimension_numbers<[1], [0], [0], [1], [0, 0, 1, 1], [], []>} : vector<256x128xbf16>, vector<128x128xbf16>, vector<256x128xf32> -> vector<256x128xf32>
    %37 = arith.addf %31, %36 : vector<256x128xf32>
    %c0_43 = arith.constant 0 : index
    %c2_44 = arith.constant 2 : index
    %c0_45 = arith.constant 0 : index
    %c0_46 = arith.constant 0 : index
    %38 = vector.load %arg10[%c0_43, %c2_44, %c0_45, %c0_46] : memref<4x4x64x128xbf16, #tpu.memory_space<vmem>>, vector<2x2x64x128xbf16>
    %39 = vector.shape_cast %38 : vector<2x2x64x128xbf16> to vector<256x128xbf16>
    %c2_47 = arith.constant 2 : index
    %c0_48 = arith.constant 0 : index
    %c0_49 = arith.constant 0 : index
    %40 = vector.load %arg3[%c2_47, %c0_48, %c0_49] : memref<9x128x128xbf16, #tpu.memory_space<vmem>>, vector<1x128x128xbf16>
    %41 = vector.shape_cast %40 : vector<1x128x128xbf16> to vector<128x128xbf16>
    %cst_50 = arith.constant dense<0.000000e+00> : vector<256x128xf32>
    %42 = tpu.matmul %39, %41, %cst_50 {dimension_numbers = #tpu.dot_dimension_numbers<[1], [0], [0], [1], [0, 0, 1, 1], [], []>} : vector<256x128xbf16>, vector<128x128xbf16>, vector<256x128xf32> -> vector<256x128xf32>
    %43 = arith.addf %37, %42 : vector<256x128xf32>
    %c1_51 = arith.constant 1 : index
    %c0_52 = arith.constant 0 : index
    %c0_53 = arith.constant 0 : index
    %c0_54 = arith.constant 0 : index
    %44 = vector.load %arg10[%c1_51, %c0_52, %c0_53, %c0_54] : memref<4x4x64x128xbf16, #tpu.memory_space<vmem>>, vector<2x2x64x128xbf16>
    %45 = vector.shape_cast %44 : vector<2x2x64x128xbf16> to vector<256x128xbf16>
    %c3_55 = arith.constant 3 : index
    %c0_56 = arith.constant 0 : index
    %c0_57 = arith.constant 0 : index
    %46 = vector.load %arg3[%c3_55, %c0_56, %c0_57] : memref<9x128x128xbf16, #tpu.memory_space<vmem>>, vector<1x128x128xbf16>
    %47 = vector.shape_cast %46 : vector<1x128x128xbf16> to vector<128x128xbf16>
    %cst_58 = arith.constant dense<0.000000e+00> : vector<256x128xf32>
    %48 = tpu.matmul %45, %47, %cst_58 {dimension_numbers = #tpu.dot_dimension_numbers<[1], [0], [0], [1], [0, 0, 1, 1], [], []>} : vector<256x128xbf16>, vector<128x128xbf16>, vector<256x128xf32> -> vector<256x128xf32>
    %49 = arith.addf %43, %48 : vector<256x128xf32>
    %c1_59 = arith.constant 1 : index
    %c1_60 = arith.constant 1 : index
    %c0_61 = arith.constant 0 : index
    %c0_62 = arith.constant 0 : index
    %50 = vector.load %arg10[%c1_59, %c1_60, %c0_61, %c0_62] : memref<4x4x64x128xbf16, #tpu.memory_space<vmem>>, vector<2x2x64x128xbf16>
    %51 = vector.shape_cast %50 : vector<2x2x64x128xbf16> to vector<256x128xbf16>
    %c4 = arith.constant 4 : index
    %c0_63 = arith.constant 0 : index
    %c0_64 = arith.constant 0 : index
    %52 = vector.load %arg3[%c4, %c0_63, %c0_64] : memref<9x128x128xbf16, #tpu.memory_space<vmem>>, vector<1x128x128xbf16>
    %53 = vector.shape_cast %52 : vector<1x128x128xbf16> to vector<128x128xbf16>
    %cst_65 = arith.constant dense<0.000000e+00> : vector<256x128xf32>
    %54 = tpu.matmul %51, %53, %cst_65 {dimension_numbers = #tpu.dot_dimension_numbers<[1], [0], [0], [1], [0, 0, 1, 1], [], []>} : vector<256x128xbf16>, vector<128x128xbf16>, vector<256x128xf32> -> vector<256x128xf32>
    %55 = arith.addf %49, %54 : vector<256x128xf32>
    %c1_66 = arith.constant 1 : index
    %c2_67 = arith.constant 2 : index
    %c0_68 = arith.constant 0 : index
    %c0_69 = arith.constant 0 : index
    %56 = vector.load %arg10[%c1_66, %c2_67, %c0_68, %c0_69] : memref<4x4x64x128xbf16, #tpu.memory_space<vmem>>, vector<2x2x64x128xbf16>
    %57 = vector.shape_cast %56 : vector<2x2x64x128xbf16> to vector<256x128xbf16>
    %c5 = arith.constant 5 : index
    %c0_70 = arith.constant 0 : index
    %c0_71 = arith.constant 0 : index
    %58 = vector.load %arg3[%c5, %c0_70, %c0_71] : memref<9x128x128xbf16, #tpu.memory_space<vmem>>, vector<1x128x128xbf16>
    %59 = vector.shape_cast %58 : vector<1x128x128xbf16> to vector<128x128xbf16>
    %cst_72 = arith.constant dense<0.000000e+00> : vector<256x128xf32>
    %60 = tpu.matmul %57, %59, %cst_72 {dimension_numbers = #tpu.dot_dimension_numbers<[1], [0], [0], [1], [0, 0, 1, 1], [], []>} : vector<256x128xbf16>, vector<128x128xbf16>, vector<256x128xf32> -> vector<256x128xf32>
    %61 = arith.addf %55, %60 : vector<256x128xf32>
    %c2_73 = arith.constant 2 : index
    %c0_74 = arith.constant 0 : index
    %c0_75 = arith.constant 0 : index
    %c0_76 = arith.constant 0 : index
    %62 = vector.load %arg10[%c2_73, %c0_74, %c0_75, %c0_76] : memref<4x4x64x128xbf16, #tpu.memory_space<vmem>>, vector<2x2x64x128xbf16>
    %63 = vector.shape_cast %62 : vector<2x2x64x128xbf16> to vector<256x128xbf16>
    %c6 = arith.constant 6 : index
    %c0_77 = arith.constant 0 : index
    %c0_78 = arith.constant 0 : index
    %64 = vector.load %arg3[%c6, %c0_77, %c0_78] : memref<9x128x128xbf16, #tpu.memory_space<vmem>>, vector<1x128x128xbf16>
    %65 = vector.shape_cast %64 : vector<1x128x128xbf16> to vector<128x128xbf16>
    %cst_79 = arith.constant dense<0.000000e+00> : vector<256x128xf32>
    %66 = tpu.matmul %63, %65, %cst_79 {dimension_numbers = #tpu.dot_dimension_numbers<[1], [0], [0], [1], [0, 0, 1, 1], [], []>} : vector<256x128xbf16>, vector<128x128xbf16>, vector<256x128xf32> -> vector<256x128xf32>
    %67 = arith.addf %61, %66 : vector<256x128xf32>
    %c2_80 = arith.constant 2 : index
    %c1_81 = arith.constant 1 : index
    %c0_82 = arith.constant 0 : index
    %c0_83 = arith.constant 0 : index
    %68 = vector.load %arg10[%c2_80, %c1_81, %c0_82, %c0_83] : memref<4x4x64x128xbf16, #tpu.memory_space<vmem>>, vector<2x2x64x128xbf16>
    %69 = vector.shape_cast %68 : vector<2x2x64x128xbf16> to vector<256x128xbf16>
    %c7 = arith.constant 7 : index
    %c0_84 = arith.constant 0 : index
    %c0_85 = arith.constant 0 : index
    %70 = vector.load %arg3[%c7, %c0_84, %c0_85] : memref<9x128x128xbf16, #tpu.memory_space<vmem>>, vector<1x128x128xbf16>
    %71 = vector.shape_cast %70 : vector<1x128x128xbf16> to vector<128x128xbf16>
    %cst_86 = arith.constant dense<0.000000e+00> : vector<256x128xf32>
    %72 = tpu.matmul %69, %71, %cst_86 {dimension_numbers = #tpu.dot_dimension_numbers<[1], [0], [0], [1], [0, 0, 1, 1], [], []>} : vector<256x128xbf16>, vector<128x128xbf16>, vector<256x128xf32> -> vector<256x128xf32>
    %73 = arith.addf %67, %72 : vector<256x128xf32>
    %c2_87 = arith.constant 2 : index
    %c2_88 = arith.constant 2 : index
    %c0_89 = arith.constant 0 : index
    %c0_90 = arith.constant 0 : index
    %74 = vector.load %arg10[%c2_87, %c2_88, %c0_89, %c0_90] : memref<4x4x64x128xbf16, #tpu.memory_space<vmem>>, vector<2x2x64x128xbf16>
    %75 = vector.shape_cast %74 : vector<2x2x64x128xbf16> to vector<256x128xbf16>
    %c8 = arith.constant 8 : index
    %c0_91 = arith.constant 0 : index
    %c0_92 = arith.constant 0 : index
    %76 = vector.load %arg3[%c8, %c0_91, %c0_92] : memref<9x128x128xbf16, #tpu.memory_space<vmem>>, vector<1x128x128xbf16>
    %77 = vector.shape_cast %76 : vector<1x128x128xbf16> to vector<128x128xbf16>
    %cst_93 = arith.constant dense<0.000000e+00> : vector<256x128xf32>
    %78 = tpu.matmul %75, %77, %cst_93 {dimension_numbers = #tpu.dot_dimension_numbers<[1], [0], [0], [1], [0, 0, 1, 1], [], []>} : vector<256x128xbf16>, vector<128x128xbf16>, vector<256x128xf32> -> vector<256x128xf32>
    %79 = arith.addf %73, %78 : vector<256x128xf32>
    %80 = vector.shape_cast %79 : vector<256x128xf32> to vector<4x64x128xf32>
    %cst_94 = arith.constant dense<0xFF800000> : vector<64x128xf32>
    %81 = vector.multi_reduction <maximumf>, %80, %cst_94 [0] : vector<4x64x128xf32> to vector<64x128xf32>
    %c0_95 = arith.constant 0 : index
    %c0_96 = arith.constant 0 : index
    %82 = vector.load %arg4[%c0_95, %c0_96] : memref<1x128xf32, #tpu.memory_space<vmem>>, vector<1x128xf32>
    %83 = vector.broadcast %82 : vector<1x128xf32> to vector<64x128xf32>
    %84 = arith.addf %81, %83 : vector<64x128xf32>
    %cst_97 = arith.constant 0.000000e+00 : f32
    %85 = vector.broadcast %cst_97 : f32 to vector<64x128xf32>
    %86 = arith.maximumf %84, %85 : vector<64x128xf32>
    %87 = arith.truncf %86 : vector<64x128xf32> to vector<64x128xbf16>
    %88 = vector.shape_cast %87 : vector<64x128xbf16> to vector<4x16x128xbf16>
    %c0_98 = arith.constant 0 : index
    %c0_99 = arith.constant 0 : index
    %c0_100 = arith.constant 0 : index
    %89 = vector.load %arg11[%c0_98, %c0_99, %c0_100] : memref<4x16x128xbf16, #tpu.memory_space<vmem>>, vector<4x16x128xbf16>
    tpu.vector_store %arg11[%c0_98, %c0_99, %c0_100], %88 {strides = array<i32>} : memref<4x16x128xbf16, #tpu.memory_space<vmem>>, vector<4x16x128xbf16>,
    %cst_101 = arith.constant 0.000000e+00 : f32
    %90 = vector.broadcast %cst_101 : f32 to vector<4x128xf32>
    %c0_102 = arith.constant 0 : index
    %c0_103 = arith.constant 0 : index
    %c0_104 = arith.constant 0 : index
    %91 = vector.load %arg11[%c0_102, %c0_103, %c0_104] : memref<4x16x128xbf16, #tpu.memory_space<vmem>>, vector<4x1x128xbf16>
    %92 = vector.shape_cast %91 : vector<4x1x128xbf16> to vector<4x128xbf16>
    %c0_105 = arith.constant 0 : index
    %c0_106 = arith.constant 0 : index
    %c0_107 = arith.constant 0 : index
    %93 = vector.load %arg5[%c0_105, %c0_106, %c0_107] : memref<16x128x128xbf16, #tpu.memory_space<vmem>>, vector<1x128x128xbf16>
    %94 = vector.shape_cast %93 : vector<1x128x128xbf16> to vector<128x128xbf16>
    %cst_108 = arith.constant dense<0.000000e+00> : vector<4x128xf32>
    %95 = tpu.matmul %92, %94, %cst_108 {dimension_numbers = #tpu.dot_dimension_numbers<[1], [0], [0], [1], [0, 0, 1, 1], [], []>} : vector<4x128xbf16>, vector<128x128xbf16>, vector<4x128xf32> -> vector<4x128xf32>
    %96 = arith.addf %90, %95 : vector<4x128xf32>
    %c0_109 = arith.constant 0 : index
    %c1_110 = arith.constant 1 : index
    %c0_111 = arith.constant 0 : index
    %97 = vector.load %arg11[%c0_109, %c1_110, %c0_111] : memref<4x16x128xbf16, #tpu.memory_space<vmem>>, vector<4x1x128xbf16>
    %98 = vector.shape_cast %97 : vector<4x1x128xbf16> to vector<4x128xbf16>
    %c1_112 = arith.constant 1 : index
    %c0_113 = arith.constant 0 : index
    %c0_114 = arith.constant 0 : index
    %99 = vector.load %arg5[%c1_112, %c0_113, %c0_114] : memref<16x128x128xbf16, #tpu.memory_space<vmem>>, vector<1x128x128xbf16>
    %100 = vector.shape_cast %99 : vector<1x128x128xbf16> to vector<128x128xbf16>
    %cst_115 = arith.constant dense<0.000000e+00> : vector<4x128xf32>
    %101 = tpu.matmul %98, %100, %cst_115 {dimension_numbers = #tpu.dot_dimension_numbers<[1], [0], [0], [1], [0, 0, 1, 1], [], []>} : vector<4x128xbf16>, vector<128x128xbf16>, vector<4x128xf32> -> vector<4x128xf32>
    %102 = arith.addf %96, %101 : vector<4x128xf32>
    %c0_116 = arith.constant 0 : index
    %c2_117 = arith.constant 2 : index
    %c0_118 = arith.constant 0 : index
    %103 = vector.load %arg11[%c0_116, %c2_117, %c0_118] : memref<4x16x128xbf16, #tpu.memory_space<vmem>>, vector<4x1x128xbf16>
    %104 = vector.shape_cast %103 : vector<4x1x128xbf16> to vector<4x128xbf16>
    %c2_119 = arith.constant 2 : index
    %c0_120 = arith.constant 0 : index
    %c0_121 = arith.constant 0 : index
    %105 = vector.load %arg5[%c2_119, %c0_120, %c0_121] : memref<16x128x128xbf16, #tpu.memory_space<vmem>>, vector<1x128x128xbf16>
    %106 = vector.shape_cast %105 : vector<1x128x128xbf16> to vector<128x128xbf16>
    %cst_122 = arith.constant dense<0.000000e+00> : vector<4x128xf32>
    %107 = tpu.matmul %104, %106, %cst_122 {dimension_numbers = #tpu.dot_dimension_numbers<[1], [0], [0], [1], [0, 0, 1, 1], [], []>} : vector<4x128xbf16>, vector<128x128xbf16>, vector<4x128xf32> -> vector<4x128xf32>
    %108 = arith.addf %102, %107 : vector<4x128xf32>
    %c0_123 = arith.constant 0 : index
    %c3_124 = arith.constant 3 : index
    %c0_125 = arith.constant 0 : index
    %109 = vector.load %arg11[%c0_123, %c3_124, %c0_125] : memref<4x16x128xbf16, #tpu.memory_space<vmem>>, vector<4x1x128xbf16>
    %110 = vector.shape_cast %109 : vector<4x1x128xbf16> to vector<4x128xbf16>
    %c3_126 = arith.constant 3 : index
    %c0_127 = arith.constant 0 : index
    %c0_128 = arith.constant 0 : index
    %111 = vector.load %arg5[%c3_126, %c0_127, %c0_128] : memref<16x128x128xbf16, #tpu.memory_space<vmem>>, vector<1x128x128xbf16>
    %112 = vector.shape_cast %111 : vector<1x128x128xbf16> to vector<128x128xbf16>
    %cst_129 = arith.constant dense<0.000000e+00> : vector<4x128xf32>
    %113 = tpu.matmul %110, %112, %cst_129 {dimension_numbers = #tpu.dot_dimension_numbers<[1], [0], [0], [1], [0, 0, 1, 1], [], []>} : vector<4x128xbf16>, vector<128x128xbf16>, vector<4x128xf32> -> vector<4x128xf32>
    %114 = arith.addf %108, %113 : vector<4x128xf32>
    %c0_130 = arith.constant 0 : index
    %c4_131 = arith.constant 4 : index
    %c0_132 = arith.constant 0 : index
    %115 = vector.load %arg11[%c0_130, %c4_131, %c0_132] : memref<4x16x128xbf16, #tpu.memory_space<vmem>>, vector<4x1x128xbf16>
    %116 = vector.shape_cast %115 : vector<4x1x128xbf16> to vector<4x128xbf16>
    %c4_133 = arith.constant 4 : index
    %c0_134 = arith.constant 0 : index
    %c0_135 = arith.constant 0 : index
    %117 = vector.load %arg5[%c4_133, %c0_134, %c0_135] : memref<16x128x128xbf16, #tpu.memory_space<vmem>>, vector<1x128x128xbf16>
    %118 = vector.shape_cast %117 : vector<1x128x128xbf16> to vector<128x128xbf16>
    %cst_136 = arith.constant dense<0.000000e+00> : vector<4x128xf32>
    %119 = tpu.matmul %116, %118, %cst_136 {dimension_numbers = #tpu.dot_dimension_numbers<[1], [0], [0], [1], [0, 0, 1, 1], [], []>} : vector<4x128xbf16>, vector<128x128xbf16>, vector<4x128xf32> -> vector<4x128xf32>
    %120 = arith.addf %114, %119 : vector<4x128xf32>
    %c0_137 = arith.constant 0 : index
    %c5_138 = arith.constant 5 : index
    %c0_139 = arith.constant 0 : index
    %121 = vector.load %arg11[%c0_137, %c5_138, %c0_139] : memref<4x16x128xbf16, #tpu.memory_space<vmem>>, vector<4x1x128xbf16>
    %122 = vector.shape_cast %121 : vector<4x1x128xbf16> to vector<4x128xbf16>
    %c5_140 = arith.constant 5 : index
    %c0_141 = arith.constant 0 : index
    %c0_142 = arith.constant 0 : index
    %123 = vector.load %arg5[%c5_140, %c0_141, %c0_142] : memref<16x128x128xbf16, #tpu.memory_space<vmem>>, vector<1x128x128xbf16>
    %124 = vector.shape_cast %123 : vector<1x128x128xbf16> to vector<128x128xbf16>
    %cst_143 = arith.constant dense<0.000000e+00> : vector<4x128xf32>
    %125 = tpu.matmul %122, %124, %cst_143 {dimension_numbers = #tpu.dot_dimension_numbers<[1], [0], [0], [1], [0, 0, 1, 1], [], []>} : vector<4x128xbf16>, vector<128x128xbf16>, vector<4x128xf32> -> vector<4x128xf32>
    %126 = arith.addf %120, %125 : vector<4x128xf32>
    %c0_144 = arith.constant 0 : index
    %c6_145 = arith.constant 6 : index
    %c0_146 = arith.constant 0 : index
    %127 = vector.load %arg11[%c0_144, %c6_145, %c0_146] : memref<4x16x128xbf16, #tpu.memory_space<vmem>>, vector<4x1x128xbf16>
    %128 = vector.shape_cast %127 : vector<4x1x128xbf16> to vector<4x128xbf16>
    %c6_147 = arith.constant 6 : index
    %c0_148 = arith.constant 0 : index
    %c0_149 = arith.constant 0 : index
    %129 = vector.load %arg5[%c6_147, %c0_148, %c0_149] : memref<16x128x128xbf16, #tpu.memory_space<vmem>>, vector<1x128x128xbf16>
    %130 = vector.shape_cast %129 : vector<1x128x128xbf16> to vector<128x128xbf16>
    %cst_150 = arith.constant dense<0.000000e+00> : vector<4x128xf32>
    %131 = tpu.matmul %128, %130, %cst_150 {dimension_numbers = #tpu.dot_dimension_numbers<[1], [0], [0], [1], [0, 0, 1, 1], [], []>} : vector<4x128xbf16>, vector<128x128xbf16>, vector<4x128xf32> -> vector<4x128xf32>
    %132 = arith.addf %126, %131 : vector<4x128xf32>
    %c0_151 = arith.constant 0 : index
    %c7_152 = arith.constant 7 : index
    %c0_153 = arith.constant 0 : index
    %133 = vector.load %arg11[%c0_151, %c7_152, %c0_153] : memref<4x16x128xbf16, #tpu.memory_space<vmem>>, vector<4x1x128xbf16>
    %134 = vector.shape_cast %133 : vector<4x1x128xbf16> to vector<4x128xbf16>
    %c7_154 = arith.constant 7 : index
    %c0_155 = arith.constant 0 : index
    %c0_156 = arith.constant 0 : index
    %135 = vector.load %arg5[%c7_154, %c0_155, %c0_156] : memref<16x128x128xbf16, #tpu.memory_space<vmem>>, vector<1x128x128xbf16>
    %136 = vector.shape_cast %135 : vector<1x128x128xbf16> to vector<128x128xbf16>
    %cst_157 = arith.constant dense<0.000000e+00> : vector<4x128xf32>
    %137 = tpu.matmul %134, %136, %cst_157 {dimension_numbers = #tpu.dot_dimension_numbers<[1], [0], [0], [1], [0, 0, 1, 1], [], []>} : vector<4x128xbf16>, vector<128x128xbf16>, vector<4x128xf32> -> vector<4x128xf32>
    %138 = arith.addf %132, %137 : vector<4x128xf32>
    %c0_158 = arith.constant 0 : index
    %c8_159 = arith.constant 8 : index
    %c0_160 = arith.constant 0 : index
    %139 = vector.load %arg11[%c0_158, %c8_159, %c0_160] : memref<4x16x128xbf16, #tpu.memory_space<vmem>>, vector<4x1x128xbf16>
    %140 = vector.shape_cast %139 : vector<4x1x128xbf16> to vector<4x128xbf16>
    %c8_161 = arith.constant 8 : index
    %c0_162 = arith.constant 0 : index
    %c0_163 = arith.constant 0 : index
    %141 = vector.load %arg5[%c8_161, %c0_162, %c0_163] : memref<16x128x128xbf16, #tpu.memory_space<vmem>>, vector<1x128x128xbf16>
    %142 = vector.shape_cast %141 : vector<1x128x128xbf16> to vector<128x128xbf16>
    %cst_164 = arith.constant dense<0.000000e+00> : vector<4x128xf32>
    %143 = tpu.matmul %140, %142, %cst_164 {dimension_numbers = #tpu.dot_dimension_numbers<[1], [0], [0], [1], [0, 0, 1, 1], [], []>} : vector<4x128xbf16>, vector<128x128xbf16>, vector<4x128xf32> -> vector<4x128xf32>
    %144 = arith.addf %138, %143 : vector<4x128xf32>
    %c0_165 = arith.constant 0 : index
    %c9 = arith.constant 9 : index
    %c0_166 = arith.constant 0 : index
    %145 = vector.load %arg11[%c0_165, %c9, %c0_166] : memref<4x16x128xbf16, #tpu.memory_space<vmem>>, vector<4x1x128xbf16>
    %146 = vector.shape_cast %145 : vector<4x1x128xbf16> to vector<4x128xbf16>
    %c9_167 = arith.constant 9 : index
    %c0_168 = arith.constant 0 : index
    %c0_169 = arith.constant 0 : index
    %147 = vector.load %arg5[%c9_167, %c0_168, %c0_169] : memref<16x128x128xbf16, #tpu.memory_space<vmem>>, vector<1x128x128xbf16>
    %148 = vector.shape_cast %147 : vector<1x128x128xbf16> to vector<128x128xbf16>
    %cst_170 = arith.constant dense<0.000000e+00> : vector<4x128xf32>
    %149 = tpu.matmul %146, %148, %cst_170 {dimension_numbers = #tpu.dot_dimension_numbers<[1], [0], [0], [1], [0, 0, 1, 1], [], []>} : vector<4x128xbf16>, vector<128x128xbf16>, vector<4x128xf32> -> vector<4x128xf32>
    %150 = arith.addf %144, %149 : vector<4x128xf32>
    %c0_171 = arith.constant 0 : index
    %c10 = arith.constant 10 : index
    %c0_172 = arith.constant 0 : index
    %151 = vector.load %arg11[%c0_171, %c10, %c0_172] : memref<4x16x128xbf16, #tpu.memory_space<vmem>>, vector<4x1x128xbf16>
    %152 = vector.shape_cast %151 : vector<4x1x128xbf16> to vector<4x128xbf16>
    %c10_173 = arith.constant 10 : index
    %c0_174 = arith.constant 0 : index
    %c0_175 = arith.constant 0 : index
    %153 = vector.load %arg5[%c10_173, %c0_174, %c0_175] : memref<16x128x128xbf16, #tpu.memory_space<vmem>>, vector<1x128x128xbf16>
    %154 = vector.shape_cast %153 : vector<1x128x128xbf16> to vector<128x128xbf16>
    %cst_176 = arith.constant dense<0.000000e+00> : vector<4x128xf32>
    %155 = tpu.matmul %152, %154, %cst_176 {dimension_numbers = #tpu.dot_dimension_numbers<[1], [0], [0], [1], [0, 0, 1, 1], [], []>} : vector<4x128xbf16>, vector<128x128xbf16>, vector<4x128xf32> -> vector<4x128xf32>
    %156 = arith.addf %150, %155 : vector<4x128xf32>
    %c0_177 = arith.constant 0 : index
    %c11 = arith.constant 11 : index
    %c0_178 = arith.constant 0 : index
    %157 = vector.load %arg11[%c0_177, %c11, %c0_178] : memref<4x16x128xbf16, #tpu.memory_space<vmem>>, vector<4x1x128xbf16>
    %158 = vector.shape_cast %157 : vector<4x1x128xbf16> to vector<4x128xbf16>
    %c11_179 = arith.constant 11 : index
    %c0_180 = arith.constant 0 : index
    %c0_181 = arith.constant 0 : index
    %159 = vector.load %arg5[%c11_179, %c0_180, %c0_181] : memref<16x128x128xbf16, #tpu.memory_space<vmem>>, vector<1x128x128xbf16>
    %160 = vector.shape_cast %159 : vector<1x128x128xbf16> to vector<128x128xbf16>
    %cst_182 = arith.constant dense<0.000000e+00> : vector<4x128xf32>
    %161 = tpu.matmul %158, %160, %cst_182 {dimension_numbers = #tpu.dot_dimension_numbers<[1], [0], [0], [1], [0, 0, 1, 1], [], []>} : vector<4x128xbf16>, vector<128x128xbf16>, vector<4x128xf32> -> vector<4x128xf32>
    %162 = arith.addf %156, %161 : vector<4x128xf32>
    %c0_183 = arith.constant 0 : index
    %c12 = arith.constant 12 : index
    %c0_184 = arith.constant 0 : index
    %163 = vector.load %arg11[%c0_183, %c12, %c0_184] : memref<4x16x128xbf16, #tpu.memory_space<vmem>>, vector<4x1x128xbf16>
    %164 = vector.shape_cast %163 : vector<4x1x128xbf16> to vector<4x128xbf16>
    %c12_185 = arith.constant 12 : index
    %c0_186 = arith.constant 0 : index
    %c0_187 = arith.constant 0 : index
    %165 = vector.load %arg5[%c12_185, %c0_186, %c0_187] : memref<16x128x128xbf16, #tpu.memory_space<vmem>>, vector<1x128x128xbf16>
    %166 = vector.shape_cast %165 : vector<1x128x128xbf16> to vector<128x128xbf16>
    %cst_188 = arith.constant dense<0.000000e+00> : vector<4x128xf32>
    %167 = tpu.matmul %164, %166, %cst_188 {dimension_numbers = #tpu.dot_dimension_numbers<[1], [0], [0], [1], [0, 0, 1, 1], [], []>} : vector<4x128xbf16>, vector<128x128xbf16>, vector<4x128xf32> -> vector<4x128xf32>
    %168 = arith.addf %162, %167 : vector<4x128xf32>
    %c0_189 = arith.constant 0 : index
    %c13 = arith.constant 13 : index
    %c0_190 = arith.constant 0 : index
    %169 = vector.load %arg11[%c0_189, %c13, %c0_190] : memref<4x16x128xbf16, #tpu.memory_space<vmem>>, vector<4x1x128xbf16>
    %170 = vector.shape_cast %169 : vector<4x1x128xbf16> to vector<4x128xbf16>
    %c13_191 = arith.constant 13 : index
    %c0_192 = arith.constant 0 : index
    %c0_193 = arith.constant 0 : index
    %171 = vector.load %arg5[%c13_191, %c0_192, %c0_193] : memref<16x128x128xbf16, #tpu.memory_space<vmem>>, vector<1x128x128xbf16>
    %172 = vector.shape_cast %171 : vector<1x128x128xbf16> to vector<128x128xbf16>
    %cst_194 = arith.constant dense<0.000000e+00> : vector<4x128xf32>
    %173 = tpu.matmul %170, %172, %cst_194 {dimension_numbers = #tpu.dot_dimension_numbers<[1], [0], [0], [1], [0, 0, 1, 1], [], []>} : vector<4x128xbf16>, vector<128x128xbf16>, vector<4x128xf32> -> vector<4x128xf32>
    %174 = arith.addf %168, %173 : vector<4x128xf32>
    %c0_195 = arith.constant 0 : index
    %c14 = arith.constant 14 : index
    %c0_196 = arith.constant 0 : index
    %175 = vector.load %arg11[%c0_195, %c14, %c0_196] : memref<4x16x128xbf16, #tpu.memory_space<vmem>>, vector<4x1x128xbf16>
    %176 = vector.shape_cast %175 : vector<4x1x128xbf16> to vector<4x128xbf16>
    %c14_197 = arith.constant 14 : index
    %c0_198 = arith.constant 0 : index
    %c0_199 = arith.constant 0 : index
    %177 = vector.load %arg5[%c14_197, %c0_198, %c0_199] : memref<16x128x128xbf16, #tpu.memory_space<vmem>>, vector<1x128x128xbf16>
    %178 = vector.shape_cast %177 : vector<1x128x128xbf16> to vector<128x128xbf16>
    %cst_200 = arith.constant dense<0.000000e+00> : vector<4x128xf32>
    %179 = tpu.matmul %176, %178, %cst_200 {dimension_numbers = #tpu.dot_dimension_numbers<[1], [0], [0], [1], [0, 0, 1, 1], [], []>} : vector<4x128xbf16>, vector<128x128xbf16>, vector<4x128xf32> -> vector<4x128xf32>
    %180 = arith.addf %174, %179 : vector<4x128xf32>
    %c0_201 = arith.constant 0 : index
    %c15 = arith.constant 15 : index
    %c0_202 = arith.constant 0 : index
    %181 = vector.load %arg11[%c0_201, %c15, %c0_202] : memref<4x16x128xbf16, #tpu.memory_space<vmem>>, vector<4x1x128xbf16>
    %182 = vector.shape_cast %181 : vector<4x1x128xbf16> to vector<4x128xbf16>
    %c15_203 = arith.constant 15 : index
    %c0_204 = arith.constant 0 : index
    %c0_205 = arith.constant 0 : index
    %183 = vector.load %arg5[%c15_203, %c0_204, %c0_205] : memref<16x128x128xbf16, #tpu.memory_space<vmem>>, vector<1x128x128xbf16>
    %184 = vector.shape_cast %183 : vector<1x128x128xbf16> to vector<128x128xbf16>
    %cst_206 = arith.constant dense<0.000000e+00> : vector<4x128xf32>
    %185 = tpu.matmul %182, %184, %cst_206 {dimension_numbers = #tpu.dot_dimension_numbers<[1], [0], [0], [1], [0, 0, 1, 1], [], []>} : vector<4x128xbf16>, vector<128x128xbf16>, vector<4x128xf32> -> vector<4x128xf32>
    %186 = arith.addf %180, %185 : vector<4x128xf32>
    %c0_207 = arith.constant 0 : index
    %c0_208 = arith.constant 0 : index
    %187 = vector.load %arg6[%c0_207, %c0_208] : memref<1x128xf32, #tpu.memory_space<vmem>>, vector<1x128xf32>
    %188 = vector.broadcast %187 : vector<1x128xf32> to vector<4x128xf32>
    %189 = arith.addf %186, %188 : vector<4x128xf32>
    %cst_209 = arith.constant 0.000000e+00 : f32
    %190 = vector.broadcast %cst_209 : f32 to vector<4x128xf32>
    %191 = arith.maximumf %189, %190 : vector<4x128xf32>
    %c0_210 = arith.constant 0 : index
    %c0_211 = arith.constant 0 : index
    %192 = vector.load %arg7[%c0_210, %c0_211] : memref<128x128xf32, #tpu.memory_space<vmem>>, vector<128x128xf32>
    %cst_212 = arith.constant dense<0.000000e+00> : vector<4x128xf32>
    %193 = tpu.matmul %191, %192, %cst_212 {dimension_numbers = #tpu.dot_dimension_numbers<[1], [0], [0], [1], [0, 0, 1, 1], [], []>} : vector<4x128xf32>, vector<128x128xf32>, vector<4x128xf32> -> vector<4x128xf32>
    %c0_213 = arith.constant 0 : index
    %c0_214 = arith.constant 0 : index
    %194 = vector.load %arg8[%c0_213, %c0_214] : memref<1x128xf32, #tpu.memory_space<vmem>>, vector<1x128xf32>
    %195 = vector.broadcast %194 : vector<1x128xf32> to vector<4x128xf32>
    %196 = arith.addf %193, %195 : vector<4x128xf32>
    %197 = tpu.iota {dimensions = array<i32: 1>} : vector<4x128xi32>
    %cst_215 = arith.constant dense<0xFF800000> : vector<4xf32>
    %198 = vector.multi_reduction <maximumf>, %196, %cst_215 [1] : vector<4x128xf32> to vector<4xf32>
    %199 = vector.shape_cast %198 : vector<4xf32> to vector<4x1xf32>
    %200 = vector.broadcast %199 : vector<4x1xf32> to vector<4x128xf32>
    %201 = arith.cmpf oeq, %196, %200 : vector<4x128xf32>
    %c128_i32 = arith.constant 128 : i32
    %202 = vector.broadcast %c128_i32 : i32 to vector<4x128xi32>
    %203 = arith.select %201, %197, %202 : vector<4x128xi1>, vector<4x128xi32>
    %cst_216 = arith.constant dense<2147483647> : vector<4xi32>
    %204 = vector.multi_reduction <minsi>, %203, %cst_216 [1] : vector<4x128xi32> to vector<4xi32>
    %205 = vector.shape_cast %204 : vector<4xi32> to vector<4x1xi32>
    %206 = vector.shape_cast %205 : vector<4x1xi32> to vector<4x1xi32>
    %207 = vector.broadcast %206 : vector<4x1xi32> to vector<4x128xi32>
    %c0_217 = arith.constant 0 : index
    %c0_218 = arith.constant 0 : index
    %208 = vector.load %arg9[%c0_217, %c0_218] : memref<4x128xi32, #tpu.memory_space<vmem>>, vector<4x128xi32>
    tpu.vector_store %arg9[%c0_217, %c0_218], %207 {strides = array<i32>} : memref<4x128xi32, #tpu.memory_space<vmem>>, vector<4x128xi32>,
    return
  }
  func.func @transform_0(%arg0: i32) -> (i32, i32, i32, i32, i32) {
    %c0_i32 = arith.constant 0 : i32
    %c0_i32_0 = arith.constant 0 : i32
    %c0_i32_1 = arith.constant 0 : i32
    %c0_i32_2 = arith.constant 0 : i32
    %c0_i32_3 = arith.constant 0 : i32
    %c0_i32_4 = arith.constant 0 : i32
    return %c0_i32, %c0_i32_0, %c0_i32_1, %c0_i32_2, %c0_i32_3 : i32, i32, i32, i32, i32
  }
  func.func @transform_1(%arg0: i32) -> (i32, i32) {
    %c0_i32 = arith.constant 0 : i32
    %c0_i32_0 = arith.constant 0 : i32
    %c0_i32_1 = arith.constant 0 : i32
    return %c0_i32, %c0_i32_0 : i32, i32
  }
  func.func @transform_2(%arg0: i32) -> (i32, i32, i32) {
    %c0_i32 = arith.constant 0 : i32
    %c0_i32_0 = arith.constant 0 : i32
    %c0_i32_1 = arith.constant 0 : i32
    %c0_i32_2 = arith.constant 0 : i32
    return %c0_i32, %c0_i32_0, %c0_i32_1 : i32, i32, i32
  }
  func.func @transform_3(%arg0: i32) -> (i32, i32) {
    %c0_i32 = arith.constant 0 : i32
    %c0_i32_0 = arith.constant 0 : i32
    %c0_i32_1 = arith.constant 0 : i32
    return %c0_i32, %c0_i32_0 : i32, i32
  }
  func.func @transform_4(%arg0: i32) -> (i32, i32, i32) {
    %c0_i32 = arith.constant 0 : i32
    %c0_i32_0 = arith.constant 0 : i32
    %c0_i32_1 = arith.constant 0 : i32
    %c0_i32_2 = arith.constant 0 : i32
    return %c0_i32, %c0_i32_0, %c0_i32_1 : i32, i32, i32
  }
  func.func @transform_5(%arg0: i32) -> (i32, i32) {
    %c0_i32 = arith.constant 0 : i32
    %c0_i32_0 = arith.constant 0 : i32
    %c0_i32_1 = arith.constant 0 : i32
    return %c0_i32, %c0_i32_0 : i32, i32
  }
  func.func @transform_6(%arg0: i32) -> (i32, i32) {
    %c0_i32 = arith.constant 0 : i32
    %c0_i32_0 = arith.constant 0 : i32
    %c0_i32_1 = arith.constant 0 : i32
    return %c0_i32, %c0_i32_0 : i32, i32
  }
  func.func @transform_7(%arg0: i32) -> (i32, i32) {
    %c0_i32 = arith.constant 0 : i32
    %c0_i32_0 = arith.constant 0 : i32
    %c0_i32_1 = arith.constant 0 : i32
    return %c0_i32, %c0_i32_0 : i32, i32
  }
  func.func @transform_8(%arg0: i32) -> (i32, i32) {
    %c0_i32 = arith.constant 0 : i32
    %c0_i32_0 = arith.constant 0 : i32
    %c0_i32_1 = arith.constant 0 : i32
    return %c0_i32, %c0_i32_0 : i32, i32
  }
}

</mosaic_0001>

<bundles_post_ra>
// kernel: squeeze.1
= control target key start
LH: loop header
LB: loop body
LE: loop exit
PB: predicated region body
PF: predicated region fallthrough
CT: control target
= control target key end

     0   :  { %s85_s0 = inlined_call_operand.vmem [shape: s32[4], index: 0, kind: input, shape index: {}]   ;;  %s86_s1 = inlined_call_operand.hbm [shape: s32[2,2], index: 1, kind: output, shape index: {}]  }
   0x1   :  { %v5_v0 = vld [vmem:[%s85_s0] sm:$0x1] }
   0x2   :  { %2 = vsyncpa [#allocation1], 0  ;;  %6 = vst [vmem:[#allocation3] sm:$0x1] %v5_v0  ;;  %vm8_vm0 = vcmask 15360   ;;  %s58_s0 = smov 126  }
   0x3   :  { %s59_s8 = smov [#allocation0]  }
   0x4   :  { %s26_s9 = sshll.u32 %s59_s8, 4  ;;  %s27_s9 = int_to_ptr.vmem [resolvable:$true] %s26_s9 }
   0x5   :  { %s34_s10 = scalar_lea.vmem %s27_s9, 32  ;;  %p39_p1 = scmp.lt.s32.totalorder %s27_s9, %s27_s9 }
   0x6   :  { %p35_p0 = scmp.ne.s32.totalorder %s27_s9, %s34_s10  ;;  %p40_p2 = scmp.lt.s32.totalorder %s34_s10, %s34_s10 }
   0x8   :  { %p41_p3 = por %p40_p2, %p39_p1 }
   0x9   :  { %v10_v1 = vld [vmem:[#allocation3] sm:$0x1]  }
   0xa   :  { %v7_v2 = vld [vmem:[#allocation3] sm:$0x1]   ;;  %11 = vrot.lane.b32.xlu0 %v10_v1, %s58_s0  ;;  %p42_p4 = pnand %p41_p3, %p35_p0 }
   0xb   :  { %9 = vst.msk [vmem:[#allocation2] sm:$0x1] %vm8_vm0, %v7_v2  }
  0x7c   :  { %v12_v3 = vpop.permute.xlu0 %11  }
  0x7d   :  { %15 = vst.msk [vmem:[#allocation2 + $0x1] sm:$0x1] %vm8_vm0, %v12_v3  }
  0x84   :  { %v19_v4 = vld [vmem:[#allocation2] sm:$0x3] }
  0x85   :  { %21 = vst [vmem:[#allocation0] sm:$0x3] %v19_v4 }
  0x86   :  { %45 = shalt.err (!%p42_p4)
}
  0x87   :  { %s46_s13 = scalar_lea.hbm %s86_s1, 32 }
  0x88   :  { %p47_p5 = scmp.ne.s32.totalorder %s86_s1, %s46_s13  ;;  %p50_p6 = scmp.lt.u32.totalorder %s46_s13, %s86_s1 }
  0x8a   :  { %p52_p7 = pnand %p50_p6, %p47_p5 }
  0x8c   :  { %55 = shalt.err (!%p52_p7)
}
  0x8d   :  { %29 = dma.vmem_to_hbm [thread:$0]  %s27_s9, 32, %s86_s1, [#allocation1]  }
  0x8e   :  { %56 = dma.done.wait [#allocation1], 32  }
  0x8f   :  { %57 = vsyncadd [#allocation1], 4294967264 }
  0x90   :  { %31 = vsyncpa [#allocation1], 1 }

// kernel: rcnn_forward.1
= control target key start
LH: loop header
LB: loop body
LE: loop exit
PB: predicated region body
PF: predicated region fallthrough
CT: control target
= control target key end

     0   :  { %vm494_vm0 = vcmask 261120   ;;  %vm14135_vm1 = vmmov 0   ;;  %vm7940_vm2 = vcmask 1041409   ;;  %vm7943_vm3 = vcmask 1042434   ;;  %s17803_s1 = inlined_call_operand.vmem [shape: bf16[32,128], index: 1, kind: input, shape index: {}]   ;;  %s17804_s0 = inlined_call_operand.vmem [shape: bf16[4,16,4,16,32], index: 0, kind: input, shape index: {}]   ;;  %s17805_s2 = inlined_call_operand.vmem [shape: bf16[9,128,128], index: 2, kind: input, shape index: {}]   ;;  %s17806_s4 = inlined_call_operand.vmem [shape: bf16[16,128,128], index: 4, kind: input, shape index: {}]   ;;  %s17807_s3 = inlined_call_operand.vmem [shape: f32[1,128], index: 3, kind: input, shape index: {}]   ;;  %s17808_s6 = inlined_call_operand.vmem [shape: f32[128,128], index: 6, kind: input, shape index: {}]   ;;  %s17809_s5 = inlined_call_operand.vmem [shape: f32[1,128], index: 5, kind: input, shape index: {}]   ;;  %s17810_s7 = inlined_call_operand.vmem [shape: f32[1,128], index: 7, kind: input, shape index: {}]   ;;  %s17811_s8 = inlined_call_operand.vmem [shape: s32[4,128], index: 8, kind: output, shape index: {}]  }
   0x1   :  { %v13676_v0 = vld [vmem:[%s17803_s1] sm:$0xff]   ;;  %v13677_v1 = vld [vmem:[%s17803_s1 + $0x8] sm:$0xff]   ;;  %v13682_v6 = vld [vmem:[%s17804_s0 + $0x10] sm:$0xff]   ;;  %vm7946_vm4 = vcmask 1043459   ;;  %vm9926_vm5 = vcmask 1043456  }
   0x2   :  { %12062 = vmatprep.subr.bf16.mxu0 %v13676_v0  ;;  %12194 = vmatprep.subr.bf16.mxu1 %v13676_v0  ;;  %v13678_v2 = vld [vmem:[%s17804_s0] sm:$0xff]   ;;  %v13680_v4 = vld [vmem:[%s17804_s0 + $0x8] sm:$0xff]   ;;  %v13683_v7 = vld [vmem:[%s17804_s0 + $0x210] sm:$0xff]  }
   0x3   :  { %12063 = vmatpush3.bf16.msra.mxu0 %v13676_v0  ;;  %12195 = vmatpush3.bf16.msra.mxu1 %v13676_v0  ;;  %v13679_v3 = vld [vmem:[%s17804_s0 + $0x200] sm:$0xff]   ;;  %v13681_v5 = vld [vmem:[%s17804_s0 + $0x208] sm:$0xff]   ;;  %v13684_v8 = vld [vmem:[%s17804_s0 + $0x18] sm:$0xff]  }
   0x4   :  { %12064 = vmatprep.subr.bf16.mxu0 %v13677_v1  ;;  %12196 = vmatprep.subr.bf16.mxu1 %v13677_v1  ;;  %v13685_v9 = vld [vmem:[%s17804_s0 + $0x218] sm:$0xff]   ;;  %v13686_v10 = vld [vmem:[%s17804_s0 + $0x20] sm:$0xff]   ;;  %v13688_v12 = vld [vmem:[%s17804_s0 + $0x28] sm:$0xff]  }
   0x5   :  { %12066 = vmatprep.mubr.msk.bf16.mxu0 %vm494_vm0, %v13678_v2  ;;  %12198 = vmatprep.mubr.msk.bf16.mxu1 %vm494_vm0, %v13679_v3  ;;  %v13687_v11 = vld [vmem:[%s17804_s0 + $0x220] sm:$0xff]   ;;  %v13689_v13 = vld [vmem:[%s17804_s0 + $0x228] sm:$0xff]   ;;  %v13690_v14 = vld [vmem:[%s17804_s0 + $0x30] sm:$0xff]  }
   0x6   :  { %v13691_v15 = vld [vmem:[%s17804_s0 + $0x230] sm:$0xff]   ;;  %v13692_v16 = vld [vmem:[%s17804_s0 + $0x38] sm:$0xff]   ;;  %v13694_v18 = vld [vmem:[%s17804_s0 + $0x40] sm:$0xff]  }
   0x7   :  { %12065 = vmatpush3.bf16.msra.mxu0 %v13677_v1  ;;  %12197 = vmatpush3.bf16.msra.mxu1 %v13677_v1  ;;  %v13693_v17 = vld [vmem:[%s17804_s0 + $0x238] sm:$0xff]   ;;  %v13695_v19 = vld [vmem:[%s17804_s0 + $0x240] sm:$0xff]   ;;  %v13696_v20 = vld [vmem:[%s17804_s0 + $0x48] sm:$0xff]  }
   0x8   :  { %12326 = vmatprep.subr.bf16.mxu0 %v13676_v0  ;;  %12458 = vmatprep.subr.bf16.mxu1 %v13676_v0  ;;  %v13697_v21 = vld [vmem:[%s17804_s0 + $0x248] sm:$0xff]   ;;  %v13698_v22 = vld [vmem:[%s17804_s0 + $0x50] sm:$0xff]   ;;  %v13700_v24 = vld [vmem:[%s17804_s0 + $0x58] sm:$0xff]  }
   0x9   :  { %v13699_v23 = vld [vmem:[%s17804_s0 + $0x250] sm:$0xff]   ;;  %v13701_v25 = vld [vmem:[%s17804_s0 + $0x258] sm:$0xff]   ;;  %v13702_v26 = vld [vmem:[%s17804_s0 + $0x60] sm:$0xff]  }
   0xa   :  { %12067 = vmatmul.mubr.msk.bf16.vlgmr.msra.gmra.mrb[0].mxu0 %vm494_vm0, %v13680_v4  ;;  %12199 = vmatmul.mubr.msk.bf16.vlgmr.msra.gmra.mrb[0].mxu1 %vm494_vm0, %v13681_v5  ;;  %v13703_v27 = vld [vmem:[%s17804_s0 + $0x260] sm:$0xff]   ;;  %v13704_v28 = vld [vmem:[%s17804_s0 + $0x68] sm:$0xff]   ;;  %v13706_v30 = vld [vmem:[%s17804_s0 + $0x70] sm:$0xff]  }
   0xb   :  { %12327 = vmatpush3.bf16.msra.mxu0 %v13676_v0  ;;  %12070 = vmatprep.mubr.msk.bf16.mxu0 %vm494_vm0, %v13682_v6  ;;  %v13705_v29 = vld [vmem:[%s17804_s0 + $0x268] sm:$0xff]   ;;  %v13707_v31 = vld [vmem:[%s17804_s0 + $0x270] sm:$0xff]   ;;  %v13708_v32 = vld [vmem:[%s17804_s0 + $0x78] sm:$0xff]  }
   0xc   :  { %12202 = vmatprep.mubr.msk.bf16.mxu1 %vm494_vm0, %v13683_v7  ;;  %12459 = vmatpush3.bf16.msra.mxu1 %v13676_v0  ;;  %v13709_v33 = vld [vmem:[%s17804_s0 + $0x278] sm:$0xff]   ;;  %v13710_v34 = vld [vmem:[%s17804_s0 + $0x80] sm:$0xff]   ;;  %v13712_v36 = vld [vmem:[%s17804_s0 + $0x88] sm:$0xff]  }
   0xd   :  { %12328 = vmatprep.subr.bf16.mxu0 %v13677_v1  ;;  %12460 = vmatprep.subr.bf16.mxu1 %v13677_v1  ;;  %v13711_v35 = vld [vmem:[%s17804_s0 + $0x280] sm:$0xff]   ;;  %v13713_v37 = vld [vmem:[%s17804_s0 + $0x288] sm:$0xff]   ;;  %v13714_v38 = vld [vmem:[%s17804_s0 + $0x90] sm:$0xff]  }
   0xe   :  { %v13715_v39 = vld [vmem:[%s17804_s0 + $0x290] sm:$0xff]   ;;  %v13716_v40 = vld [vmem:[%s17804_s0 + $0x98] sm:$0xff]   ;;  %v13718_v42 = vld [vmem:[%s17804_s0 + $0xa0] sm:$0xff]  }
   0xf   :  { %12329 = vmatpush3.bf16.msra.mxu0 %v13677_v1  ;;  %v13717_v41 = vld [vmem:[%s17804_s0 + $0x298] sm:$0xff]   ;;  %v13719_v43 = vld [vmem:[%s17804_s0 + $0x2a0] sm:$0xff]   ;;  %v13720_v44 = vld [vmem:[%s17804_s0 + $0xa8] sm:$0xff]  }
  0x10   :  { %12461 = vmatpush3.bf16.msra.mxu1 %v13677_v1  ;;  %v13721_v45 = vld [vmem:[%s17804_s0 + $0x2a8] sm:$0xff]   ;;  %v13722_v46 = vld [vmem:[%s17804_s0 + $0xb0] sm:$0xff]   ;;  %v13724_v48 = vld [vmem:[%s17804_s0 + $0xb8] sm:$0xff]  }
  0x11   :  { %v13723_v47 = vld [vmem:[%s17804_s0 + $0x2b0] sm:$0xff]   ;;  %v13725_v49 = vld [vmem:[%s17804_s0 + $0x2b8] sm:$0xff]   ;;  %v13726_v50 = vld [vmem:[%s17804_s0 + $0xc0] sm:$0xff]  }
  0x12   :  { %12071 = vmatmul.mubr.msk.bf16.gmra.mrb[4].mxu0 %vm494_vm0, %v13684_v8  ;;  %12203 = vmatmul.mubr.msk.bf16.gmra.mrb[4].mxu1 %vm494_vm0, %v13685_v9  ;;  %v13727_v51 = vld [vmem:[%s17804_s0 + $0x2c0] sm:$0xff]   ;;  %v13728_v52 = vld [vmem:[%s17804_s0 + $0xc8] sm:$0xff]   ;;  %v13730_v54 = vld [vmem:[%s17804_s0 + $0xd0] sm:$0xff]  }
  0x13   :  { %12074 = vmatprep.mubr.msk.bf16.mxu0 %vm494_vm0, %v13686_v10  ;;  %12206 = vmatprep.mubr.msk.bf16.mxu1 %vm494_vm0, %v13687_v11  ;;  %v13729_v53 = vld [vmem:[%s17804_s0 + $0x2c8] sm:$0xff]   ;;  %v13731_v55 = vld [vmem:[%s17804_s0 + $0x2d0] sm:$0xff]   ;;  %v13732_v56 = vld [vmem:[%s17804_s0 + $0xd8] sm:$0xff]  }
  0x14   :  { %v13733_v57 = vld [vmem:[%s17804_s0 + $0x2d8] sm:$0xff]   ;;  %v13734_v58 = vld [vmem:[%s17804_s0 + $0xe0] sm:$0xff]   ;;  %v13736_v60 = vld [vmem:[%s17804_s0 + $0xe8] sm:$0xff]  }
  0x15   :  { %v13735_v59 = vld [vmem:[%s17804_s0 + $0x2e0] sm:$0xff]   ;;  %v13737_v61 = vld [vmem:[%s17804_s0 + $0x2e8] sm:$0xff]   ;;  %v13738_v62 = vld [vmem:[%s17804_s0 + $0xf0] sm:$0xff]  }
  0x16   :  { %v13739_v63 = vld [vmem:[%s17804_s0 + $0x2f0] sm:$0xff]   ;;  %v13740_v0 = vld [vmem:[%s17804_s0 + $0xf8] sm:$0xff]   ;;  %v13742_v2 = vld [vmem:[%s17804_s0 + $0x100] sm:$0xff]  }
  0x17   :  { %v13741_v1 = vld [vmem:[%s17804_s0 + $0x2f8] sm:$0xff]   ;;  %v13743_v3 = vld [vmem:[%s17804_s0 + $0x300] sm:$0xff]   ;;  %v13744_v4 = vld [vmem:[%s17804_s0 + $0x108] sm:$0xff]  }
  0x18   :  { %v13745_v5 = vld [vmem:[%s17804_s0 + $0x308] sm:$0xff]   ;;  %v13746_v6 = vld [vmem:[%s17804_s0 + $0x110] sm:$0xff]   ;;  %v14471_v8 = vld [vmem:[%s17805_s2 + $0x40] sm:$0xff]  }
  0x19   :  { %v13747_v7 = vld [vmem:[%s17804_s0 + $0x310] sm:$0xff]   ;;  %v13748_v9 = vld [vmem:[%s17804_s0 + $0x118] sm:$0xff]   ;;  %v13750_v11 = vld [vmem:[%s17804_s0 + $0x120] sm:$0xff]   ;;  %12590 = vmatprep.subr.bf16.mxu0 %v14471_v8  ;;  %13401 = vmatprep.subr.bf16.mxu1 %v14471_v8 }
  0x1a   :  { %12075 = vmatmul.mubr.msk.bf16.gmra.mrb[8].mxu0 %vm494_vm0, %v13688_v12  ;;  %12207 = vmatmul.mubr.msk.bf16.gmra.mrb[8].mxu1 %vm494_vm0, %v13689_v13  ;;  %v13749_v10 = vld [vmem:[%s17804_s0 + $0x318] sm:$0xff]   ;;  %v13751_v12 = vld [vmem:[%s17804_s0 + $0x320] sm:$0xff]   ;;  %v13752_v13 = vld [vmem:[%s17804_s0 + $0x128] sm:$0xff]  }
  0x1b   :  { %12078 = vmatprep.mubr.msk.bf16.mxu0 %vm494_vm0, %v13690_v14  ;;  %12210 = vmatprep.mubr.msk.bf16.mxu1 %vm494_vm0, %v13691_v15  ;;  %v13753_v14 = vld [vmem:[%s17804_s0 + $0x328] sm:$0xff]   ;;  %v13754_v15 = vld [vmem:[%s17804_s0 + $0x130] sm:$0xff]  }
  0x22   :  { %12079 = vmatmul.mubr.msk.bf16.gmra.mrb[12].mxu0 %vm494_vm0, %v13692_v16  ;;  %12211 = vmatmul.mubr.msk.bf16.gmra.mrb[12].mxu1 %vm494_vm0, %v13693_v17  ;;  %v13755_v16 = vld [vmem:[%s17804_s0 + $0x330] sm:$0xff]   ;;  %v13756_v17 = vld [vmem:[%s17804_s0 + $0x138] sm:$0xff]  }
  0x23   :  { %12082 = vmatprep.mubr.msk.bf16.mxu0 %vm494_vm0, %v13694_v18  ;;  %12214 = vmatprep.mubr.msk.bf16.mxu1 %vm494_vm0, %v13695_v19  ;;  %v13757_v18 = vld [vmem:[%s17804_s0 + $0x338] sm:$0xff]   ;;  %v13758_v19 = vld [vmem:[%s17804_s0 + $0x140] sm:$0xff]  }
  0x2a   :  { %12083 = vmatmul.mubr.msk.bf16.gmra.mrb[16].mxu0 %vm494_vm0, %v13696_v20  ;;  %12215 = vmatmul.mubr.msk.bf16.gmra.mrb[16].mxu1 %vm494_vm0, %v13697_v21  ;;  %v13759_v20 = vld [vmem:[%s17804_s0 + $0x340] sm:$0xff]   ;;  %v13760_v21 = vld [vmem:[%s17804_s0 + $0x148] sm:$0xff]  }
  0x2b   :  { %12086 = vmatprep.mubr.msk.bf16.mxu0 %vm494_vm0, %v13698_v22  ;;  %12218 = vmatprep.mubr.msk.bf16.mxu1 %vm494_vm0, %v13699_v23  ;;  %v13761_v22 = vld [vmem:[%s17804_s0 + $0x348] sm:$0xff]   ;;  %v13762_v23 = vld [vmem:[%s17804_s0 + $0x150] sm:$0xff]  }
  0x32   :  { %12087 = vmatmul.mubr.msk.bf16.gmra.mrb[20].mxu0 %vm494_vm0, %v13700_v24  ;;  %12219 = vmatmul.mubr.msk.bf16.gmra.mrb[20].mxu1 %vm494_vm0, %v13701_v25  ;;  %v13763_v24 = vld [vmem:[%s17804_s0 + $0x350] sm:$0xff]   ;;  %v13764_v25 = vld [vmem:[%s17804_s0 + $0x158] sm:$0xff]  }
  0x33   :  { %12090 = vmatprep.mubr.msk.bf16.mxu0 %vm494_vm0, %v13702_v26  ;;  %12222 = vmatprep.mubr.msk.bf16.mxu1 %vm494_vm0, %v13703_v27  ;;  %v13765_v26 = vld [vmem:[%s17804_s0 + $0x358] sm:$0xff]   ;;  %v13766_v27 = vld [vmem:[%s17804_s0 + $0x160] sm:$0xff]  }
  0x3a   :  { %12091 = vmatmul.mubr.msk.bf16.gmra.mrb[24].mxu0 %vm494_vm0, %v13704_v28  ;;  %12223 = vmatmul.mubr.msk.bf16.gmra.mrb[24].mxu1 %vm494_vm0, %v13705_v29  ;;  %v13767_v28 = vld [vmem:[%s17804_s0 + $0x360] sm:$0xff]   ;;  %v13768_v29 = vld [vmem:[%s17804_s0 + $0x168] sm:$0xff]  }
  0x3b   :  { %12094 = vmatprep.mubr.msk.bf16.mxu0 %vm494_vm0, %v13706_v30  ;;  %12226 = vmatprep.mubr.msk.bf16.mxu1 %vm494_vm0, %v13707_v31  ;;  %v13769_v30 = vld [vmem:[%s17804_s0 + $0x368] sm:$0xff]   ;;  %v13770_v31 = vld [vmem:[%s17804_s0 + $0x170] sm:$0xff]  }
  0x42   :  { %12095 = vmatmul.mubr.msk.bf16.gmra.mrb[28].mxu0 %vm494_vm0, %v13708_v32  ;;  %12227 = vmatmul.mubr.msk.bf16.gmra.mrb[28].mxu1 %vm494_vm0, %v13709_v33  ;;  %v13771_v32 = vld [vmem:[%s17804_s0 + $0x370] sm:$0xff]   ;;  %v13772_v33 = vld [vmem:[%s17804_s0 + $0x178] sm:$0xff]  }
  0x43   :  { %12098 = vmatprep.mubr.msk.bf16.mxu0 %vm494_vm0, %v13710_v34  ;;  %12230 = vmatprep.mubr.msk.bf16.mxu1 %vm494_vm0, %v13711_v35  ;;  %v13773_v34 = vld [vmem:[%s17804_s0 + $0x378] sm:$0xff]   ;;  %v13774_v35 = vld [vmem:[%s17804_s0 + $0x180] sm:$0xff]  }
  0x4a   :  { %12099 = vmatmul.mubr.msk.bf16.gmra.mrb[32].mxu0 %vm494_vm0, %v13712_v36  ;;  %12231 = vmatmul.mubr.msk.bf16.gmra.mrb[32].mxu1 %vm494_vm0, %v13713_v37  ;;  %v13775_v36 = vld [vmem:[%s17804_s0 + $0x380] sm:$0xff]   ;;  %v13776_v37 = vld [vmem:[%s17804_s0 + $0x188] sm:$0xff]  }
  0x4b   :  { %12102 = vmatprep.mubr.msk.bf16.mxu0 %vm494_vm0, %v13714_v38  ;;  %12234 = vmatprep.mubr.msk.bf16.mxu1 %vm494_vm0, %v13715_v39  ;;  %v13777_v38 = vld [vmem:[%s17804_s0 + $0x388] sm:$0xff]   ;;  %v13778_v39 = vld [vmem:[%s17804_s0 + $0x190] sm:$0xff]  }
  0x52   :  { %12103 = vmatmul.mubr.msk.bf16.gmra.mrb[36].mxu0 %vm494_vm0, %v13716_v40  ;;  %12235 = vmatmul.mubr.msk.bf16.gmra.mrb[36].mxu1 %vm494_vm0, %v13717_v41  ;;  %v13779_v40 = vld [vmem:[%s17804_s0 + $0x390] sm:$0xff]   ;;  %v13780_v41 = vld [vmem:[%s17804_s0 + $0x198] sm:$0xff]  }
  0x53   :  { %12106 = vmatprep.mubr.msk.bf16.mxu0 %vm494_vm0, %v13718_v42  ;;  %12238 = vmatprep.mubr.msk.bf16.mxu1 %vm494_vm0, %v13719_v43  ;;  %v13781_v42 = vld [vmem:[%s17804_s0 + $0x398] sm:$0xff]   ;;  %v13782_v43 = vld [vmem:[%s17804_s0 + $0x1a0] sm:$0xff]  }
  0x5a   :  { %12107 = vmatmul.mubr.msk.bf16.gmra.mrb[40].mxu0 %vm494_vm0, %v13720_v44  ;;  %12239 = vmatmul.mubr.msk.bf16.gmra.mrb[40].mxu1 %vm494_vm0, %v13721_v45  ;;  %v13783_v44 = vld [vmem:[%s17804_s0 + $0x3a0] sm:$0xff]   ;;  %v13784_v45 = vld [vmem:[%s17804_s0 + $0x1a8] sm:$0xff]  }
  0x5b   :  { %12110 = vmatprep.mubr.msk.bf16.mxu0 %vm494_vm0, %v13722_v46  ;;  %12242 = vmatprep.mubr.msk.bf16.mxu1 %vm494_vm0, %v13723_v47  ;;  %v13785_v46 = vld [vmem:[%s17804_s0 + $0x3a8] sm:$0xff]   ;;  %v13786_v47 = vld [vmem:[%s17804_s0 + $0x1b0] sm:$0xff]  }
  0x62   :  { %12111 = vmatmul.mubr.msk.bf16.gmra.mrb[44].mxu0 %vm494_vm0, %v13724_v48  ;;  %12243 = vmatmul.mubr.msk.bf16.gmra.mrb[44].mxu1 %vm494_vm0, %v13725_v49  ;;  %v13787_v48 = vld [vmem:[%s17804_s0 + $0x3b0] sm:$0xff]   ;;  %v13788_v49 = vld [vmem:[%s17804_s0 + $0x1b8] sm:$0xff]  }
  0x63   :  { %12114 = vmatprep.mubr.msk.bf16.mxu0 %vm494_vm0, %v13726_v50  ;;  %12246 = vmatprep.mubr.msk.bf16.mxu1 %vm494_vm0, %v13727_v51  ;;  %v13789_v50 = vld [vmem:[%s17804_s0 + $0x3b8] sm:$0xff]  }
  0x6a   :  { %12115 = vmatmul.mubr.msk.bf16.gmra.mrb[48].mxu0 %vm494_vm0, %v13728_v52  ;;  %12247 = vmatmul.mubr.msk.bf16.gmra.mrb[48].mxu1 %vm494_vm0, %v13729_v53 }
  0x6b   :  { %12118 = vmatprep.mubr.msk.bf16.mxu0 %vm494_vm0, %v13730_v54  ;;  %12250 = vmatprep.mubr.msk.bf16.mxu1 %vm494_vm0, %v13731_v55  ;;  %v13876_v55 = vld [vmem:[%s17805_s2 + $0x60] sm:$0xff]  }
  0x72   :  { %12119 = vmatmul.mubr.msk.bf16.gmra.mrb[52].mxu0 %vm494_vm0, %v13732_v56  ;;  %12251 = vmatmul.mubr.msk.bf16.gmra.mrb[52].mxu1 %vm494_vm0, %v13733_v57 }
  0x73   :  { %12122 = vmatprep.mubr.msk.bf16.mxu0 %vm494_vm0, %v13734_v58  ;;  %12254 = vmatprep.mubr.msk.bf16.mxu1 %vm494_vm0, %v13735_v59  ;;  %v13790_v58 = vld [vmem:[%s17804_s0 + $0x1c0] sm:$0xff]  }
  0x74   :  { %v13791_v59 = vld [vmem:[%s17804_s0 + $0x3c0] sm:$0xff]  }
  0x7a   :  { %12123 = vmatmul.mubr.msk.bf16.gmra.mrb[56].mxu0 %vm494_vm0, %v13736_v60  ;;  %12255 = vmatmul.mubr.msk.bf16.gmra.mrb[56].mxu1 %vm494_vm0, %v13737_v61 }
  0x7b   :  { %12126 = vmatprep.mubr.msk.bf16.mxu0 %vm494_vm0, %v13738_v62  ;;  %12258 = vmatprep.mubr.msk.bf16.mxu1 %vm494_vm0, %v13739_v63  ;;  %v13816_v63 = vld [vmem:[%s17804_s0 + $0x428] sm:$0xff]  }
  0x82   :  { %12127 = vmatmul.mubr.msk.bf16.gmra.mrb[60].mxu0 %vm494_vm0, %v13740_v0  ;;  %12259 = vmatmul.mubr.msk.bf16.gmra.mrb[60].mxu1 %vm494_vm0, %v13741_v1  ;;  %v13792_v1 = vld [vmem:[%s17804_s0 + $0x1c8] sm:$0xff]   ;;  %v13815_v0 = vld [vmem:[%s17804_s0 + $0x420] sm:$0xff]  }
  0x83   :  { %12130 = vmatprep.mubr.msk.bf16.mxu0 %vm494_vm0, %v13742_v2  ;;  %12262 = vmatprep.mubr.msk.bf16.mxu1 %vm494_vm0, %v13743_v3  ;;  %v13793_v2 = vld [vmem:[%s17804_s0 + $0x3c8] sm:$0xff]  }
  0x8a   :  { %12131 = vmatmul.mubr.msk.bf16.gmra.mrb[64].mxu0 %vm494_vm0, %v13744_v4  ;;  %12263 = vmatmul.mubr.msk.bf16.gmra.mrb[64].mxu1 %vm494_vm0, %v13745_v5 }
  0x8b   :  { %12134 = vmatprep.mubr.msk.bf16.mxu0 %vm494_vm0, %v13746_v6  ;;  %12266 = vmatprep.mubr.msk.bf16.mxu1 %vm494_vm0, %v13747_v7 }
  0x92   :  { %12135 = vmatmul.mubr.msk.bf16.gmra.mrb[68].mxu0 %vm494_vm0, %v13748_v9  ;;  %12267 = vmatmul.mubr.msk.bf16.gmra.mrb[68].mxu1 %vm494_vm0, %v13749_v10 }
  0x93   :  { %12138 = vmatprep.mubr.msk.bf16.mxu0 %vm494_vm0, %v13750_v11  ;;  %12270 = vmatprep.mubr.msk.bf16.mxu1 %vm494_vm0, %v13751_v12  ;;  %v13794_v11 = vld [vmem:[%s17804_s0 + $0x1d0] sm:$0xff]  }
  0x94   :  { %v13795_v12 = vld [vmem:[%s17804_s0 + $0x3d0] sm:$0xff]  }
  0x9a   :  { %12139 = vmatmul.mubr.msk.bf16.gmra.mrb[72].mxu0 %vm494_vm0, %v13752_v13  ;;  %12271 = vmatmul.mubr.msk.bf16.gmra.mrb[72].mxu1 %vm494_vm0, %v13753_v14 }
  0x9b   :  { %12142 = vmatprep.mubr.msk.bf16.mxu0 %vm494_vm0, %v13754_v15  ;;  %12274 = vmatprep.mubr.msk.bf16.mxu1 %vm494_vm0, %v13755_v16  ;;  %v13812_v16 = vld [vmem:[%s17804_s0 + $0x418] sm:$0xff]  }
  0xa2   :  { %12143 = vmatmul.mubr.msk.bf16.gmra.mrb[76].mxu0 %vm494_vm0, %v13756_v17  ;;  %12275 = vmatmul.mubr.msk.bf16.gmra.mrb[76].mxu1 %vm494_vm0, %v13757_v18  ;;  %v13796_v18 = vld [vmem:[%s17804_s0 + $0x1d8] sm:$0xff]  }
  0xa3   :  { %12146 = vmatprep.mubr.msk.bf16.mxu0 %vm494_vm0, %v13758_v19  ;;  %12278 = vmatprep.mubr.msk.bf16.mxu1 %vm494_vm0, %v13759_v20  ;;  %v13797_v19 = vld [vmem:[%s17804_s0 + $0x3d8] sm:$0xff]  }
  0xaa   :  { %12147 = vmatmul.mubr.msk.bf16.gmra.mrb[80].mxu0 %vm494_vm0, %v13760_v21  ;;  %12279 = vmatmul.mubr.msk.bf16.gmra.mrb[80].mxu1 %vm494_vm0, %v13761_v22 }
  0xab   :  { %12150 = vmatprep.mubr.msk.bf16.mxu0 %vm494_vm0, %v13762_v23  ;;  %12282 = vmatprep.mubr.msk.bf16.mxu1 %vm494_vm0, %v13763_v24 }
  0xb2   :  { %12151 = vmatmul.mubr.msk.bf16.gmra.mrb[84].mxu0 %vm494_vm0, %v13764_v25  ;;  %12283 = vmatmul.mubr.msk.bf16.gmra.mrb[84].mxu1 %vm494_vm0, %v13765_v26 }
  0xb3   :  { %12154 = vmatprep.mubr.msk.bf16.mxu0 %vm494_vm0, %v13766_v27  ;;  %12286 = vmatprep.mubr.msk.bf16.mxu1 %vm494_vm0, %v13767_v28  ;;  %v13798_v27 = vld [vmem:[%s17804_s0 + $0x1e0] sm:$0xff]  }
  0xb4   :  { %v13799_v28 = vld [vmem:[%s17804_s0 + $0x3e0] sm:$0xff]  }
  0xba   :  { %12155 = vmatmul.mubr.msk.bf16.gmra.mrb[88].mxu0 %vm494_vm0, %v13768_v29  ;;  %12287 = vmatmul.mubr.msk.bf16.gmra.mrb[88].mxu1 %vm494_vm0, %v13769_v30  ;;  %v13813_v29 = vld [vmem:[%s17804_s0 + $0x610] sm:$0xff]  }
  0xbb   :  { %12158 = vmatprep.mubr.msk.bf16.mxu0 %vm494_vm0, %v13770_v31  ;;  %12290 = vmatprep.mubr.msk.bf16.mxu1 %vm494_vm0, %v13771_v32 }
  0xc2   :  { %12159 = vmatmul.mubr.msk.bf16.gmra.mrb[92].mxu0 %vm494_vm0, %v13772_v33  ;;  %12291 = vmatmul.mubr.msk.bf16.gmra.mrb[92].mxu1 %vm494_vm0, %v13773_v34  ;;  %v13800_v34 = vld [vmem:[%s17804_s0 + $0x1e8] sm:$0xff]  }
  0xc3   :  { %12162 = vmatprep.mubr.msk.bf16.mxu0 %vm494_vm0, %v13774_v35  ;;  %12294 = vmatprep.mubr.msk.bf16.mxu1 %vm494_vm0, %v13775_v36  ;;  %v13801_v35 = vld [vmem:[%s17804_s0 + $0x3e8] sm:$0xff]  }
  0xca   :  { %12163 = vmatmul.mubr.msk.bf16.gmra.mrb[96].mxu0 %vm494_vm0, %v13776_v37  ;;  %12295 = vmatmul.mubr.msk.bf16.gmra.mrb[96].mxu1 %vm494_vm0, %v13777_v38 }
  0xcb   :  { %12166 = vmatprep.mubr.msk.bf16.mxu0 %vm494_vm0, %v13778_v39  ;;  %12298 = vmatprep.mubr.msk.bf16.mxu1 %vm494_vm0, %v13779_v40  ;;  %v13842_v40 = vld [vmem:[%s17805_s2 + $0x50] sm:$0xff]  }
  0xd2   :  { %12167 = vmatmul.mubr.msk.bf16.gmra.mrb[100].mxu0 %vm494_vm0, %v13780_v41  ;;  %12299 = vmatmul.mubr.msk.bf16.gmra.mrb[100].mxu1 %vm494_vm0, %v13781_v42 }
  0xd3   :  { %12170 = vmatprep.mubr.msk.bf16.mxu0 %vm494_vm0, %v13782_v43  ;;  %12302 = vmatprep.mubr.msk.bf16.mxu1 %vm494_vm0, %v13783_v44  ;;  %v13802_v43 = vld [vmem:[%s17804_s0 + $0x1f0] sm:$0xff]  }
  0xd4   :  { %v13803_v44 = vld [vmem:[%s17804_s0 + $0x3f0] sm:$0xff]  }
  0xda   :  { %12171 = vmatmul.mubr.msk.bf16.gmra.mrb[104].mxu0 %vm494_vm0, %v13784_v45  ;;  %12303 = vmatmul.mubr.msk.bf16.gmra.mrb[104].mxu1 %vm494_vm0, %v13785_v46  ;;  %v13811_v45 = vld [vmem:[%s17804_s0 + $0x410] sm:$0xff]  }
  0xdb   :  { %12174 = vmatprep.mubr.msk.bf16.mxu0 %vm494_vm0, %v13786_v47  ;;  %12306 = vmatprep.mubr.msk.bf16.mxu1 %vm494_vm0, %v13787_v48 }
  0xdd   :  { %v14641_v51 = vpop.f32.mrb[0].mxu0  ;;  %v14643_v52 = vpop.f32.mrb[0].mxu1 }
  0xde   :  { %v14645_v53 = vpop.f32.mrb[1].mxu0  ;;  %v14647_v54 = vpop.f32.mrb[1].mxu1 }
  0xdf   :  { %v14651_v56 = vpop.f32.mrb[2].mxu0  ;;  %v14653_v57 = vpop.f32.mrb[2].mxu1 }
  0xe0   :  { %v14663_v61 = vpop.f32.mrb[3].mxu0  ;;  %v14665_v62 = vpop.f32.mrb[3].mxu1 }
  0xe2   :  { %12175 = vmatmul.mubr.msk.bf16.gmra.mrb[108].mxu0 %vm494_vm0, %v13788_v49  ;;  %12307 = vmatmul.mubr.msk.bf16.gmra.mrb[108].mxu1 %vm494_vm0, %v13789_v50  ;;  %v13804_v50 = vld [vmem:[%s17804_s0 + $0x1f8] sm:$0xff]   ;;  %v13810_v49 = vld [vmem:[%s17804_s0 + $0x608] sm:$0xff]  }
  0xe3   :  { %12178 = vmatprep.mubr.msk.bf16.mxu0 %vm494_vm0, %v13790_v58  ;;  %12310 = vmatprep.mubr.msk.bf16.mxu1 %vm494_vm0, %v13791_v59  ;;  %v13805_v58 = vld [vmem:[%s17804_s0 + $0x3f8] sm:$0xff]  }
  0xe5   :  { %v14681_v3 = vpop.f32.mrb[4].mxu0  ;;  %v14683_v4 = vpop.f32.mrb[4].mxu1 }
  0xe6   :  { %v14685_v5 = vpop.f32.mrb[5].mxu0  ;;  %v14687_v6 = vpop.f32.mrb[5].mxu1 }
  0xe7   :  { %v14691_v9 = vpop.f32.mrb[6].mxu0  ;;  %v14693_v10 = vpop.f32.mrb[6].mxu1 }
  0xe8   :  { %v14703_v14 = vpop.f32.mrb[7].mxu0  ;;  %v14705_v15 = vpop.f32.mrb[7].mxu1 }
  0xea   :  { %12179 = vmatmul.mubr.msk.bf16.gmra.mrb[112].mxu0 %vm494_vm0, %v13792_v1  ;;  %12311 = vmatmul.mubr.msk.bf16.gmra.mrb[112].mxu1 %vm494_vm0, %v13793_v2 }
  0xeb   :  { %12182 = vmatprep.mubr.msk.bf16.mxu0 %vm494_vm0, %v13794_v11  ;;  %12314 = vmatprep.mubr.msk.bf16.mxu1 %vm494_vm0, %v13795_v12 }
  0xed   :  { %v14721_v20 = vpop.f32.mrb[8].mxu0  ;;  %v14723_v21 = vpop.f32.mrb[8].mxu1 }
  0xee   :  { %v14725_v22 = vpop.f32.mrb[9].mxu0  ;;  %v14727_v23 = vpop.f32.mrb[9].mxu1 }
  0xef   :  { %v14731_v25 = vpop.f32.mrb[10].mxu0  ;;  %v14733_v26 = vpop.f32.mrb[10].mxu1 }
  0xf0   :  { %v14743_v30 = vpop.f32.mrb[11].mxu0  ;;  %v14745_v31 = vpop.f32.mrb[11].mxu1 }
  0xf2   :  { %12183 = vmatmul.mubr.msk.bf16.gmra.mrb[116].mxu0 %vm494_vm0, %v13796_v18  ;;  %12315 = vmatmul.mubr.msk.bf16.gmra.mrb[116].mxu1 %vm494_vm0, %v13797_v19 }
  0xf3   :  { %12186 = vmatprep.mubr.msk.bf16.mxu0 %vm494_vm0, %v13798_v27  ;;  %12318 = vmatprep.mubr.msk.bf16.mxu1 %vm494_vm0, %v13799_v28  ;;  %v13806_v27 = vld [vmem:[%s17804_s0 + $0x400] sm:$0xff]  }
  0xf4   :  { %v13809_v28 = vld [vmem:[%s17804_s0 + $0x600] sm:$0xff]  }
  0xf5   :  { %v14761_v36 = vpop.f32.mrb[12].mxu0  ;;  %v14763_v37 = vpop.f32.mrb[12].mxu1 }
  0xf6   :  { %v14765_v38 = vpop.f32.mrb[13].mxu0  ;;  %v14767_v39 = vpop.f32.mrb[13].mxu1 }
  0xf7   :  { %v14771_v41 = vpop.f32.mrb[14].mxu0  ;;  %v14773_v42 = vpop.f32.mrb[14].mxu1 }
  0xf8   :  { %v14783_v46 = vpop.f32.mrb[15].mxu0  ;;  %v14785_v47 = vpop.f32.mrb[15].mxu1 }
  0xfa   :  { %12187 = vmatmul.mubr.msk.bf16.gmra.mrb[120].mxu0 %vm494_vm0, %v13800_v34  ;;  %12319 = vmatmul.mubr.msk.bf16.gmra.mrb[120].mxu1 %vm494_vm0, %v13801_v35  ;;  %v13807_v34 = vld [vmem:[%s17804_s0 + $0x408] sm:$0xff]  }
  0xfb   :  { %12190 = vmatprep.mubr.msk.bf16.mxu0 %vm494_vm0, %v13802_v43  ;;  %12322 = vmatprep.mubr.msk.bf16.mxu1 %vm494_vm0, %v13803_v44 }
  0xfd   :  { %v14801_v59 = vpop.f32.mrb[16].mxu0  ;;  %v14803_v1 = vpop.f32.mrb[16].mxu1 }
  0xfe   :  { %v14805_v2 = vpop.f32.mrb[17].mxu0  ;;  %v14807_v11 = vpop.f32.mrb[17].mxu1 }
  0xff   :  { %v14811_v18 = vpop.f32.mrb[18].mxu0  ;;  %v14813_v19 = vpop.f32.mrb[18].mxu1 }
 0x100   :  { %v14823_v35 = vpop.f32.mrb[19].mxu0  ;;  %v14825_v43 = vpop.f32.mrb[19].mxu1 }
 0x102   :  { %12191 = vmatmul.mubr.msk.bf16.gmra.mrb[124].mxu0 %vm494_vm0, %v13804_v50  ;;  %12323 = vmatmul.mubr.msk.bf16.gmra.mrb[124].mxu1 %vm494_vm0, %v13805_v58  ;;  %v13825_v58 = vld [vmem:[%s17805_s2 + $0x48] sm:$0xff]  }
 0x103   :  { %12330 = vmatprep.mubr.msk.bf16.mxu0 %vm494_vm0, %v13806_v27  ;;  %12462 = vmatprep.mubr.msk.bf16.mxu1 %vm494_vm0, %v13809_v28 }
 0x105   :  { %v14841_v44 = vpop.f32.mrb[20].mxu0  ;;  %v14843_v48 = vpop.f32.mrb[20].mxu1 }
 0x106   :  { %v14845_v12 = vpop.f32.mrb[21].mxu0  ;;  %v14847_v50 = vpop.f32.mrb[21].mxu1 }
 0x107   :  { %v14851_v27 = vpop.f32.mrb[22].mxu0  ;;  %v14853_v28 = vpop.f32.mrb[22].mxu1 }
 0x108   :  { %v14860_v33 = vpop.f32.mrb[23].mxu0  ;;  %v14862_v32 = vpop.f32.mrb[23].mxu1 }
 0x10a   :  { %12331 = vmatmul.mubr.msk.bf16.vlgmr.msra.gmra.mrb[128].mxu0 %vm494_vm0, %v13807_v34  ;;  %12463 = vmatmul.mubr.msk.bf16.vlgmr.msra.gmra.mrb[128].mxu1 %vm494_vm0, %v13810_v49  ;;  %v13814_v34 = vld [vmem:[%s17804_s0 + $0x618] sm:$0xff]  }
 0x10b   :  { %12591 = vmatpush3.bf16.msra.mxu0 %v14471_v8  ;;  %12334 = vmatprep.mubr.msk.bf16.mxu0 %vm494_vm0, %v13811_v45 }
 0x10c   :  { %12466 = vmatprep.mubr.msk.bf16.mxu1 %vm494_vm0, %v13813_v29  ;;  %12592 = vmatprep.subr.bf16.mxu0 %v13825_v58 }
 0x10d   :  { %v14888_v49 = vpop.f32.mrb[24].mxu0  ;;  %v14890_v17 = vpop.f32.mrb[24].mxu1  ;;  %13409 = vmatpush3.bf16.msra.mxu1 %v14471_v8  ;;  %v13817_v8 = vld [vmem:[%s17804_s0 + $0x620] sm:$0xff]  }
 0x10e   :  { %18030 = vst [vmem:[#allocation4_spill] sm:$0xff] %v14888_v49  ;;  %18031 = vst [vmem:[#allocation5_spill] sm:$0xff] %v14890_v17  ;;  %v14893_v24 = vpop.f32.mrb[25].mxu0  ;;  %v14895_v45 = vpop.f32.mrb[25].mxu1  ;;  %13402 = vmatprep.subr.bf16.mxu1 %v13825_v58  ;;  %v13859_v17 = vld [vmem:[%s17805_s2 + $0x58] sm:$0xff]  }
 0x10f   :  { %18032 = vst [vmem:[#allocation6_spill] sm:$0xff] %v14893_v24  ;;  %18033 = vst [vmem:[#allocation7_spill] sm:$0xff] %v14895_v45  ;;  %v14899_v29 = vpop.f32.mrb[26].mxu0  ;;  %v14901_v7 = vpop.f32.mrb[26].mxu1  ;;  %12593 = vmatpush3.bf16.msra.mxu0 %v13825_v58  ;;  %v13822_v49 = vld [vmem:[%s17804_s0 + $0x638] sm:$0xff]  }
 0x110   :  { %18034 = vst [vmem:[#allocation8_spill] sm:$0xff] %v14899_v29  ;;  %18035 = vst [vmem:[#allocation9_spill] sm:$0xff] %v14901_v7  ;;  %v14911_v60 = vpop.f32.mrb[27].mxu0  ;;  %v14913_v13 = vpop.f32.mrb[27].mxu1  ;;  %12594 = vmatprep.subr.bf16.mxu0 %v13842_v40  ;;  %v13819_v7 = vld [vmem:[%s17804_s0 + $0x430] sm:$0xff]   ;;  %v13820_v29 = vld [vmem:[%s17804_s0 + $0x438] sm:$0xff]  }
 0x111   :  { %18036 = vst [vmem:[#allocation10_spill] sm:$0xff] %v14911_v60  ;;  %18037 = vst [vmem:[#allocation11_spill] sm:$0xff] %v14913_v13  ;;  %13410 = vmatpush3.bf16.msra.mxu1 %v13825_v58  ;;  %v13818_v58 = vld [vmem:[%s17804_s0 + $0x628] sm:$0xff]  }
 0x112   :  { %12335 = vmatmul.mubr.msk.bf16.gmra.mrb[132].mxu0 %vm494_vm0, %v13812_v16  ;;  %12467 = vmatmul.mubr.msk.bf16.gmra.mrb[132].mxu1 %vm494_vm0, %v13814_v34 }
 0x113   :  { %12338 = vmatprep.mubr.msk.bf16.mxu0 %vm494_vm0, %v13815_v0  ;;  %12470 = vmatprep.mubr.msk.bf16.mxu1 %vm494_vm0, %v13817_v8 }
 0x114   :  { %12595 = vmatpush3.bf16.msra.mxu0 %v13842_v40  ;;  %13403 = vmatprep.subr.bf16.mxu1 %v13842_v40 }
 0x115   :  { %v14935_v16 = vpop.f32.mrb[28].mxu0  ;;  %v14937_v34 = vpop.f32.mrb[28].mxu1  ;;  %12596 = vmatprep.subr.bf16.mxu0 %v13859_v17  ;;  %13411 = vmatpush3.bf16.msra.mxu1 %v13842_v40  ;;  %v13821_v40 = vld [vmem:[%s17804_s0 + $0x630] sm:$0xff]  }
 0x116   :  { %18038 = vst [vmem:[#allocation12_spill] sm:$0xff] %v14935_v16  ;;  %18039 = vst [vmem:[#allocation13_spill] sm:$0xff] %v14937_v34  ;;  %v14939_v0 = vpop.f32.mrb[29].mxu0  ;;  %v14941_v8 = vpop.f32.mrb[29].mxu1  ;;  %13404 = vmatprep.subr.bf16.mxu1 %v13859_v17 }
 0x117   :  { %18040 = vst [vmem:[#allocation14_spill] sm:$0xff] %v14939_v0  ;;  %18041 = vst [vmem:[#allocation15_spill] sm:$0xff] %v14941_v8  ;;  %v14945_v13 = vpop.f32.mrb[30].mxu0  ;;  %v14947_v60 = vpop.f32.mrb[30].mxu1 }
 0x118   :  { %18042 = vst [vmem:[#allocation16_spill] sm:$0xff] %v14945_v13  ;;  %18043 = vst [vmem:[#allocation17_spill] sm:$0xff] %v14947_v60  ;;  %v14957_v45 = vpop.f32.mrb[31].mxu0  ;;  %v14959_v24 = vpop.f32.mrb[31].mxu1  ;;  %12597 = vmatpush3.bf16.msra.mxu0 %v13859_v17  ;;  %v13826_v60 = vld [vmem:[%s17804_s0 + $0x640] sm:$0xff]  }
 0x119   :  { %18044 = vst [vmem:[#allocation18_spill] sm:$0xff] %v14957_v45  ;;  %18045 = vst [vmem:[#allocation19_spill] sm:$0xff] %v14959_v24  ;;  %12598 = vmatprep.subr.bf16.mxu0 %v13876_v55  ;;  %13412 = vmatpush3.bf16.msra.mxu1 %v13859_v17  ;;  %v13823_v45 = vld [vmem:[%s17804_s0 + $0x440] sm:$0xff]  }
 0x11a   :  { %12339 = vmatmul.mubr.msk.bf16.gmra.mrb[136].mxu0 %vm494_vm0, %v13816_v63  ;;  %12471 = vmatmul.mubr.msk.bf16.gmra.mrb[136].mxu1 %vm494_vm0, %v13818_v58 }
 0x11b   :  { %12342 = vmatprep.mubr.msk.bf16.mxu0 %vm494_vm0, %v13819_v7  ;;  %12474 = vmatprep.mubr.msk.bf16.mxu1 %vm494_vm0, %v13821_v40 }
 0x11c   :  { %12599 = vmatpush3.bf16.msra.mxu0 %v13876_v55  ;;  %13405 = vmatprep.subr.bf16.mxu1 %v13876_v55 }
 0x11d   :  { %v14975_v34 = vpop.f32.mrb[32].mxu0  ;;  %v14977_v17 = vpop.f32.mrb[32].mxu1  ;;  %13413 = vmatpush3.bf16.msra.mxu1 %v13876_v55  ;;  %v13824_v55 = vld [vmem:[%s17804_s0 + $0x448] sm:$0xff]  }
 0x11e   :  { %18046 = vst [vmem:[#allocation20_spill] sm:$0xff] %v14975_v34  ;;  %18047 = vst [vmem:[#allocation21_spill] sm:$0xff] %v14977_v17  ;;  %v14979_v63 = vpop.f32.mrb[33].mxu0  ;;  %v14981_v7 = vpop.f32.mrb[33].mxu1 }
 0x11f   :  { %18048 = vst [vmem:[#allocation22_spill] sm:$0xff] %v14979_v63  ;;  %18049 = vst [vmem:[#allocation23_spill] sm:$0xff] %v14981_v7  ;;  %v14985_v40 = vpop.f32.mrb[34].mxu0  ;;  %v14987_v24 = vpop.f32.mrb[34].mxu1  ;;  %v13827_v7 = vld [vmem:[%s17804_s0 + $0x648] sm:$0xff]  }
 0x120   :  { %18050 = vst [vmem:[#allocation24_spill] sm:$0xff] %v14985_v40  ;;  %18051 = vst [vmem:[#allocation25_spill] sm:$0xff] %v14987_v24  ;;  %v14997_v13 = vpop.f32.mrb[35].mxu0  ;;  %v14999_v8 = vpop.f32.mrb[35].mxu1  ;;  %v13829_v40 = vld [vmem:[%s17804_s0 + $0x458] sm:$0xff]  }
 0x121   :  { %18052 = vst [vmem:[#allocation26_spill] sm:$0xff] %v14997_v13  ;;  %18053 = vst [vmem:[#allocation27_spill] sm:$0xff] %v14999_v8  ;;  %v13828_v8 = vld [vmem:[%s17804_s0 + $0x450] sm:$0xff]  }
 0x122   :  { %12343 = vmatmul.mubr.msk.bf16.gmra.mrb[140].mxu0 %vm494_vm0, %v13820_v29  ;;  %12475 = vmatmul.mubr.msk.bf16.gmra.mrb[140].mxu1 %vm494_vm0, %v13822_v49  ;;  %v13830_v13 = vld [vmem:[%s17804_s0 + $0x650] sm:$0xff]  }
 0x123   :  { %12346 = vmatprep.mubr.msk.bf16.mxu0 %vm494_vm0, %v13823_v45  ;;  %12478 = vmatprep.mubr.msk.bf16.mxu1 %vm494_vm0, %v13826_v60 }
 0x125   :  { %v15015_v58 = vpop.f32.mrb[36].mxu0  ;;  %v15017_v24 = vpop.f32.mrb[36].mxu1 }
 0x126   :  { %18054 = vst [vmem:[#allocation28_spill] sm:$0xff] %v15015_v58  ;;  %18055 = vst [vmem:[#allocation29_spill] sm:$0xff] %v15017_v24  ;;  %v15019_v17 = vpop.f32.mrb[37].mxu0  ;;  %v15021_v29 = vpop.f32.mrb[37].mxu1  ;;  %v13893_v58 = vld [vmem:[%s17805_s2 + $0x68] sm:$0xff]   ;;  %v13831_v24 = vld [vmem:[%s17804_s0 + $0x658] sm:$0xff]  }
 0x127   :  { %18056 = vst [vmem:[#allocation30_spill] sm:$0xff] %v15019_v17  ;;  %18057 = vst [vmem:[#allocation31_spill] sm:$0xff] %v15021_v29  ;;  %v15025_v60 = vpop.f32.mrb[38].mxu0  ;;  %v15027_v45 = vpop.f32.mrb[38].mxu1  ;;  %12600 = vmatprep.subr.bf16.mxu0 %v13893_v58  ;;  %13406 = vmatprep.subr.bf16.mxu1 %v13893_v58 }
 0x128   :  { %18058 = vst [vmem:[#allocation32_spill] sm:$0xff] %v15025_v60  ;;  %18059 = vst [vmem:[#allocation33_spill] sm:$0xff] %v15027_v45  ;;  %v15037_v63 = vpop.f32.mrb[39].mxu0  ;;  %v15039_v34 = vpop.f32.mrb[39].mxu1  ;;  %12601 = vmatpush3.bf16.msra.mxu0 %v13893_v58  ;;  %13414 = vmatpush3.bf16.msra.mxu1 %v13893_v58  ;;  %v13832_v45 = vld [vmem:[%s17804_s0 + $0x460] sm:$0xff]  }
 0x129   :  { %18060 = vst [vmem:[#allocation34_spill] sm:$0xff] %v15037_v63  ;;  %18061 = vst [vmem:[#allocation35_spill] sm:$0xff] %v15039_v34  ;;  %v13834_v60 = vld [vmem:[%s17804_s0 + $0x660] sm:$0xff]  }
 0x12a   :  { %12347 = vmatmul.mubr.msk.bf16.gmra.mrb[144].mxu0 %vm494_vm0, %v13824_v55  ;;  %12479 = vmatmul.mubr.msk.bf16.gmra.mrb[144].mxu1 %vm494_vm0, %v13827_v7 }
 0x12b   :  { %12350 = vmatprep.mubr.msk.bf16.mxu0 %vm494_vm0, %v13828_v8  ;;  %12482 = vmatprep.mubr.msk.bf16.mxu1 %vm494_vm0, %v13830_v13  ;;  %v13836_v13 = vld [vmem:[%s17804_s0 + $0x470] sm:$0xff]  }
 0x12d   :  { %v15058_v55 = vpop.f32.mrb[40].mxu0  ;;  %v15060_v7 = vpop.f32.mrb[40].mxu1 }
 0x12e   :  { %18062 = vst [vmem:[#allocation36_spill] sm:$0xff] %v15058_v55  ;;  %18063 = vst [vmem:[#allocation37_spill] sm:$0xff] %v15060_v7  ;;  %v15062_v49 = vpop.f32.mrb[41].mxu0  ;;  %v15064_v8 = vpop.f32.mrb[41].mxu1  ;;  %v13833_v7 = vld [vmem:[%s17804_s0 + $0x468] sm:$0xff]  }
 0x12f   :  { %18064 = vst [vmem:[#allocation38_spill] sm:$0xff] %v15062_v49  ;;  %18065 = vst [vmem:[#allocation39_spill] sm:$0xff] %v15064_v8  ;;  %v15068_v34 = vpop.f32.mrb[42].mxu0  ;;  %v15070_v63 = vpop.f32.mrb[42].mxu1 }
 0x130   :  { %18066 = vst [vmem:[#allocation40_spill] sm:$0xff] %v15068_v34  ;;  %18067 = vst [vmem:[#allocation41_spill] sm:$0xff] %v15070_v63  ;;  %v15080_v29 = vpop.f32.mrb[43].mxu0  ;;  %v15082_v17 = vpop.f32.mrb[43].mxu1 }
 0x131   :  { %18068 = vst [vmem:[#allocation42_spill] sm:$0xff] %v15080_v29  ;;  %18069 = vst [vmem:[#allocation43_spill] sm:$0xff] %v15082_v17  ;;  %v13838_v17 = vld [vmem:[%s17804_s0 + $0x670] sm:$0xff]  }
 0x132   :  { %12351 = vmatmul.mubr.msk.bf16.gmra.mrb[148].mxu0 %vm494_vm0, %v13829_v40  ;;  %12483 = vmatmul.mubr.msk.bf16.gmra.mrb[148].mxu1 %vm494_vm0, %v13831_v24  ;;  %v13835_v24 = vld [vmem:[%s17804_s0 + $0x668] sm:$0xff]   ;;  %v13840_v40 = vld [vmem:[%s17804_s0 + $0x480] sm:$0xff]  }
 0x133   :  { %12354 = vmatprep.mubr.msk.bf16.mxu0 %vm494_vm0, %v13832_v45  ;;  %12486 = vmatprep.mubr.msk.bf16.mxu1 %vm494_vm0, %v13834_v60 }
 0x135   :  { %v15092_v55 = vpop.f32.mrb[44].mxu0  ;;  %v15094_v58 = vpop.f32.mrb[44].mxu1 }
 0x136   :  { %18070 = vst [vmem:[#allocation44_spill] sm:$0xff] %v15092_v55  ;;  %18071 = vst [vmem:[#allocation45_spill] sm:$0xff] %v15094_v58  ;;  %v15096_v8 = vpop.f32.mrb[45].mxu0  ;;  %v15098_v49 = vpop.f32.mrb[45].mxu1  ;;  %v13837_v58 = vld [vmem:[%s17804_s0 + $0x478] sm:$0xff]  }
 0x137   :  { %18072 = vst [vmem:[#allocation46_spill] sm:$0xff] %v15096_v8  ;;  %18073 = vst [vmem:[#allocation47_spill] sm:$0xff] %v15098_v49  ;;  %v15108_v60 = vpop.f32.mrb[46].mxu0  ;;  %v15110_v45 = vpop.f32.mrb[46].mxu1 }
 0x138   :  { %18074 = vst [vmem:[#allocation48_spill] sm:$0xff] %v15108_v60  ;;  %18075 = vst [vmem:[#allocation49_spill] sm:$0xff] %v15110_v45  ;;  %v15120_v63 = vpop.f32.mrb[47].mxu0  ;;  %v15122_v34 = vpop.f32.mrb[47].mxu1 }
 0x139   :  { %18076 = vst [vmem:[#allocation50_spill] sm:$0xff] %v15120_v63  ;;  %18077 = vst [vmem:[#allocation51_spill] sm:$0xff] %v15122_v34  ;;  %v13843_v34 = vld [vmem:[%s17804_s0 + $0x680] sm:$0xff]  }
 0x13a   :  { %12355 = vmatmul.mubr.msk.bf16.gmra.mrb[152].mxu0 %vm494_vm0, %v13833_v7  ;;  %12487 = vmatmul.mubr.msk.bf16.gmra.mrb[152].mxu1 %vm494_vm0, %v13835_v24  ;;  %v13839_v7 = vld [vmem:[%s17804_s0 + $0x678] sm:$0xff]  }
 0x13b   :  { %12358 = vmatprep.mubr.msk.bf16.mxu0 %vm494_vm0, %v13836_v13  ;;  %12490 = vmatprep.mubr.msk.bf16.mxu1 %vm494_vm0, %v13838_v17  ;;  %v13845_v13 = vld [vmem:[%s17804_s0 + $0x490] sm:$0xff]  }
 0x13d   :  { %v15132_v55 = vpop.f32.mrb[48].mxu0  ;;  %v15134_v29 = vpop.f32.mrb[48].mxu1 }
 0x13e   :  { %18078 = vst [vmem:[#allocation52_spill] sm:$0xff] %v15132_v55  ;;  %18079 = vst [vmem:[#allocation53_spill] sm:$0xff] %v15134_v29  ;;  %v15136_v49 = vpop.f32.mrb[49].mxu0  ;;  %v15138_v8 = vpop.f32.mrb[49].mxu1  ;;  %v13841_v29 = vld [vmem:[%s17804_s0 + $0x488] sm:$0xff]  }
 0x13f   :  { %18080 = vst [vmem:[#allocation54_spill] sm:$0xff] %v15136_v49  ;;  %18081 = vst [vmem:[#allocation55_spill] sm:$0xff] %v15138_v8  ;;  %v15148_v17 = vpop.f32.mrb[50].mxu0  ;;  %v15150_v24 = vpop.f32.mrb[50].mxu1 }
 0x140   :  { %18082 = vst [vmem:[#allocation56_spill] sm:$0xff] %v15148_v17  ;;  %18083 = vst [vmem:[#allocation57_spill] sm:$0xff] %v15150_v24  ;;  %v15160_v45 = vpop.f32.mrb[51].mxu0  ;;  %v15162_v60 = vpop.f32.mrb[51].mxu1 }
 0x141   :  { %18084 = vst [vmem:[#allocation58_spill] sm:$0xff] %v15160_v45  ;;  %18085 = vst [vmem:[#allocation59_spill] sm:$0xff] %v15162_v60  ;;  %v13847_v60 = vld [vmem:[%s17804_s0 + $0x690] sm:$0xff]  }
 0x142   :  { %12359 = vmatmul.mubr.msk.bf16.gmra.mrb[156].mxu0 %vm494_vm0, %v13837_v58  ;;  %12491 = vmatmul.mubr.msk.bf16.gmra.mrb[156].mxu1 %vm494_vm0, %v13839_v7  ;;  %v13844_v58 = vld [vmem:[%s17804_s0 + $0x688] sm:$0xff]  }
 0x143   :  { %12362 = vmatprep.mubr.msk.bf16.mxu0 %vm494_vm0, %v13840_v40  ;;  %12494 = vmatprep.mubr.msk.bf16.mxu1 %vm494_vm0, %v13843_v34 }
 0x145   :  { %v15172_v55 = vpop.f32.mrb[52].mxu0  ;;  %v15174_v63 = vpop.f32.mrb[52].mxu1 }
 0x146   :  { %18086 = vst [vmem:[#allocation60_spill] sm:$0xff] %v15172_v55  ;;  %18087 = vst [vmem:[#allocation61_spill] sm:$0xff] %v15174_v63  ;;  %v15176_v8 = vpop.f32.mrb[53].mxu0  ;;  %v15178_v49 = vpop.f32.mrb[53].mxu1  ;;  %v13910_v55 = vld [vmem:[%s17805_s2 + $0x70] sm:$0xff]  }
 0x147   :  { %18088 = vst [vmem:[#allocation62_spill] sm:$0xff] %v15176_v8  ;;  %18089 = vst [vmem:[#allocation63_spill] sm:$0xff] %v15178_v49  ;;  %v15188_v34 = vpop.f32.mrb[54].mxu0  ;;  %v15190_v7 = vpop.f32.mrb[54].mxu1  ;;  %12602 = vmatprep.subr.bf16.mxu0 %v13910_v55  ;;  %13407 = vmatprep.subr.bf16.mxu1 %v13910_v55 }
 0x148   :  { %18090 = vst [vmem:[#allocation64_spill] sm:$0xff] %v15188_v34  ;;  %18091 = vst [vmem:[#allocation65_spill] sm:$0xff] %v15190_v7  ;;  %v15200_v24 = vpop.f32.mrb[55].mxu0  ;;  %v15202_v17 = vpop.f32.mrb[55].mxu1  ;;  %12603 = vmatpush3.bf16.msra.mxu0 %v13910_v55  ;;  %13415 = vmatpush3.bf16.msra.mxu1 %v13910_v55  ;;  %v13849_v55 = vld [vmem:[%s17804_s0 + $0x4a0] sm:$0xff]  }
 0x149   :  { %18092 = vst [vmem:[#allocation66_spill] sm:$0xff] %v15200_v24  ;;  %18093 = vst [vmem:[#allocation67_spill] sm:$0xff] %v15202_v17  ;;  %v13851_v7 = vld [vmem:[%s17804_s0 + $0x6a0] sm:$0xff]  }
 0x14a   :  { %12363 = vmatmul.mubr.msk.bf16.gmra.mrb[160].mxu0 %vm494_vm0, %v13841_v29  ;;  %12495 = vmatmul.mubr.msk.bf16.gmra.mrb[160].mxu1 %vm494_vm0, %v13844_v58  ;;  %v13846_v58 = vld [vmem:[%s17804_s0 + $0x498] sm:$0xff]  }
 0x14b   :  { %12366 = vmatprep.mubr.msk.bf16.mxu0 %vm494_vm0, %v13845_v13  ;;  %12498 = vmatprep.mubr.msk.bf16.mxu1 %vm494_vm0, %v13847_v60  ;;  %v13848_v60 = vld [vmem:[%s17804_s0 + $0x698] sm:$0xff]   ;;  %v13853_v13 = vld [vmem:[%s17804_s0 + $0x4b0] sm:$0xff]  }
 0x14d   :  { %v15215_v45 = vpop.f32.mrb[56].mxu0  ;;  %v15217_v40 = vpop.f32.mrb[56].mxu1 }
 0x14e   :  { %18094 = vst [vmem:[#allocation68_spill] sm:$0xff] %v15215_v45  ;;  %18095 = vst [vmem:[#allocation69_spill] sm:$0xff] %v15217_v40  ;;  %v15219_v63 = vpop.f32.mrb[57].mxu0  ;;  %v15221_v29 = vpop.f32.mrb[57].mxu1  ;;  %v13850_v40 = vld [vmem:[%s17804_s0 + $0x4a8] sm:$0xff]  }
 0x14f   :  { %18096 = vst [vmem:[#allocation70_spill] sm:$0xff] %v15219_v63  ;;  %18097 = vst [vmem:[#allocation71_spill] sm:$0xff] %v15221_v29  ;;  %v15231_v17 = vpop.f32.mrb[58].mxu0  ;;  %v15233_v24 = vpop.f32.mrb[58].mxu1 }
 0x150   :  { %18098 = vst [vmem:[#allocation72_spill] sm:$0xff] %v15231_v17  ;;  %18099 = vst [vmem:[#allocation73_spill] sm:$0xff] %v15233_v24  ;;  %v15243_v49 = vpop.f32.mrb[59].mxu0  ;;  %v15245_v8 = vpop.f32.mrb[59].mxu1 }
 0x151   :  { %18100 = vst [vmem:[#allocation74_spill] sm:$0xff] %v15243_v49  ;;  %18101 = vst [vmem:[#allocation75_spill] sm:$0xff] %v15245_v8  ;;  %v13855_v8 = vld [vmem:[%s17804_s0 + $0x6b0] sm:$0xff]  }
 0x152   :  { %12367 = vmatmul.mubr.msk.bf16.gmra.mrb[164].mxu0 %vm494_vm0, %v13846_v58  ;;  %12499 = vmatmul.mubr.msk.bf16.gmra.mrb[164].mxu1 %vm494_vm0, %v13848_v60  ;;  %v13852_v58 = vld [vmem:[%s17804_s0 + $0x6a8] sm:$0xff]   ;;  %v13857_v60 = vld [vmem:[%s17804_s0 + $0x4c0] sm:$0xff]  }
 0x153   :  { %12370 = vmatprep.mubr.msk.bf16.mxu0 %vm494_vm0, %v13849_v55  ;;  %12502 = vmatprep.mubr.msk.bf16.mxu1 %vm494_vm0, %v13851_v7 }
 0x155   :  { %v15255_v45 = vpop.f32.mrb[60].mxu0  ;;  %v15257_v34 = vpop.f32.mrb[60].mxu1 }
 0x156   :  { %18102 = vst [vmem:[#allocation76_spill] sm:$0xff] %v15255_v45  ;;  %18103 = vst [vmem:[#allocation77_spill] sm:$0xff] %v15257_v34  ;;  %v15259_v29 = vpop.f32.mrb[61].mxu0  ;;  %v15261_v63 = vpop.f32.mrb[61].mxu1  ;;  %v13854_v34 = vld [vmem:[%s17804_s0 + $0x4b8] sm:$0xff]  }
 0x157   :  { %18104 = vst [vmem:[#allocation78_spill] sm:$0xff] %v15259_v29  ;;  %18105 = vst [vmem:[#allocation79_spill] sm:$0xff] %v15261_v63  ;;  %v15271_v7 = vpop.f32.mrb[62].mxu0  ;;  %v15273_v55 = vpop.f32.mrb[62].mxu1 }
 0x158   :  { %18106 = vst [vmem:[#allocation80_spill] sm:$0xff] %v15271_v7  ;;  %18107 = vst [vmem:[#allocation81_spill] sm:$0xff] %v15273_v55  ;;  %v15283_v24 = vpop.f32.mrb[63].mxu0  ;;  %v15285_v17 = vpop.f32.mrb[63].mxu1 }
 0x159   :  { %18108 = vst [vmem:[#allocation82_spill] sm:$0xff] %v15283_v24  ;;  %18109 = vst [vmem:[#allocation83_spill] sm:$0xff] %v15285_v17  ;;  %v13860_v17 = vld [vmem:[%s17804_s0 + $0x6c0] sm:$0xff]  }
 0x15a   :  { %12371 = vmatmul.mubr.msk.bf16.gmra.mrb[168].mxu0 %vm494_vm0, %v13850_v40  ;;  %12503 = vmatmul.mubr.msk.bf16.gmra.mrb[168].mxu1 %vm494_vm0, %v13852_v58  ;;  %v13856_v40 = vld [vmem:[%s17804_s0 + $0x6b8] sm:$0xff]  }
 0x15b   :  { %12374 = vmatprep.mubr.msk.bf16.mxu0 %vm494_vm0, %v13853_v13  ;;  %12506 = vmatprep.mubr.msk.bf16.mxu1 %vm494_vm0, %v13855_v8  ;;  %v13862_v13 = vld [vmem:[%s17804_s0 + $0x4d0] sm:$0xff]  }
 0x15d   :  { %v15295_v45 = vpop.f32.mrb[64].mxu0  ;;  %v15297_v49 = vpop.f32.mrb[64].mxu1 }
 0x15e   :  { %18110 = vst [vmem:[#allocation84_spill] sm:$0xff] %v15295_v45  ;;  %18111 = vst [vmem:[#allocation85_spill] sm:$0xff] %v15297_v49  ;;  %v15299_v63 = vpop.f32.mrb[65].mxu0  ;;  %v15301_v29 = vpop.f32.mrb[65].mxu1  ;;  %v13858_v49 = vld [vmem:[%s17804_s0 + $0x4c8] sm:$0xff]  }
 0x15f   :  { %18112 = vst [vmem:[#allocation86_spill] sm:$0xff] %v15299_v63  ;;  %18113 = vst [vmem:[#allocation87_spill] sm:$0xff] %v15301_v29  ;;  %v15311_v8 = vpop.f32.mrb[66].mxu0  ;;  %v15313_v58 = vpop.f32.mrb[66].mxu1 }
 0x160   :  { %18114 = vst [vmem:[#allocation88_spill] sm:$0xff] %v15311_v8  ;;  %18115 = vst [vmem:[#allocation89_spill] sm:$0xff] %v15313_v58  ;;  %v15323_v55 = vpop.f32.mrb[67].mxu0  ;;  %v15325_v7 = vpop.f32.mrb[67].mxu1 }
 0x161   :  { %18116 = vst [vmem:[#allocation90_spill] sm:$0xff] %v15323_v55  ;;  %18117 = vst [vmem:[#allocation91_spill] sm:$0xff] %v15325_v7  ;;  %v13864_v7 = vld [vmem:[%s17804_s0 + $0x6d0] sm:$0xff]  }
 0x162   :  { %12375 = vmatmul.mubr.msk.bf16.gmra.mrb[172].mxu0 %vm494_vm0, %v13854_v34  ;;  %12507 = vmatmul.mubr.msk.bf16.gmra.mrb[172].mxu1 %vm494_vm0, %v13856_v40  ;;  %v13861_v34 = vld [vmem:[%s17804_s0 + $0x6c8] sm:$0xff]  }
 0x163   :  { %12378 = vmatprep.mubr.msk.bf16.mxu0 %vm494_vm0, %v13857_v60  ;;  %12510 = vmatprep.mubr.msk.bf16.mxu1 %vm494_vm0, %v13860_v17  ;;  %v13866_v60 = vld [vmem:[%s17804_s0 + $0x4e0] sm:$0xff]  }
 0x165   :  { %v15335_v45 = vpop.f32.mrb[68].mxu0  ;;  %v15337_v24 = vpop.f32.mrb[68].mxu1 }
 0x166   :  { %18118 = vst [vmem:[#allocation92_spill] sm:$0xff] %v15335_v45  ;;  %18119 = vst [vmem:[#allocation93_spill] sm:$0xff] %v15337_v24  ;;  %v15339_v29 = vpop.f32.mrb[69].mxu0  ;;  %v15341_v63 = vpop.f32.mrb[69].mxu1  ;;  %v13863_v24 = vld [vmem:[%s17804_s0 + $0x4d8] sm:$0xff]  }
 0x167   :  { %18120 = vst [vmem:[#allocation94_spill] sm:$0xff] %v15339_v29  ;;  %18121 = vst [vmem:[#allocation95_spill] sm:$0xff] %v15341_v63  ;;  %v15351_v17 = vpop.f32.mrb[70].mxu0  ;;  %v15353_v40 = vpop.f32.mrb[70].mxu1 }
 0x168   :  { %18122 = vst [vmem:[#allocation96_spill] sm:$0xff] %v15351_v17  ;;  %18123 = vst [vmem:[#allocation97_spill] sm:$0xff] %v15353_v40  ;;  %v15363_v58 = vpop.f32.mrb[71].mxu0  ;;  %v15365_v8 = vpop.f32.mrb[71].mxu1  ;;  %v13870_v17 = vld [vmem:[%s17804_s0 + $0x4f0] sm:$0xff]  }
 0x169   :  { %18124 = vst [vmem:[#allocation98_spill] sm:$0xff] %v15363_v58  ;;  %18125 = vst [vmem:[#allocation99_spill] sm:$0xff] %v15365_v8  ;;  %v13868_v8 = vld [vmem:[%s17804_s0 + $0x6e0] sm:$0xff]   ;;  %v13927_v58 = vld [vmem:[%s17805_s2 + $0x78] sm:$0xff]  }
 0x16a   :  { %12379 = vmatmul.mubr.msk.bf16.gmra.mrb[176].mxu0 %vm494_vm0, %v13858_v49  ;;  %12511 = vmatmul.mubr.msk.bf16.gmra.mrb[176].mxu1 %vm494_vm0, %v13861_v34  ;;  %v13865_v49 = vld [vmem:[%s17804_s0 + $0x6d8] sm:$0xff]  }
 0x16b   :  { %12382 = vmatprep.mubr.msk.bf16.mxu0 %vm494_vm0, %v13862_v13  ;;  %12514 = vmatprep.mubr.msk.bf16.mxu1 %vm494_vm0, %v13864_v7 }
 0x16c   :  { %12604 = vmatprep.subr.bf16.mxu0 %v13927_v58  ;;  %13408 = vmatprep.subr.bf16.mxu1 %v13927_v58 }
 0x16d   :  { %v15375_v45 = vpop.f32.mrb[72].mxu0  ;;  %v15377_v55 = vpop.f32.mrb[72].mxu1  ;;  %12605 = vmatpush3.bf16.msra.mxu0 %v13927_v58  ;;  %13416 = vmatpush3.bf16.msra.mxu1 %v13927_v58 }
 0x16e   :  { %18126 = vst [vmem:[#allocation100_spill] sm:$0xff] %v15375_v45  ;;  %18127 = vst [vmem:[#allocation101_spill] sm:$0xff] %v15377_v55  ;;  %v15379_v63 = vpop.f32.mrb[73].mxu0  ;;  %v15381_v29 = vpop.f32.mrb[73].mxu1 }
 0x16f   :  { %18128 = vst [vmem:[#allocation102_spill] sm:$0xff] %v15379_v63  ;;  %18129 = vst [vmem:[#allocation103_spill] sm:$0xff] %v15381_v29  ;;  %v15391_v7 = vpop.f32.mrb[74].mxu0  ;;  %v15393_v34 = vpop.f32.mrb[74].mxu1 }
 0x170   :  { %18130 = vst [vmem:[#allocation104_spill] sm:$0xff] %v15391_v7  ;;  %18131 = vst [vmem:[#allocation105_spill] sm:$0xff] %v15393_v34  ;;  %v15406_v13 = vpop.f32.mrb[75].mxu0  ;;  %v15408_v55 = vpop.f32.mrb[75].mxu1 }
 0x171   :  { %18132 = vst [vmem:[#allocation106_spill] sm:$0xff] %v15406_v13  ;;  %18133 = vst [vmem:[#allocation107_spill] sm:$0xff] %v15408_v55  ;;  %v13872_v55 = vld [vmem:[%s17804_s0 + $0x6f0] sm:$0xff]  }
 0x172   :  { %12383 = vmatmul.mubr.msk.bf16.gmra.mrb[180].mxu0 %vm494_vm0, %v13863_v24  ;;  %12515 = vmatmul.mubr.msk.bf16.gmra.mrb[180].mxu1 %vm494_vm0, %v13865_v49  ;;  %v13867_v24 = vld [vmem:[%s17804_s0 + $0x4e8] sm:$0xff]  }
 0x173   :  { %12386 = vmatprep.mubr.msk.bf16.mxu0 %vm494_vm0, %v13866_v60  ;;  %12518 = vmatprep.mubr.msk.bf16.mxu1 %vm494_vm0, %v13868_v8  ;;  %v13869_v60 = vld [vmem:[%s17804_s0 + $0x6e8] sm:$0xff]   ;;  %v13874_v8 = vld [vmem:[%s17804_s0 + $0x500] sm:$0xff]  }
 0x175   :  { %v15418_v40 = vpop.f32.mrb[76].mxu0  ;;  %v15420_v29 = vpop.f32.mrb[76].mxu1 }
 0x176   :  { %18134 = vst [vmem:[#allocation108_spill] sm:$0xff] %v15418_v40  ;;  %18135 = vst [vmem:[#allocation109_spill] sm:$0xff] %v15420_v29  ;;  %v15422_v45 = vpop.f32.mrb[77].mxu0  ;;  %v15424_v34 = vpop.f32.mrb[77].mxu1  ;;  %v13871_v29 = vld [vmem:[%s17804_s0 + $0x4f8] sm:$0xff]  }
 0x177   :  { %18136 = vst [vmem:[#allocation110_spill] sm:$0xff] %v15422_v45  ;;  %18137 = vst [vmem:[#allocation111_spill] sm:$0xff] %v15424_v34  ;;  %v15434_v58 = vpop.f32.mrb[78].mxu0  ;;  %v15436_v49 = vpop.f32.mrb[78].mxu1 }
 0x178   :  { %18138 = vst [vmem:[#allocation112_spill] sm:$0xff] %v15434_v58  ;;  %18139 = vst [vmem:[#allocation113_spill] sm:$0xff] %v15436_v49  ;;  %v15446_v7 = vpop.f32.mrb[79].mxu0  ;;  %v15448_v63 = vpop.f32.mrb[79].mxu1  ;;  %v13879_v49 = vld [vmem:[%s17804_s0 + $0x510] sm:$0xff]  }
 0x179   :  { %18140 = vst [vmem:[#allocation114_spill] sm:$0xff] %v15446_v7  ;;  %18141 = vst [vmem:[#allocation115_spill] sm:$0xff] %v15448_v63  ;;  %v13877_v63 = vld [vmem:[%s17804_s0 + $0x700] sm:$0xff]  }
 0x17a   :  { %12387 = vmatmul.mubr.msk.bf16.gmra.mrb[184].mxu0 %vm494_vm0, %v13867_v24  ;;  %12519 = vmatmul.mubr.msk.bf16.gmra.mrb[184].mxu1 %vm494_vm0, %v13869_v60  ;;  %v13873_v24 = vld [vmem:[%s17804_s0 + $0x6f8] sm:$0xff]  }
 0x17b   :  { %12390 = vmatprep.mubr.msk.bf16.mxu0 %vm494_vm0, %v13870_v17  ;;  %12522 = vmatprep.mubr.msk.bf16.mxu1 %vm494_vm0, %v13872_v55 }
 0x17d   :  { %v15458_v40 = vpop.f32.mrb[80].mxu0  ;;  %v15460_v13 = vpop.f32.mrb[80].mxu1 }
 0x17e   :  { %18142 = vst [vmem:[#allocation116_spill] sm:$0xff] %v15458_v40  ;;  %18143 = vst [vmem:[#allocation117_spill] sm:$0xff] %v15460_v13  ;;  %v15462_v34 = vpop.f32.mrb[81].mxu0  ;;  %v15464_v45 = vpop.f32.mrb[81].mxu1 }
 0x17f   :  { %18144 = vst [vmem:[#allocation118_spill] sm:$0xff] %v15462_v34  ;;  %18145 = vst [vmem:[#allocation119_spill] sm:$0xff] %v15464_v45  ;;  %v15474_v55 = vpop.f32.mrb[82].mxu0  ;;  %v15476_v60 = vpop.f32.mrb[82].mxu1 }
 0x180   :  { %18146 = vst [vmem:[#allocation120_spill] sm:$0xff] %v15474_v55  ;;  %18147 = vst [vmem:[#allocation121_spill] sm:$0xff] %v15476_v60  ;;  %v15488_v58 = vpop.f32.mrb[83].mxu0  ;;  %v15490_v17 = vpop.f32.mrb[83].mxu1 }
 0x181   :  { %18148 = vst [vmem:[#allocation122_spill] sm:$0xff] %v15488_v58  ;;  %18149 = vst [vmem:[#allocation123_spill] sm:$0xff] %v15490_v17 }
 0x182   :  { %12391 = vmatmul.mubr.msk.bf16.gmra.mrb[188].mxu0 %vm494_vm0, %v13871_v29  ;;  %12523 = vmatmul.mubr.msk.bf16.gmra.mrb[188].mxu1 %vm494_vm0, %v13873_v24  ;;  %v13875_v29 = vld [vmem:[%s17804_s0 + $0x508] sm:$0xff]  }
 0x183   :  { %12394 = vmatprep.mubr.msk.bf16.mxu0 %vm494_vm0, %v13874_v8  ;;  %12526 = vmatprep.mubr.msk.bf16.mxu1 %vm494_vm0, %v13877_v63  ;;  %v13878_v8 = vld [vmem:[%s17804_s0 + $0x708] sm:$0xff]   ;;  %v15535_v63 = vld [vmem:[%s17805_s2] sm:$0xff]  }
 0x184   :  { %18158 = vst [vmem:[#allocation132_spill] sm:$0xff] %v15535_v63  ;;  %12638 = vmatprep.subr.bf16.mxu0 %v15535_v63 }
 0x185   :  { %v15498_v40 = vpop.f32.mrb[84].mxu0  ;;  %v15500_v7 = vpop.f32.mrb[84].mxu1 }
 0x186   :  { %18150 = vst [vmem:[#allocation124_spill] sm:$0xff] %v15498_v40  ;;  %18151 = vst [vmem:[#allocation125_spill] sm:$0xff] %v15500_v7  ;;  %v15504_v60 = vpop.f32.mrb[85].mxu0  ;;  %v15506_v55 = vpop.f32.mrb[85].mxu1  ;;  %v13881_v7 = vld [vmem:[%s17804_s0 + $0x710] sm:$0xff]  }
 0x187   :  { %18152 = vst [vmem:[#allocation126_spill] sm:$0xff] %v15504_v60  ;;  %18153 = vst [vmem:[#allocation127_spill] sm:$0xff] %v15506_v55  ;;  %v15516_v24 = vpop.f32.mrb[86].mxu0  ;;  %v15518_v13 = vpop.f32.mrb[86].mxu1 }
 0x188   :  { %18154 = vst [vmem:[#allocation128_spill] sm:$0xff] %v15516_v24  ;;  %18155 = vst [vmem:[#allocation129_spill] sm:$0xff] %v15518_v13  ;;  %v15528_v17 = vpop.f32.mrb[87].mxu0  ;;  %v15530_v58 = vpop.f32.mrb[87].mxu1  ;;  %v13883_v24 = vld [vmem:[%s17804_s0 + $0x520] sm:$0xff]  }
 0x189   :  { %18156 = vst [vmem:[#allocation130_spill] sm:$0xff] %v15528_v17  ;;  %18157 = vst [vmem:[#allocation131_spill] sm:$0xff] %v15530_v58 }
 0x18a   :  { %12395 = vmatmul.mubr.msk.bf16.gmra.mrb[192].mxu0 %vm494_vm0, %v13875_v29  ;;  %12527 = vmatmul.mubr.msk.bf16.gmra.mrb[192].mxu1 %vm494_vm0, %v13878_v8  ;;  %v13880_v29 = vld [vmem:[%s17804_s0 + $0x518] sm:$0xff]  }
 0x18b   :  { %12398 = vmatprep.mubr.msk.bf16.mxu0 %vm494_vm0, %v13879_v49  ;;  %12530 = vmatprep.mubr.msk.bf16.mxu1 %vm494_vm0, %v13881_v7  ;;  %v13882_v7 = vld [vmem:[%s17804_s0 + $0x718] sm:$0xff]  }
 0x18d   :  { %v15544_v40 = vpop.f32.mrb[88].mxu0  ;;  %v15546_v13 = vpop.f32.mrb[88].mxu1 }
 0x18e   :  { %18159 = vst [vmem:[#allocation133_spill] sm:$0xff] %v15544_v40  ;;  %18160 = vst [vmem:[#allocation134_spill] sm:$0xff] %v15546_v13  ;;  %v15550_v60 = vpop.f32.mrb[89].mxu0  ;;  %v15552_v55 = vpop.f32.mrb[89].mxu1  ;;  %v13885_v13 = vld [vmem:[%s17804_s0 + $0x720] sm:$0xff]   ;;  %v13887_v40 = vld [vmem:[%s17804_s0 + $0x530] sm:$0xff]  }
 0x18f   :  { %18161 = vst [vmem:[#allocation135_spill] sm:$0xff] %v15550_v60  ;;  %18162 = vst [vmem:[#allocation136_spill] sm:$0xff] %v15552_v55  ;;  %v15562_v8 = vpop.f32.mrb[90].mxu0  ;;  %v15564_v58 = vpop.f32.mrb[90].mxu1 }
 0x190   :  { %18163 = vst [vmem:[#allocation137_spill] sm:$0xff] %v15562_v8  ;;  %18164 = vst [vmem:[#allocation138_spill] sm:$0xff] %v15564_v58  ;;  %v15574_v17 = vpop.f32.mrb[91].mxu0  ;;  %v15576_v45 = vpop.f32.mrb[91].mxu1 }
 0x191   :  { %18165 = vst [vmem:[#allocation139_spill] sm:$0xff] %v15574_v17  ;;  %18166 = vst [vmem:[#allocation140_spill] sm:$0xff] %v15576_v45 }
 0x192   :  { %12399 = vmatmul.mubr.msk.bf16.gmra.mrb[196].mxu0 %vm494_vm0, %v13880_v29  ;;  %12531 = vmatmul.mubr.msk.bf16.gmra.mrb[196].mxu1 %vm494_vm0, %v13882_v7  ;;  %v13884_v29 = vld [vmem:[%s17804_s0 + $0x528] sm:$0xff]  }
 0x193   :  { %12402 = vmatprep.mubr.msk.bf16.mxu0 %vm494_vm0, %v13883_v24  ;;  %12534 = vmatprep.mubr.msk.bf16.mxu1 %vm494_vm0, %v13885_v13  ;;  %v13886_v24 = vld [vmem:[%s17804_s0 + $0x728] sm:$0xff]  }
 0x195   :  { %v15584_v55 = vpop.f32.mrb[92].mxu0  ;;  %v15586_v60 = vpop.f32.mrb[92].mxu1 }
 0x196   :  { %18167 = vst [vmem:[#allocation141_spill] sm:$0xff] %v15584_v55  ;;  %18168 = vst [vmem:[#allocation142_spill] sm:$0xff] %v15586_v60  ;;  %v15590_v58 = vpop.f32.mrb[93].mxu0  ;;  %v15592_v8 = vpop.f32.mrb[93].mxu1  ;;  %v13889_v60 = vld [vmem:[%s17804_s0 + $0x730] sm:$0xff]   ;;  %v13891_v55 = vld [vmem:[%s17804_s0 + $0x540] sm:$0xff]  }
 0x197   :  { %18169 = vst [vmem:[#allocation143_spill] sm:$0xff] %v15590_v58  ;;  %18170 = vst [vmem:[#allocation144_spill] sm:$0xff] %v15592_v8  ;;  %v15602_v7 = vpop.f32.mrb[94].mxu0  ;;  %v15604_v49 = vpop.f32.mrb[94].mxu1 }
 0x198   :  { %18171 = vst [vmem:[#allocation145_spill] sm:$0xff] %v15602_v7  ;;  %18172 = vst [vmem:[#allocation146_spill] sm:$0xff] %v15604_v49  ;;  %v15614_v45 = vpop.f32.mrb[95].mxu0  ;;  %v15616_v17 = vpop.f32.mrb[95].mxu1 }
 0x199   :  { %18173 = vst [vmem:[#allocation147_spill] sm:$0xff] %v15614_v45  ;;  %18174 = vst [vmem:[#allocation148_spill] sm:$0xff] %v15616_v17 }
 0x19a   :  { %12403 = vmatmul.mubr.msk.bf16.gmra.mrb[200].mxu0 %vm494_vm0, %v13884_v29  ;;  %12535 = vmatmul.mubr.msk.bf16.gmra.mrb[200].mxu1 %vm494_vm0, %v13886_v24  ;;  %v13888_v29 = vld [vmem:[%s17804_s0 + $0x538] sm:$0xff]  }
 0x19b   :  { %12406 = vmatprep.mubr.msk.bf16.mxu0 %vm494_vm0, %v13887_v40  ;;  %12538 = vmatprep.mubr.msk.bf16.mxu1 %vm494_vm0, %v13889_v60  ;;  %v13890_v40 = vld [vmem:[%s17804_s0 + $0x738] sm:$0xff]  }
 0x19d   :  { %v15624_v8 = vpop.f32.mrb[96].mxu0  ;;  %v15626_v58 = vpop.f32.mrb[96].mxu1 }
 0x19e   :  { %18175 = vst [vmem:[#allocation149_spill] sm:$0xff] %v15624_v8  ;;  %18176 = vst [vmem:[#allocation150_spill] sm:$0xff] %v15626_v58  ;;  %v15630_v49 = vpop.f32.mrb[97].mxu0  ;;  %v15632_v7 = vpop.f32.mrb[97].mxu1  ;;  %v13894_v58 = vld [vmem:[%s17804_s0 + $0x740] sm:$0xff]   ;;  %v13896_v8 = vld [vmem:[%s17804_s0 + $0x550] sm:$0xff]  }
 0x19f   :  { %18177 = vst [vmem:[#allocation151_spill] sm:$0xff] %v15630_v49  ;;  %18178 = vst [vmem:[#allocation152_spill] sm:$0xff] %v15632_v7  ;;  %v15642_v24 = vpop.f32.mrb[98].mxu0  ;;  %v15644_v13 = vpop.f32.mrb[98].mxu1 }
 0x1a0   :  { %18179 = vst [vmem:[#allocation153_spill] sm:$0xff] %v15642_v24  ;;  %18180 = vst [vmem:[#allocation154_spill] sm:$0xff] %v15644_v13  ;;  %v15654_v17 = vpop.f32.mrb[99].mxu0  ;;  %v15656_v45 = vpop.f32.mrb[99].mxu1 }
 0x1a1   :  { %18181 = vst [vmem:[#allocation155_spill] sm:$0xff] %v15654_v17  ;;  %18182 = vst [vmem:[#allocation156_spill] sm:$0xff] %v15656_v45 }
 0x1a2   :  { %12407 = vmatmul.mubr.msk.bf16.gmra.mrb[204].mxu0 %vm494_vm0, %v13888_v29  ;;  %12539 = vmatmul.mubr.msk.bf16.gmra.mrb[204].mxu1 %vm494_vm0, %v13890_v40  ;;  %v13892_v29 = vld [vmem:[%s17804_s0 + $0x548] sm:$0xff]  }
 0x1a3   :  { %12410 = vmatprep.mubr.msk.bf16.mxu0 %vm494_vm0, %v13891_v55  ;;  %12542 = vmatprep.mubr.msk.bf16.mxu1 %vm494_vm0, %v13894_v58  ;;  %v13895_v55 = vld [vmem:[%s17804_s0 + $0x748] sm:$0xff]  }
 0x1a5   :  { %v15664_v7 = vpop.f32.mrb[100].mxu0  ;;  %v15666_v49 = vpop.f32.mrb[100].mxu1 }
 0x1a6   :  { %18183 = vst [vmem:[#allocation157_spill] sm:$0xff] %v15664_v7  ;;  %18184 = vst [vmem:[#allocation158_spill] sm:$0xff] %v15666_v49  ;;  %v15670_v13 = vpop.f32.mrb[101].mxu0  ;;  %v15672_v24 = vpop.f32.mrb[101].mxu1  ;;  %v13898_v49 = vld [vmem:[%s17804_s0 + $0x750] sm:$0xff]   ;;  %v13900_v7 = vld [vmem:[%s17804_s0 + $0x560] sm:$0xff]  }
 0x1a7   :  { %18185 = vst [vmem:[#allocation159_spill] sm:$0xff] %v15670_v13  ;;  %18186 = vst [vmem:[#allocation160_spill] sm:$0xff] %v15672_v24  ;;  %v15682_v40 = vpop.f32.mrb[102].mxu0  ;;  %v15684_v60 = vpop.f32.mrb[102].mxu1 }
 0x1a8   :  { %18187 = vst [vmem:[#allocation161_spill] sm:$0xff] %v15682_v40  ;;  %18188 = vst [vmem:[#allocation162_spill] sm:$0xff] %v15684_v60  ;;  %v15694_v45 = vpop.f32.mrb[103].mxu0  ;;  %v15696_v17 = vpop.f32.mrb[103].mxu1 }
 0x1a9   :  { %18189 = vst [vmem:[#allocation163_spill] sm:$0xff] %v15694_v45  ;;  %18190 = vst [vmem:[#allocation164_spill] sm:$0xff] %v15696_v17 }
 0x1aa   :  { %12411 = vmatmul.mubr.msk.bf16.gmra.mrb[208].mxu0 %vm494_vm0, %v13892_v29  ;;  %12543 = vmatmul.mubr.msk.bf16.gmra.mrb[208].mxu1 %vm494_vm0, %v13895_v55  ;;  %v13897_v29 = vld [vmem:[%s17804_s0 + $0x558] sm:$0xff]  }
 0x1ab   :  { %12414 = vmatprep.mubr.msk.bf16.mxu0 %vm494_vm0, %v13896_v8  ;;  %12546 = vmatprep.mubr.msk.bf16.mxu1 %vm494_vm0, %v13898_v49  ;;  %v13899_v8 = vld [vmem:[%s17804_s0 + $0x758] sm:$0xff]  }
 0x1ad   :  { %v15704_v24 = vpop.f32.mrb[104].mxu0  ;;  %v15706_v13 = vpop.f32.mrb[104].mxu1 }
 0x1ae   :  { %18191 = vst [vmem:[#allocation165_spill] sm:$0xff] %v15704_v24  ;;  %18192 = vst [vmem:[#allocation166_spill] sm:$0xff] %v15706_v13  ;;  %v15710_v60 = vpop.f32.mrb[105].mxu0  ;;  %v15712_v40 = vpop.f32.mrb[105].mxu1  ;;  %v13902_v13 = vld [vmem:[%s17804_s0 + $0x760] sm:$0xff]   ;;  %v13904_v24 = vld [vmem:[%s17804_s0 + $0x570] sm:$0xff]  }
 0x1af   :  { %18193 = vst [vmem:[#allocation167_spill] sm:$0xff] %v15710_v60  ;;  %18194 = vst [vmem:[#allocation168_spill] sm:$0xff] %v15712_v40  ;;  %v15722_v55 = vpop.f32.mrb[106].mxu0  ;;  %v15724_v58 = vpop.f32.mrb[106].mxu1 }
 0x1b0   :  { %18195 = vst [vmem:[#allocation169_spill] sm:$0xff] %v15722_v55  ;;  %18196 = vst [vmem:[#allocation170_spill] sm:$0xff] %v15724_v58  ;;  %v15734_v17 = vpop.f32.mrb[107].mxu0  ;;  %v15736_v45 = vpop.f32.mrb[107].mxu1 }
 0x1b1   :  { %18197 = vst [vmem:[#allocation171_spill] sm:$0xff] %v15734_v17  ;;  %18198 = vst [vmem:[#allocation172_spill] sm:$0xff] %v15736_v45 }
 0x1b2   :  { %12415 = vmatmul.mubr.msk.bf16.gmra.mrb[212].mxu0 %vm494_vm0, %v13897_v29  ;;  %12547 = vmatmul.mubr.msk.bf16.gmra.mrb[212].mxu1 %vm494_vm0, %v13899_v8  ;;  %v13901_v29 = vld [vmem:[%s17804_s0 + $0x568] sm:$0xff]  }
 0x1b3   :  { %12418 = vmatprep.mubr.msk.bf16.mxu0 %vm494_vm0, %v13900_v7  ;;  %12550 = vmatprep.mubr.msk.bf16.mxu1 %vm494_vm0, %v13902_v13  ;;  %v13903_v7 = vld [vmem:[%s17804_s0 + $0x768] sm:$0xff]  }
 0x1b5   :  { %v15744_v40 = vpop.f32.mrb[108].mxu0  ;;  %v15746_v60 = vpop.f32.mrb[108].mxu1 }
 0x1b6   :  { %18199 = vst [vmem:[#allocation173_spill] sm:$0xff] %v15744_v40  ;;  %18200 = vst [vmem:[#allocation174_spill] sm:$0xff] %v15746_v60  ;;  %v15750_v58 = vpop.f32.mrb[109].mxu0  ;;  %v15752_v55 = vpop.f32.mrb[109].mxu1  ;;  %v13906_v60 = vld [vmem:[%s17804_s0 + $0x770] sm:$0xff]   ;;  %v13908_v40 = vld [vmem:[%s17804_s0 + $0x580] sm:$0xff]  }
 0x1b7   :  { %18201 = vst [vmem:[#allocation175_spill] sm:$0xff] %v15750_v58  ;;  %18202 = vst [vmem:[#allocation176_spill] sm:$0xff] %v15752_v55  ;;  %v15762_v8 = vpop.f32.mrb[110].mxu0  ;;  %v15764_v49 = vpop.f32.mrb[110].mxu1 }
 0x1b8   :  { %18203 = vst [vmem:[#allocation177_spill] sm:$0xff] %v15762_v8  ;;  %18204 = vst [vmem:[#allocation178_spill] sm:$0xff] %v15764_v49  ;;  %v15774_v45 = vpop.f32.mrb[111].mxu0  ;;  %v15776_v17 = vpop.f32.mrb[111].mxu1 }
 0x1b9   :  { %18205 = vst [vmem:[#allocation179_spill] sm:$0xff] %v15774_v45  ;;  %18206 = vst [vmem:[#allocation180_spill] sm:$0xff] %v15776_v17 }
 0x1ba   :  { %12419 = vmatmul.mubr.msk.bf16.gmra.mrb[216].mxu0 %vm494_vm0, %v13901_v29  ;;  %12551 = vmatmul.mubr.msk.bf16.gmra.mrb[216].mxu1 %vm494_vm0, %v13903_v7  ;;  %v13905_v29 = vld [vmem:[%s17804_s0 + $0x578] sm:$0xff]  }
 0x1bb   :  { %12422 = vmatprep.mubr.msk.bf16.mxu0 %vm494_vm0, %v13904_v24  ;;  %12554 = vmatprep.mubr.msk.bf16.mxu1 %vm494_vm0, %v13906_v60  ;;  %v13907_v24 = vld [vmem:[%s17804_s0 + $0x778] sm:$0xff]  }
 0x1bd   :  { %v15784_v55 = vpop.f32.mrb[112].mxu0  ;;  %v15786_v58 = vpop.f32.mrb[112].mxu1 }
 0x1be   :  { %18207 = vst [vmem:[#allocation181_spill] sm:$0xff] %v15784_v55  ;;  %18208 = vst [vmem:[#allocation182_spill] sm:$0xff] %v15786_v58  ;;  %v15790_v49 = vpop.f32.mrb[113].mxu0  ;;  %v15792_v8 = vpop.f32.mrb[113].mxu1  ;;  %v13911_v58 = vld [vmem:[%s17804_s0 + $0x780] sm:$0xff]   ;;  %v13913_v55 = vld [vmem:[%s17804_s0 + $0x590] sm:$0xff]  }
 0x1bf   :  { %18209 = vst [vmem:[#allocation183_spill] sm:$0xff] %v15790_v49  ;;  %18210 = vst [vmem:[#allocation184_spill] sm:$0xff] %v15792_v8  ;;  %v15802_v7 = vpop.f32.mrb[114].mxu0  ;;  %v15804_v13 = vpop.f32.mrb[114].mxu1 }
 0x1c0   :  { %18211 = vst [vmem:[#allocation185_spill] sm:$0xff] %v15802_v7  ;;  %18212 = vst [vmem:[#allocation186_spill] sm:$0xff] %v15804_v13  ;;  %v15814_v17 = vpop.f32.mrb[115].mxu0  ;;  %v15816_v45 = vpop.f32.mrb[115].mxu1 }
 0x1c1   :  { %18213 = vst [vmem:[#allocation187_spill] sm:$0xff] %v15814_v17  ;;  %18214 = vst [vmem:[#allocation188_spill] sm:$0xff] %v15816_v45 }
 0x1c2   :  { %12423 = vmatmul.mubr.msk.bf16.gmra.mrb[220].mxu0 %vm494_vm0, %v13905_v29  ;;  %12555 = vmatmul.mubr.msk.bf16.gmra.mrb[220].mxu1 %vm494_vm0, %v13907_v24  ;;  %v13909_v29 = vld [vmem:[%s17804_s0 + $0x588] sm:$0xff]  }
 0x1c3   :  { %12426 = vmatprep.mubr.msk.bf16.mxu0 %vm494_vm0, %v13908_v40  ;;  %12558 = vmatprep.mubr.msk.bf16.mxu1 %vm494_vm0, %v13911_v58  ;;  %v13912_v40 = vld [vmem:[%s17804_s0 + $0x788] sm:$0xff]  }
 0x1c5   :  { %v15824_v8 = vpop.f32.mrb[116].mxu0  ;;  %v15826_v49 = vpop.f32.mrb[116].mxu1 }
 0x1c6   :  { %18215 = vst [vmem:[#allocation189_spill] sm:$0xff] %v15824_v8  ;;  %18216 = vst [vmem:[#allocation190_spill] sm:$0xff] %v15826_v49  ;;  %v15830_v13 = vpop.f32.mrb[117].mxu0  ;;  %v15832_v7 = vpop.f32.mrb[117].mxu1  ;;  %v13915_v49 = vld [vmem:[%s17804_s0 + $0x790] sm:$0xff]   ;;  %v13917_v8 = vld [vmem:[%s17804_s0 + $0x5a0] sm:$0xff]  }
 0x1c7   :  { %18217 = vst [vmem:[#allocation191_spill] sm:$0xff] %v15830_v13  ;;  %18218 = vst [vmem:[#allocation192_spill] sm:$0xff] %v15832_v7  ;;  %v15842_v24 = vpop.f32.mrb[118].mxu0  ;;  %v15844_v60 = vpop.f32.mrb[118].mxu1 }
 0x1c8   :  { %18219 = vst [vmem:[#allocation193_spill] sm:$0xff] %v15842_v24  ;;  %18220 = vst [vmem:[#allocation194_spill] sm:$0xff] %v15844_v60  ;;  %v15854_v45 = vpop.f32.mrb[119].mxu0  ;;  %v15856_v17 = vpop.f32.mrb[119].mxu1 }
 0x1c9   :  { %18221 = vst [vmem:[#allocation195_spill] sm:$0xff] %v15854_v45  ;;  %18222 = vst [vmem:[#allocation196_spill] sm:$0xff] %v15856_v17 }
 0x1ca   :  { %12427 = vmatmul.mubr.msk.bf16.gmra.mrb[224].mxu0 %vm494_vm0, %v13909_v29  ;;  %12559 = vmatmul.mubr.msk.bf16.gmra.mrb[224].mxu1 %vm494_vm0, %v13912_v40  ;;  %v13914_v29 = vld [vmem:[%s17804_s0 + $0x598] sm:$0xff]  }
 0x1cb   :  { %12430 = vmatprep.mubr.msk.bf16.mxu0 %vm494_vm0, %v13913_v55  ;;  %12562 = vmatprep.mubr.msk.bf16.mxu1 %vm494_vm0, %v13915_v49  ;;  %v13916_v55 = vld [vmem:[%s17804_s0 + $0x798] sm:$0xff]  }
 0x1cd   :  { %v15864_v7 = vpop.f32.mrb[120].mxu0  ;;  %v15866_v13 = vpop.f32.mrb[120].mxu1 }
 0x1ce   :  { %18223 = vst [vmem:[#allocation197_spill] sm:$0xff] %v15864_v7  ;;  %18224 = vst [vmem:[#allocation198_spill] sm:$0xff] %v15866_v13  ;;  %v15870_v60 = vpop.f32.mrb[121].mxu0  ;;  %v15872_v24 = vpop.f32.mrb[121].mxu1  ;;  %v13919_v13 = vld [vmem:[%s17804_s0 + $0x7a0] sm:$0xff]   ;;  %v13921_v7 = vld [vmem:[%s17804_s0 + $0x5b0] sm:$0xff]  }
 0x1cf   :  { %18225 = vst [vmem:[#allocation199_spill] sm:$0xff] %v15870_v60  ;;  %18226 = vst [vmem:[#allocation200_spill] sm:$0xff] %v15872_v24  ;;  %v15882_v40 = vpop.f32.mrb[122].mxu0  ;;  %v15884_v58 = vpop.f32.mrb[122].mxu1 }
 0x1d0   :  { %18227 = vst [vmem:[#allocation201_spill] sm:$0xff] %v15882_v40  ;;  %18228 = vst [vmem:[#allocation202_spill] sm:$0xff] %v15884_v58  ;;  %v15894_v17 = vpop.f32.mrb[123].mxu0  ;;  %v15896_v45 = vpop.f32.mrb[123].mxu1 }
 0x1d1   :  { %18229 = vst [vmem:[#allocation203_spill] sm:$0xff] %v15894_v17  ;;  %18230 = vst [vmem:[#allocation204_spill] sm:$0xff] %v15896_v45 }
 0x1d2   :  { %12431 = vmatmul.mubr.msk.bf16.gmra.mrb[228].mxu0 %vm494_vm0, %v13914_v29  ;;  %12563 = vmatmul.mubr.msk.bf16.gmra.mrb[228].mxu1 %vm494_vm0, %v13916_v55  ;;  %v13918_v29 = vld [vmem:[%s17804_s0 + $0x5a8] sm:$0xff]  }
 0x1d3   :  { %12434 = vmatprep.mubr.msk.bf16.mxu0 %vm494_vm0, %v13917_v8  ;;  %12566 = vmatprep.mubr.msk.bf16.mxu1 %vm494_vm0, %v13919_v13  ;;  %v13920_v8 = vld [vmem:[%s17804_s0 + $0x7a8] sm:$0xff]   ;;  %v13922_v13 = vld [vmem:[%s17804_s0 + $0x5b8] sm:$0xff]  }
 0x1d5   :  { %v15904_v24 = vpop.f32.mrb[124].mxu0  ;;  %v15906_v60 = vpop.f32.mrb[124].mxu1 }
 0x1d6   :  { %18231 = vst [vmem:[#allocation205_spill] sm:$0xff] %v15904_v24  ;;  %18232 = vst [vmem:[#allocation206_spill] sm:$0xff] %v15906_v60  ;;  %v15910_v58 = vpop.f32.mrb[125].mxu0  ;;  %v15912_v40 = vpop.f32.mrb[125].mxu1  ;;  %v13923_v60 = vld [vmem:[%s17804_s0 + $0x7b0] sm:$0xff]   ;;  %v18239_v24 = vmax.f32 %v14641_v51, %v14643_v52  ;;  %v13925_v51 = vld [vmem:[%s17804_s0 + $0x5c0] sm:$0xff]  }
 0x1d7   :  { %18233 = vst [vmem:[#allocation207_spill] sm:$0xff] %v15910_v58  ;;  %18234 = vst [vmem:[#allocation208_spill] sm:$0xff] %v15912_v40  ;;  %v15922_v55 = vpop.f32.mrb[126].mxu0  ;;  %v15924_v49 = vpop.f32.mrb[126].mxu1  ;;  %v13928_v52 = vld [vmem:[%s17804_s0 + $0x7c0] sm:$0xff]  }
 0x1d8   :  { %18235 = vst [vmem:[#allocation209_spill] sm:$0xff] %v15922_v55  ;;  %18236 = vst [vmem:[#allocation210_spill] sm:$0xff] %v15924_v49  ;;  %v15934_v45 = vpop.f32.mrb[127].mxu0  ;;  %v15936_v17 = vpop.f32.mrb[127].mxu1 }
 0x1d9   :  { %18237 = vst [vmem:[#allocation211_spill] sm:$0xff] %v15934_v45  ;;  %18238 = vst [vmem:[#allocation212_spill] sm:$0xff] %v15936_v17 }
 0x1da   :  { %12435 = vmatmul.mubr.msk.bf16.gmra.mrb[232].mxu0 %vm494_vm0, %v13918_v29  ;;  %12567 = vmatmul.mubr.msk.bf16.gmra.mrb[232].mxu1 %vm494_vm0, %v13920_v8  ;;  %v13924_v29 = vld [vmem:[%s17804_s0 + $0x7b8] sm:$0xff]  }
 0x1db   :  { %12438 = vmatprep.mubr.msk.bf16.mxu0 %vm494_vm0, %v13921_v7  ;;  %12570 = vmatprep.mubr.msk.bf16.mxu1 %vm494_vm0, %v13923_v60  ;;  %v18240_v7 = vmax.f32 %v14645_v53, %v14647_v54  ;;  %v18242_v53 = vmax.f32 %v14663_v61, %v14665_v62 }
 0x1dd   :  { %v12332_v40 = vpop.f32.mrb[128].mxu0  ;;  %v12464_v58 = vpop.f32.mrb[128].mxu1 }
 0x1de   :  { %v3734_v49 = vmax.f32 %v18239_v24, %v12332_v40  ;;  %v3221_v55 = vpop.f32.mrb[129].mxu0  ;;  %v4535_v34 = vpop.f32.mrb[129].mxu1  ;;  %v18241_v24 = vmax.f32 %v14651_v56, %v14653_v57 }
 0x1df   :  { %v3732_v60 = vmax.f32 %v18240_v7, %v3221_v55  ;;  %v12333_v8 = vpop.f32.mrb[130].mxu0  ;;  %v12465_v17 = vpop.f32.mrb[130].mxu1 }
 0x1e0   :  { %v3735_v40 = vmax.f32 %v18241_v24, %v12333_v8  ;;  %v5048_v45 = vmax.f32 %v3734_v49, %v12464_v58  ;;  %v3224_v0 = vpop.f32.mrb[131].mxu0  ;;  %v4538_v16 = vpop.f32.mrb[131].mxu1  ;;  %v18245_v24 = vmax.f32 %v14691_v9, %v14693_v10 }
 0x1e1   :  { %v3733_v54 = vmax.f32 %v18242_v53, %v3224_v0  ;;  %v5046_v55 = vmax.f32 %v3732_v60, %v4535_v34  ;;  %v18244_v60 = vmax.f32 %v14685_v5, %v14687_v6  ;;  %v18246_v5 = vmax.f32 %v14703_v14, %v14705_v15 }
 0x1e2   :  { %v5049_v7 = vmax.f32 %v3735_v40, %v12465_v17  ;;  %12439 = vmatmul.mubr.msk.bf16.gmra.mrb[236].mxu0 %vm494_vm0, %v13922_v13  ;;  %12571 = vmatmul.mubr.msk.bf16.gmra.mrb[236].mxu1 %vm494_vm0, %v13924_v29  ;;  %v15972_v56 = vmax.f32 %v5048_v45, 0.0  ;;  %v13926_v45 = vld [vmem:[%s17804_s0 + $0x5c8] sm:$0xff]  }
 0x1e3   :  { %v5047_v63 = vmax.f32 %v3733_v54, %v4538_v16  ;;  %12442 = vmatprep.mubr.msk.bf16.mxu0 %vm494_vm0, %v13925_v51  ;;  %12574 = vmatprep.mubr.msk.bf16.mxu1 %vm494_vm0, %v13928_v52  ;;  %v15976_v58 = vmax.f32 %v5046_v55, 0.0  ;;  %v18243_v16 = vmax.f32 %v14681_v3, %v14683_v4  ;;  %v13930_v4 = vld [vmem:[%s17804_s0 + $0x5d0] sm:$0xff]  }
 0x1e4   :  { %v15974_v57 = vmax.f32 %v5049_v7, 0.0  ;;  %v13932_v52 = vld [vmem:[%s17804_s0 + $0x7d0] sm:$0xff]  }
 0x1e5   :  { %v15978_v49 = vmax.f32 %v5047_v63, 0.0  ;;  %v12336_v61 = vpop.f32.mrb[132].mxu0  ;;  %v12468_v62 = vpop.f32.mrb[132].mxu1  ;;  %v13929_v63 = vld [vmem:[%s17804_s0 + $0x7c8] sm:$0xff]  }
 0x1e6   :  { %v5303_v0 = vpack.c.bf16 %v15974_v57, %v15972_v56  ;;  %v3738_v34 = vmax.f32 %v18243_v16, %v12336_v61  ;;  %v3237_v17 = vpop.f32.mrb[133].mxu0  ;;  %v4551_v13 = vpop.f32.mrb[133].mxu1  ;;  %v18312_v56 = vld [vmem:[#allocation36_spill] sm:$0xff]  ;;  %v18313_v57 = vld [vmem:[#allocation37_spill] sm:$0xff] }
 0x1e7   :  { %v5302_v29 = vpack.c.bf16 %v15978_v49, %v15976_v58  ;;  %v3736_v8 = vmax.f32 %v18244_v60, %v3237_v17  ;;  %v12337_v51 = vpop.f32.mrb[134].mxu0  ;;  %v12469_v3 = vpop.f32.mrb[134].mxu1 }
 0x1e8   :  { %v3739_v40 = vmax.f32 %v18245_v24, %v12337_v51  ;;  %v5052_v53 = vmax.f32 %v3738_v34, %v12468_v62  ;;  %v3240_v54 = vpop.f32.mrb[135].mxu0  ;;  %v4554_v55 = vpop.f32.mrb[135].mxu1  ;;  %v13933_v51 = vld [vmem:[%s17804_s0 + $0x7d8] sm:$0xff]  }
 0x1e9   :  { %v3737_v6 = vmax.f32 %v18246_v5, %v3240_v54  ;;  %v5050_v7 = vmax.f32 %v3736_v8, %v4551_v13  ;;  %v18247_v13 = vmax.f32 %v14721_v20, %v14723_v21  ;;  %v13931_v8 = vld [vmem:[%s17804_s0 + $0x5d8] sm:$0xff]   ;;  %v13934_v21 = vld [vmem:[%s17804_s0 + $0x5e0] sm:$0xff]  }
 0x1ea   :  { %v5053_v61 = vmax.f32 %v3739_v40, %v12469_v3  ;;  %12443 = vmatmul.mubr.msk.bf16.gmra.mrb[240].mxu0 %vm494_vm0, %v13926_v45  ;;  %12575 = vmatmul.mubr.msk.bf16.gmra.mrb[240].mxu1 %vm494_vm0, %v13929_v63  ;;  %v16012_v9 = vmax.f32 %v5052_v53, 0.0  ;;  %v13936_v40 = vld [vmem:[%s17804_s0 + $0x7e0] sm:$0xff]   ;;  %v18249_v53 = vmax.f32 %v14731_v25, %v14733_v26 }
 0x1eb   :  { %v5051_v16 = vmax.f32 %v3737_v6, %v4554_v55  ;;  %12446 = vmatprep.mubr.msk.bf16.mxu0 %vm494_vm0, %v13930_v4  ;;  %12578 = vmatprep.mubr.msk.bf16.mxu1 %vm494_vm0, %v13932_v52  ;;  %v16016_v62 = vmax.f32 %v5050_v7, 0.0  ;;  %v18248_v4 = vmax.f32 %v14725_v22, %v14727_v23  ;;  %v18250_v22 = vmax.f32 %v14743_v30, %v14745_v31 }
 0x1ec   :  { %v16014_v10 = vmax.f32 %v5053_v61, 0.0  ;;  %v18251_v30 = vmax.f32 %v14761_v36, %v14763_v37  ;;  %v13938_v36 = vld [vmem:[%s17804_s0 + $0x5f0] sm:$0xff]  }
 0x1ed   :  { %v16018_v34 = vmax.f32 %v5051_v16, 0.0  ;;  %v12340_v14 = vpop.f32.mrb[136].mxu0  ;;  %v12472_v15 = vpop.f32.mrb[136].mxu1  ;;  %v13940_v37 = vld [vmem:[%s17804_s0 + $0x7f0] sm:$0xff]  }
 0x1ee   :  { %v5305_v17 = vpack.c.bf16 %v16014_v10, %v16012_v9  ;;  %v3742_v45 = vmax.f32 %v18247_v13, %v12340_v14  ;;  %v3253_v63 = vpop.f32.mrb[137].mxu0  ;;  %v4567_v60 = vpop.f32.mrb[137].mxu1  ;;  %v18325_v9 = vld [vmem:[#allocation45_spill] sm:$0xff] }
 0x1ef   :  { %v5304_v3 = vpack.c.bf16 %v16018_v34, %v16016_v62  ;;  %v3740_v52 = vmax.f32 %v18248_v4, %v3253_v63  ;;  %v12341_v24 = vpop.f32.mrb[138].mxu0  ;;  %v12473_v20 = vpop.f32.mrb[138].mxu1  ;;  %v13937_v4 = vld [vmem:[%s17804_s0 + $0x7e8] sm:$0xff]  }
 0x1f0   :  { %v3743_v54 = vmax.f32 %v18249_v53, %v12341_v24  ;;  %v5056_v55 = vmax.f32 %v3742_v45, %v12472_v15  ;;  %v3256_v5 = vpop.f32.mrb[139].mxu0  ;;  %v4570_v6 = vpop.f32.mrb[139].mxu1  ;;  %v18252_v24 = vmax.f32 %v14765_v38, %v14767_v39  ;;  %v18253_v53 = vmax.f32 %v14771_v41, %v14773_v42 }
 0x1f1   :  { %v3741_v23 = vmax.f32 %v18250_v22, %v3256_v5  ;;  %v5054_v7 = vmax.f32 %v3740_v52, %v4567_v60  ;;  %v18254_v38 = vmax.f32 %v14783_v46, %v14785_v47  ;;  %v18255_v46 = vmax.f32 %v14801_v59, %v14803_v1 }
 0x1f2   :  { %v5057_v61 = vmax.f32 %v3743_v54, %v12473_v20  ;;  %12447 = vmatmul.mubr.msk.bf16.gmra.mrb[244].mxu0 %vm494_vm0, %v13931_v8  ;;  %12579 = vmatmul.mubr.msk.bf16.gmra.mrb[244].mxu1 %vm494_vm0, %v13933_v51  ;;  %v5184_v25 = vmax.f32 %v5056_v55, 0.0  ;;  %v13935_v51 = vld [vmem:[%s17804_s0 + $0x5e8] sm:$0xff]   ;;  %v18257_v59 = vmax.f32 %v14811_v18, %v14813_v19 }
 0x1f3   :  { %v5055_v16 = vmax.f32 %v3741_v23, %v4570_v6  ;;  %12450 = vmatprep.mubr.msk.bf16.mxu0 %vm494_vm0, %v13934_v21  ;;  %12582 = vmatprep.mubr.msk.bf16.mxu1 %vm494_vm0, %v13936_v40  ;;  %v5182_v14 = vmax.f32 %v5054_v7, 0.0 }
 0x1f4   :  { %v5185_v26 = vmax.f32 %v5057_v61, 0.0 }
 0x1f5   :  { %v5183_v15 = vmax.f32 %v5055_v16, 0.0  ;;  %v12344_v13 = vpop.f32.mrb[140].mxu0  ;;  %v12476_v45 = vpop.f32.mrb[140].mxu1 }
 0x1f6   :  { %v16052_v63 = vpack.c.bf16 %v5185_v26, %v5184_v25  ;;  %v3746_v31 = vmax.f32 %v18251_v30, %v12344_v13  ;;  %v3269_v60 = vpop.f32.mrb[141].mxu0  ;;  %v4583_v8 = vpop.f32.mrb[141].mxu1  ;;  %v13941_v30 = vld [vmem:[%s17804_s0 + $0x7f8] sm:$0xff]  }
 0x1f7   :  { %v16063_v52 = vpack.c.bf16 %v5183_v15, %v5182_v14  ;;  %v3744_v20 = vmax.f32 %v18252_v24, %v3269_v60  ;;  %v12345_v21 = vpop.f32.mrb[142].mxu0  ;;  %v12477_v40 = vpop.f32.mrb[142].mxu1  ;;  %v18256_v60 = vmax.f32 %v14805_v2, %v14807_v11 }
 0x1f8   :  { %v3747_v54 = vmax.f32 %v18253_v53, %v12345_v21  ;;  %v5060_v55 = vmax.f32 %v3746_v31, %v12476_v45  ;;  %v3272_v5 = vpop.f32.mrb[143].mxu0  ;;  %v4586_v6 = vpop.f32.mrb[143].mxu1  ;;  %v13939_v45 = vld [vmem:[%s17804_s0 + $0x5f8] sm:$0xff]  }
 0x1f9   :  { %v3745_v39 = vmax.f32 %v18254_v38, %v3272_v5  ;;  %v5058_v22 = vmax.f32 %v3744_v20, %v4583_v8 }
 0x1fa   :  { %v5061_v23 = vmax.f32 %v3747_v54, %v12477_v40  ;;  %12451 = vmatmul.mubr.msk.bf16.gmra.mrb[248].mxu0 %vm494_vm0, %v13935_v51  ;;  %12583 = vmatmul.mubr.msk.bf16.gmra.mrb[248].mxu1 %vm494_vm0, %v13937_v4  ;;  %v5188_v41 = vmax.f32 %v5060_v55, 0.0  ;;  %v18258_v40 = vmax.f32 %v14823_v35, %v14825_v43  ;;  %v18259_v35 = vmax.f32 %v14841_v44, %v14843_v48  ;;  %v13943_v48 = vld [vmem:[%s17805_s2 + $0x8] sm:$0xff]  }
 0x1fb   :  { %v5059_v7 = vmax.f32 %v3745_v39, %v4586_v6  ;;  %12454 = vmatprep.mubr.msk.bf16.mxu0 %vm494_vm0, %v13938_v36  ;;  %12586 = vmatprep.mubr.msk.bf16.mxu1 %vm494_vm0, %v13940_v37  ;;  %v5186_v61 = vmax.f32 %v5058_v22, 0.0  ;;  %v18262_v44 = vmax.f32 %v14860_v33, %v14862_v32 }
 0x1fc   :  { %v5189_v42 = vmax.f32 %v5061_v23, 0.0  ;;  %v18260_v23 = vmax.f32 %v14845_v12, %v14847_v50 }
 0x1fd   :  { %v5187_v16 = vmax.f32 %v5059_v7, 0.0  ;;  %v12348_v25 = vpop.f32.mrb[144].mxu0  ;;  %v12480_v26 = vpop.f32.mrb[144].mxu1 }
 0x1fe   :  { %v16084_v14 = vpack.c.bf16 %v5189_v42, %v5188_v41  ;;  %v3750_v47 = vmax.f32 %v18255_v46, %v12348_v25  ;;  %v3285_v15 = vpop.f32.mrb[145].mxu0  ;;  %v4599_v13 = vpop.f32.mrb[145].mxu1 }
 0x1ff   :  { %v16095_v31 = vpack.c.bf16 %v5187_v16, %v5186_v61  ;;  %v3748_v8 = vmax.f32 %v18256_v60, %v3285_v15  ;;  %v12349_v51 = vpop.f32.mrb[146].mxu0  ;;  %v12481_v4 = vpop.f32.mrb[146].mxu1  ;;  %v18261_v61 = vmax.f32 %v14851_v27, %v14853_v28  ;;  %v18263_v27 = vld [vmem:[#allocation132_spill] sm:$0xff] }
 0x200   :  { %v3751_v1 = vmax.f32 %v18257_v59, %v12349_v51  ;;  %v5064_v24 = vmax.f32 %v3750_v47, %v12480_v26  ;;  %v3288_v20 = vpop.f32.mrb[147].mxu0  ;;  %v4602_v21 = vpop.f32.mrb[147].mxu1  ;;  %v18264_v51 = vld [vmem:[#allocation4_spill] sm:$0xff] }
 0x201   :  { %v3749_v36 = vmax.f32 %v18258_v40, %v3288_v20  ;;  %v5062_v37 = vmax.f32 %v3748_v8, %v4599_v13  ;;  %v18267_v40 = vld [vmem:[#allocation6_spill] sm:$0xff] }
 0x202   :  { %v5065_v53 = vmax.f32 %v3751_v1, %v12481_v4  ;;  %12455 = vmatmul.mubr.msk.bf16.gmra.mrb[252].mxu0 %vm494_vm0, %v13939_v45  ;;  %12587 = vmatmul.mubr.msk.bf16.gmra.mrb[252].mxu1 %vm494_vm0, %v13941_v30  ;;  %v5192_v11 = vmax.f32 %v5064_v24, 0.0  ;;  %v13944_v45 = vld [vmem:[%s17805_s2 + $0x10] sm:$0xff]   ;;  %v18265_v4 = vld [vmem:[#allocation5_spill] sm:$0xff] }
 0x203   :  { %v5063_v2 = vmax.f32 %v3749_v36, %v4602_v21  ;;  %12606 = vmatprep.mubr.bf16.mxu0 %v16063_v52  ;;  %v5190_v18 = vmax.f32 %v5062_v37, 0.0  ;;  %v18266_v59 = vmax.f32 %v18264_v51, %v18265_v4  ;;  %v18268_v36 = vld [vmem:[#allocation7_spill] sm:$0xff] }
 0x204   :  { %v5193_v54 = vmax.f32 %v5065_v53, 0.0  ;;  %v18269_v37 = vmax.f32 %v18267_v40, %v18268_v36 }
 0x205   :  { %v5191_v19 = vmax.f32 %v5063_v2, 0.0  ;;  %v12352_v55 = vpop.f32.mrb[148].mxu0  ;;  %v12484_v5 = vpop.f32.mrb[148].mxu1 }
 0x206   :  { %v16109_v6 = vpack.c.bf16 %v5193_v54, %v5192_v11  ;;  %v3754_v43 = vmax.f32 %v18259_v35, %v12352_v55  ;;  %v3301_v38 = vpop.f32.mrb[149].mxu0  ;;  %v4615_v39 = vpop.f32.mrb[149].mxu1  ;;  %v18270_v54 = vld [vmem:[#allocation8_spill] sm:$0xff] }
 0x207   :  { %v16114_v22 = vpack.c.bf16 %v5191_v19, %v5190_v18  ;;  %v3752_v7 = vmax.f32 %v18260_v23, %v3301_v38  ;;  %v12353_v41 = vpop.f32.mrb[150].mxu0  ;;  %v12485_v42 = vpop.f32.mrb[150].mxu1  ;;  %v18271_v18 = vld [vmem:[#allocation9_spill] sm:$0xff]  ;;  %v13945_v38 = vld [vmem:[%s17805_s2 + $0x18] sm:$0xff]  }
 0x208   :  { %v3755_v16 = vmax.f32 %v18261_v61, %v12353_v41  ;;  %v5068_v25 = vmax.f32 %v3754_v43, %v12484_v5  ;;  %v3304_v26 = vpop.f32.mrb[151].mxu0  ;;  %v4618_v46 = vpop.f32.mrb[151].mxu1  ;;  %v18272_v19 = vmax.f32 %v18270_v54, %v18271_v18  ;;  %v18274_v23 = vld [vmem:[#allocation11_spill] sm:$0xff]  ;;  %v18285_v54 = vld [vmem:[#allocation18_spill] sm:$0xff] }
 0x209   :  { %v3753_v47 = vmax.f32 %v18262_v44, %v3304_v26  ;;  %v5066_v15 = vmax.f32 %v3752_v7, %v4615_v39  ;;  %v18273_v39 = vld [vmem:[#allocation10_spill] sm:$0xff]  ;;  %v18286_v18 = vld [vmem:[#allocation19_spill] sm:$0xff] }
 0x20a   :  { %v5069_v12 = vmax.f32 %v3755_v16, %v12485_v42  ;;  %12607 = vmatmul.mubr.bf16.vlgmr.msra.gmra.mrb[0].mxu0 %v16052_v63  ;;  %v5196_v28 = vmax.f32 %v5068_v25, 0.0  ;;  %v18275_v7 = vmax.f32 %v18273_v39, %v18274_v23  ;;  %v13948_v23 = vld [vmem:[%s17805_s2 + $0x30] sm:$0xff]  }
 0x20b   :  { %v5067_v50 = vmax.f32 %v3753_v47, %v4618_v46  ;;  %12610 = vmatprep.mubr.bf16.mxu0 %v16095_v31  ;;  %12639 = vmatpush3.bf16.msra.mxu0 %v18263_v27  ;;  %v5194_v30 = vmax.f32 %v5066_v15, 0.0  ;;  %v13946_v46 = vld [vmem:[%s17805_s2 + $0x20] sm:$0xff]   ;;  %v18277_v27 = vld [vmem:[#allocation13_spill] sm:$0xff] }
 0x20c   :  { %v5197_v13 = vmax.f32 %v5069_v12, 0.0  ;;  %12640 = vmatprep.subr.bf16.mxu0 %v13943_v48 }
 0x20d   :  { %v5195_v60 = vmax.f32 %v5067_v50, 0.0  ;;  %v12356_v32 = vpop.f32.mrb[152].mxu0  ;;  %v12488_v33 = vpop.f32.mrb[152].mxu1  ;;  %v18276_v50 = vld [vmem:[#allocation12_spill] sm:$0xff] }
 0x20e   :  { %v16134_v8 = vpack.c.bf16 %v5197_v13, %v5196_v28  ;;  %v3758_v1 = vmax.f32 %v18266_v59, %v12356_v32  ;;  %v3317_v24 = vpop.f32.mrb[153].mxu0  ;;  %v4631_v20 = vpop.f32.mrb[153].mxu1  ;;  %v18278_v28 = vmax.f32 %v18276_v50, %v18277_v27  ;;  %v18279_v32 = vld [vmem:[#allocation14_spill] sm:$0xff] }
 0x20f   :  { %v16139_v21 = vpack.c.bf16 %v5195_v60, %v5194_v30  ;;  %v3756_v53 = vmax.f32 %v18269_v37, %v3317_v24  ;;  %v12357_v2 = vpop.f32.mrb[154].mxu0  ;;  %12641 = vmatpush3.bf16.msra.mxu0 %v13943_v48  ;;  %v12489_v11 = vpop.f32.mrb[154].mxu1  ;;  %v18282_v24 = vld [vmem:[#allocation16_spill] sm:$0xff] }
 0x210   :  { %v3759_v55 = vmax.f32 %v18272_v19, %v12357_v2  ;;  %v5072_v5 = vmax.f32 %v3758_v1, %v12488_v33  ;;  %v3320_v35 = vpop.f32.mrb[155].mxu0  ;;  %v4634_v43 = vpop.f32.mrb[155].mxu1  ;;  %12642 = vmatprep.subr.bf16.mxu0 %v13944_v45  ;;  %v18280_v33 = vld [vmem:[#allocation15_spill] sm:$0xff]  ;;  %v18287_v19 = vmax.f32 %v18285_v54, %v18286_v18 }
 0x211   :  { %v3757_v41 = vmax.f32 %v18275_v7, %v3320_v35  ;;  %v5070_v42 = vmax.f32 %v3756_v53, %v4631_v20  ;;  %v18281_v51 = vmax.f32 %v18279_v32, %v18280_v33  ;;  %v18283_v20 = vld [vmem:[#allocation17_spill] sm:$0xff]  ;;  %v18298_v54 = vld [vmem:[#allocation27_spill] sm:$0xff] }
 0x212   :  { %v5073_v61 = vmax.f32 %v3759_v55, %v12489_v11  ;;  %12611 = vmatmul.mubr.bf16.gmra.mrb[4].mxu0 %v16084_v14  ;;  %v16155_v25 = vmax.f32 %v5072_v5, 0.0  ;;  %v18284_v40 = vmax.f32 %v18282_v24, %v18283_v20  ;;  %v13947_v11 = vld [vmem:[%s17805_s2 + $0x28] sm:$0xff]  }
 0x213   :  { %v5071_v16 = vmax.f32 %v3757_v41, %v4634_v43  ;;  %12614 = vmatprep.mubr.bf16.mxu0 %v16114_v22  ;;  %12643 = vmatpush3.bf16.msra.mxu0 %v13944_v45  ;;  %v16162_v48 = vmax.f32 %v5070_v42, 0.0 }
 0x214   :  { %v16157_v26 = vmax.f32 %v5073_v61, 0.0  ;;  %12644 = vmatprep.subr.bf16.mxu0 %v13945_v38 }
 0x215   :  { %v16164_v44 = vmax.f32 %v5071_v16, 0.0  ;;  %v12360_v47 = vpop.f32.mrb[156].mxu0  ;;  %v12492_v15 = vpop.f32.mrb[156].mxu1 }
 0x216   :  { %v5315_v12 = vpack.c.bf16 %v16157_v26, %v16155_v25  ;;  %v3762_v13 = vmax.f32 %v18278_v28, %v12360_v47  ;;  %v3333_v45 = vpop.f32.mrb[157].mxu0  ;;  %v4647_v30 = vpop.f32.mrb[157].mxu1  ;;  %v18288_v47 = vld [vmem:[#allocation20_spill] sm:$0xff]  ;;  %v18433_v26 = vld [vmem:[#allocation117_spill] sm:$0xff] }
 0x217   :  { %v5314_v60 = vpack.c.bf16 %v16164_v44, %v16162_v48  ;;  %v3760_v4 = vmax.f32 %v18281_v51, %v3333_v45  ;;  %v12361_v59 = vpop.f32.mrb[158].mxu0  ;;  %12645 = vmatpush3.bf16.msra.mxu0 %v13945_v38  ;;  %v12493_v1 = vpop.f32.mrb[158].mxu1  ;;  %v18291_v45 = vld [vmem:[#allocation22_spill] sm:$0xff]  ;;  %v18432_v25 = vld [vmem:[#allocation116_spill] sm:$0xff] }
 0x218   :  { %v3763_v36 = vmax.f32 %v18284_v40, %v12361_v59  ;;  %v5076_v37 = vmax.f32 %v3762_v13, %v12492_v15  ;;  %v3336_v53 = vpop.f32.mrb[159].mxu0  ;;  %v4650_v2 = vpop.f32.mrb[159].mxu1  ;;  %12646 = vmatprep.subr.bf16.mxu0 %v13946_v46  ;;  %v18294_v59 = vld [vmem:[#allocation24_spill] sm:$0xff] }
 0x219   :  { %v3761_v55 = vmax.f32 %v18287_v19, %v3336_v53  ;;  %v5074_v5 = vmax.f32 %v3760_v4, %v4647_v30  ;;  %v18292_v30 = vld [vmem:[#allocation23_spill] sm:$0xff] }
 0x21a   :  { %v5077_v35 = vmax.f32 %v3763_v36, %v12493_v1  ;;  %12615 = vmatmul.mubr.bf16.gmra.mrb[8].mxu0 %v16109_v6  ;;  %v16187_v38 = vmax.f32 %v5076_v37, 0.0  ;;  %v18293_v32 = vmax.f32 %v18291_v45, %v18292_v30  ;;  %v18295_v1 = vld [vmem:[#allocation25_spill] sm:$0xff]  ;;  %v13949_v53 = vld [vmem:[%s17805_s2 + $0x38] sm:$0xff]  }
 0x21b   :  { %v5075_v43 = vmax.f32 %v3761_v55, %v4650_v2  ;;  %12618 = vmatprep.mubr.bf16.mxu0 %v16139_v21  ;;  %12647 = vmatpush3.bf16.msra.mxu0 %v13946_v46  ;;  %v16194_v7 = vmax.f32 %v5074_v5, 0.0  ;;  %v18289_v46 = vld [vmem:[#allocation21_spill] sm:$0xff]  ;;  %v18296_v24 = vmax.f32 %v18294_v59, %v18295_v1  ;;  %v18297_v2 = vld [vmem:[#allocation26_spill] sm:$0xff]  ;;  %v18306_v1 = vld [vmem:[#allocation32_spill] sm:$0xff] }
 0x21c   :  { %v16189_v39 = vmax.f32 %v5077_v35, 0.0  ;;  %12648 = vmatprep.subr.bf16.mxu0 %v13947_v11  ;;  %v18290_v15 = vmax.f32 %v18288_v47, %v18289_v46  ;;  %v18299_v18 = vmax.f32 %v18297_v2, %v18298_v54  ;;  %v13951_v54 = vld [vmem:[%s17805_s2 + $0x88] sm:$0xff]  }
 0x21d   :  { %v16196_v41 = vmax.f32 %v5075_v43, 0.0  ;;  %v12364_v42 = vpop.f32.mrb[160].mxu0  ;;  %v12496_v61 = vpop.f32.mrb[160].mxu1 }
 0x21e   :  { %v5317_v16 = vpack.c.bf16 %v16189_v39, %v16187_v38  ;;  %v3766_v50 = vmax.f32 %v18290_v15, %v12364_v42  ;;  %v3349_v27 = vpop.f32.mrb[161].mxu0  ;;  %v4663_v28 = vpop.f32.mrb[161].mxu1  ;;  %v13950_v42 = vld [vmem:[%s17805_s2 + $0x80] sm:$0xff]   ;;  %v18445_v39 = vld [vmem:[#allocation125_spill] sm:$0xff] }
 0x21f   :  { %v5316_v13 = vpack.c.bf16 %v16196_v41, %v16194_v7  ;;  %v3764_v33 = vmax.f32 %v18293_v32, %v3349_v27  ;;  %v12365_v51 = vpop.f32.mrb[162].mxu0  ;;  %12649 = vmatpush3.bf16.msra.mxu0 %v13947_v11  ;;  %v12497_v4 = vpop.f32.mrb[162].mxu1  ;;  %v18300_v27 = vld [vmem:[#allocation28_spill] sm:$0xff]  ;;  %v18304_v32 = vld [vmem:[#allocation31_spill] sm:$0xff] }
 0x220   :  { %v3767_v20 = vmax.f32 %v18296_v24, %v12365_v51  ;;  %v5080_v40 = vmax.f32 %v3766_v50, %v12496_v61  ;;  %v3352_v36 = vpop.f32.mrb[163].mxu0  ;;  %v4666_v37 = vpop.f32.mrb[163].mxu1  ;;  %12650 = vmatprep.subr.bf16.mxu0 %v13948_v23  ;;  %v18307_v24 = vld [vmem:[#allocation33_spill] sm:$0xff]  ;;  %v18444_v38 = vld [vmem:[#allocation124_spill] sm:$0xff] }
 0x221   :  { %v3765_v19 = vmax.f32 %v18299_v18, %v3352_v36  ;;  %v5078_v55 = vmax.f32 %v3764_v33, %v4663_v28  ;;  %v18301_v28 = vld [vmem:[#allocation29_spill] sm:$0xff]  ;;  %v18309_v18 = vld [vmem:[#allocation34_spill] sm:$0xff] }
 0x222   :  { %v5081_v5 = vmax.f32 %v3767_v20, %v12497_v4  ;;  %12619 = vmatmul.mubr.bf16.gmra.mrb[12].mxu0 %v16134_v8  ;;  %v5208_v35 = vmax.f32 %v5080_v40, 0.0  ;;  %v18308_v20 = vmax.f32 %v18306_v1, %v18307_v24 }
 0x223   :  { %v5079_v11 = vmax.f32 %v3765_v19, %v4666_v37  ;;  %12651 = vmatpush3.bf16.msra.mxu0 %v13948_v23  ;;  %12654 = vmatprep.mubr.bf16.mxu0 %v5302_v29  ;;  %v5206_v61 = vmax.f32 %v5078_v55, 0.0  ;;  %v18302_v23 = vmax.f32 %v18300_v27, %v18301_v28  ;;  %v18303_v29 = vld [vmem:[#allocation30_spill] sm:$0xff]  ;;  %v18310_v19 = vld [vmem:[#allocation35_spill] sm:$0xff] }
 0x224   :  { %v5209_v43 = vmax.f32 %v5081_v5, 0.0  ;;  %12652 = vmatprep.subr.bf16.mxu0 %v13949_v53  ;;  %v18305_v33 = vmax.f32 %v18303_v29, %v18304_v32  ;;  %v18311_v55 = vmax.f32 %v18309_v18, %v18310_v19 }
 0x225   :  { %v5207_v47 = vmax.f32 %v5079_v11, 0.0  ;;  %v12368_v46 = vpop.f32.mrb[164].mxu0  ;;  %v12500_v15 = vpop.f32.mrb[164].mxu1 }
 0x226   :  { %v16224_v50 = vpack.c.bf16 %v5209_v43, %v5208_v35  ;;  %v3770_v45 = vmax.f32 %v18302_v23, %v12368_v46  ;;  %v3365_v30 = vpop.f32.mrb[165].mxu0  ;;  %v4679_v58 = vpop.f32.mrb[165].mxu1 }
 0x227   :  { %v16229_v49 = vpack.c.bf16 %v5207_v47, %v5206_v61  ;;  %v3768_v51 = vmax.f32 %v18305_v33, %v3365_v30  ;;  %v12369_v4 = vpop.f32.mrb[166].mxu0  ;;  %12653 = vmatpush3.bf16.msra.mxu0 %v13949_v53  ;;  %v12501_v59 = vpop.f32.mrb[166].mxu1  ;;  %v13952_v47 = vld [vmem:[%s17805_s2 + $0x90] sm:$0xff]   ;;  %v18316_v30 = vld [vmem:[#allocation39_spill] sm:$0xff] }
 0x228   :  { %v3771_v40 = vmax.f32 %v18308_v20, %v12369_v4  ;;  %v5084_v36 = vmax.f32 %v3770_v45, %v12500_v15  ;;  %v3368_v37 = vpop.f32.mrb[167].mxu0  ;;  %v4682_v2 = vpop.f32.mrb[167].mxu1  ;;  %12686 = vmatprep.subr.bf16.mxu0 %v13950_v42  ;;  %v18319_v4 = vld [vmem:[#allocation41_spill] sm:$0xff] }
 0x229   :  { %v3769_v5 = vmax.f32 %v18311_v55, %v3368_v37  ;;  %v5082_v11 = vmax.f32 %v3768_v51, %v4679_v58  ;;  %v18318_v51 = vld [vmem:[#allocation40_spill] sm:$0xff]  ;;  %v18321_v37 = vld [vmem:[#allocation42_spill] sm:$0xff] }
 0x22a   :  { %v5085_v35 = vmax.f32 %v3771_v40, %v12501_v59  ;;  %12655 = vmatmul.mubr.bf16.vlgmr.msra.gmra.mrb[0].mxu0 %v5303_v0  ;;  %v5212_v43 = vmax.f32 %v5084_v36, 0.0  ;;  %v18314_v0 = vmax.f32 %v18312_v56, %v18313_v57  ;;  %v18320_v59 = vmax.f32 %v18318_v51, %v18319_v4  ;;  %v13953_v36 = vld [vmem:[%s17805_s2 + $0x98] sm:$0xff]   ;;  %v18327_v57 = vld [vmem:[#allocation46_spill] sm:$0xff] }
 0x22b   :  { %v5083_v53 = vmax.f32 %v3769_v5, %v4682_v2  ;;  %12658 = vmatprep.mubr.bf16.mxu0 %v5304_v3  ;;  %12687 = vmatpush3.bf16.msra.mxu0 %v13950_v42  ;;  %v5210_v46 = vmax.f32 %v5082_v11, 0.0  ;;  %v18315_v42 = vld [vmem:[#allocation38_spill] sm:$0xff]  ;;  %v18322_v2 = vld [vmem:[#allocation43_spill] sm:$0xff] }
 0x22c   :  { %v5213_v61 = vmax.f32 %v5085_v35, 0.0  ;;  %12688 = vmatprep.subr.bf16.mxu0 %v13951_v54  ;;  %v18317_v58 = vmax.f32 %v18315_v42, %v18316_v30  ;;  %v18323_v18 = vmax.f32 %v18321_v37, %v18322_v2  ;;  %v18330_v30 = vld [vmem:[#allocation48_spill] sm:$0xff] }
 0x22d   :  { %v5211_v15 = vmax.f32 %v5083_v53, 0.0  ;;  %v12372_v27 = vpop.f32.mrb[168].mxu0  ;;  %v12504_v28 = vpop.f32.mrb[168].mxu1  ;;  %v13954_v53 = vld [vmem:[%s17805_s2 + $0xa0] sm:$0xff]  }
 0x22e   :  { %v16252_v23 = vpack.c.bf16 %v5213_v61, %v5212_v43  ;;  %v3774_v45 = vmax.f32 %v18314_v0, %v12372_v27  ;;  %v3381_v62 = vpop.f32.mrb[169].mxu0  ;;  %v4695_v34 = vpop.f32.mrb[169].mxu1  ;;  %v18328_v0 = vld [vmem:[#allocation47_spill] sm:$0xff] }
 0x22f   :  { %v16257_v3 = vpack.c.bf16 %v5211_v15, %v5210_v46  ;;  %v3772_v29 = vmax.f32 %v18317_v58, %v3381_v62  ;;  %v12373_v32 = vpop.f32.mrb[170].mxu0  ;;  %v12505_v33 = vpop.f32.mrb[170].mxu1  ;;  %12689 = vmatpush3.bf16.msra.mxu0 %v13951_v54  ;;  %v18331_v58 = vld [vmem:[#allocation49_spill] sm:$0xff] }
 0x230   :  { %v3775_v1 = vmax.f32 %v18320_v59, %v12373_v32  ;;  %v5088_v24 = vmax.f32 %v3774_v45, %v12504_v28  ;;  %v3384_v20 = vpop.f32.mrb[171].mxu0  ;;  %v4698_v40 = vpop.f32.mrb[171].mxu1  ;;  %12690 = vmatprep.subr.bf16.mxu0 %v13952_v47  ;;  %v18324_v28 = vld [vmem:[#allocation44_spill] sm:$0xff]  ;;  %v18329_v45 = vmax.f32 %v18327_v57, %v18328_v0  ;;  %v13955_v59 = vld [vmem:[%s17805_s2 + $0xa8] sm:$0xff]  }
 0x231   :  { %v3773_v19 = vmax.f32 %v18323_v18, %v3384_v20  ;;  %v5086_v55 = vmax.f32 %v3772_v29, %v4695_v34  ;;  %v18326_v10 = vmax.f32 %v18324_v28, %v18325_v9  ;;  %v18332_v29 = vmax.f32 %v18330_v30, %v18331_v58  ;;  %v18339_v9 = vld [vmem:[#allocation54_spill] sm:$0xff]  ;;  %v18342_v0 = vld [vmem:[#allocation56_spill] sm:$0xff] }
 0x232   :  { %v5089_v5 = vmax.f32 %v3775_v1, %v12505_v33  ;;  %12659 = vmatmul.mubr.bf16.gmra.mrb[4].mxu0 %v5305_v17  ;;  %v5216_v11 = vmax.f32 %v5088_v24, 0.0  ;;  %v18333_v1 = vld [vmem:[#allocation50_spill] sm:$0xff]  ;;  %v18334_v24 = vld [vmem:[#allocation51_spill] sm:$0xff] }
 0x233   :  { %v5087_v54 = vmax.f32 %v3773_v19, %v4698_v40  ;;  %12662 = vmatprep.mubr.bf16.mxu0 %v16063_v52  ;;  %12691 = vmatpush3.bf16.msra.mxu0 %v13952_v47  ;;  %v5214_v43 = vmax.f32 %v5086_v55, 0.0  ;;  %v18335_v20 = vmax.f32 %v18333_v1, %v18334_v24  ;;  %v13956_v55 = vld [vmem:[%s17805_s2 + $0xb0] sm:$0xff]  }
 0x234   :  { %v5217_v35 = vmax.f32 %v5089_v5, 0.0  ;;  %12692 = vmatprep.subr.bf16.mxu0 %v13953_v36 }
 0x235   :  { %v5215_v61 = vmax.f32 %v5087_v54, 0.0  ;;  %v12376_v46 = vpop.f32.mrb[172].mxu0  ;;  %v12508_v15 = vpop.f32.mrb[172].mxu1 }
 0x236   :  { %v16278_v27 = vpack.c.bf16 %v5217_v35, %v5216_v11  ;;  %v3778_v17 = vmax.f32 %v18326_v10, %v12376_v46  ;;  %v3397_v56 = vpop.f32.mrb[173].mxu0  ;;  %v4711_v52 = vpop.f32.mrb[173].mxu1  ;;  %v18337_v46 = vld [vmem:[#allocation53_spill] sm:$0xff]  ;;  %v18340_v10 = vld [vmem:[#allocation55_spill] sm:$0xff] }
 0x237   :  { %v16283_v47 = vpack.c.bf16 %v5215_v61, %v5214_v43  ;;  %v3776_v62 = vmax.f32 %v18329_v45, %v3397_v56  ;;  %v12377_v34 = vpop.f32.mrb[174].mxu0  ;;  %v12509_v42 = vpop.f32.mrb[174].mxu1  ;;  %12693 = vmatpush3.bf16.msra.mxu0 %v13953_v36  ;;  %v18336_v61 = vld [vmem:[#allocation52_spill] sm:$0xff]  ;;  %v18343_v45 = vld [vmem:[#allocation57_spill] sm:$0xff] }
 0x238   :  { %v3779_v32 = vmax.f32 %v18332_v29, %v12377_v34  ;;  %v5092_v33 = vmax.f32 %v3778_v17, %v12508_v15  ;;  %v3400_v51 = vpop.f32.mrb[175].mxu0  ;;  %v4714_v4 = vpop.f32.mrb[175].mxu1  ;;  %12694 = vmatprep.subr.bf16.mxu0 %v13954_v53  ;;  %v18341_v17 = vmax.f32 %v18339_v9, %v18340_v10  ;;  %v13957_v29 = vld [vmem:[%s17805_s2 + $0xb8] sm:$0xff]  }
 0x239   :  { %v3777_v40 = vmax.f32 %v18335_v20, %v3400_v51  ;;  %v5090_v37 = vmax.f32 %v3776_v62, %v4711_v52  ;;  %12622 = vmatprep.mubr.bf16.mxu1 %v16283_v47  ;;  %v18344_v62 = vmax.f32 %v18342_v0, %v18343_v45 }
 0x23a   :  { %v5093_v36 = vmax.f32 %v3779_v32, %v12509_v42  ;;  %12623 = vmatmul.mubr.bf16.vlgmr.msra.gmra.mrb[0].mxu1 %v16278_v27  ;;  %12663 = vmatmul.mubr.bf16.gmra.mrb[8].mxu0 %v16052_v63  ;;  %v5220_v18 = vmax.f32 %v5092_v33, 0.0  ;;  %v18338_v63 = vmax.f32 %v18336_v61, %v18337_v46  ;;  %v18345_v32 = vld [vmem:[#allocation58_spill] sm:$0xff]  ;;  %v18346_v33 = vld [vmem:[#allocation59_spill] sm:$0xff] }
 0x23b   :  { %v5091_v2 = vmax.f32 %v3777_v40, %v4714_v4  ;;  %12666 = vmatprep.mubr.bf16.mxu0 %v16095_v31  ;;  %12695 = vmatpush3.bf16.msra.mxu0 %v13954_v53  ;;  %v5218_v5 = vmax.f32 %v5090_v37, 0.0  ;;  %v18347_v51 = vmax.f32 %v18345_v32, %v18346_v33  ;;  %v16330_v37 = vld [vmem:[%s17805_s2 + $0xc0] sm:$0xff]  }
 0x23c   :  { %v5221_v19 = vmax.f32 %v5093_v36, 0.0  ;;  %12696 = vmatprep.subr.bf16.mxu0 %v13955_v59 }
 0x23d   :  { %v5219_v54 = vmax.f32 %v5091_v2, 0.0  ;;  %v12380_v11 = vpop.f32.mrb[176].mxu0  ;;  %v12512_v35 = vpop.f32.mrb[176].mxu1 }
 0x23e   :  { %v16304_v43 = vpack.c.bf16 %v5221_v19, %v5220_v18  ;;  %v3782_v15 = vmax.f32 %v18338_v63, %v12380_v11  ;;  %v3413_v28 = vpop.f32.mrb[177].mxu0  ;;  %v4727_v31 = vpop.f32.mrb[177].mxu1  ;;  %v18351_v63 = vld [vmem:[#allocation62_spill] sm:$0xff] }
 0x23f   :  { %v16309_v53 = vpack.c.bf16 %v5219_v54, %v5218_v5  ;;  %v3780_v56 = vmax.f32 %v18341_v17, %v3413_v28  ;;  %v12381_v52 = vpop.f32.mrb[178].mxu0  ;;  %v12513_v57 = vpop.f32.mrb[178].mxu1  ;;  %12697 = vmatpush3.bf16.msra.mxu0 %v13955_v59  ;;  %v18348_v54 = vld [vmem:[#allocation60_spill] sm:$0xff] }
 0x240   :  { %v3783_v34 = vmax.f32 %v18344_v62, %v12381_v52  ;;  %v5096_v42 = vmax.f32 %v3782_v15, %v12512_v35  ;;  %v3416_v30 = vpop.f32.mrb[179].mxu0  ;;  %v4730_v58 = vpop.f32.mrb[179].mxu1  ;;  %12698 = vmatprep.subr.bf16.mxu0 %v13956_v55  ;;  %v18352_v15 = vld [vmem:[#allocation63_spill] sm:$0xff]  ;;  %v18354_v17 = vld [vmem:[#allocation64_spill] sm:$0xff] }
 0x241   :  { %v3781_v4 = vmax.f32 %v18347_v51, %v3416_v30  ;;  %v5094_v1 = vmax.f32 %v3780_v56, %v4727_v31  ;;  %12626 = vmatprep.mubr.bf16.mxu1 %v16309_v53  ;;  %v18353_v28 = vmax.f32 %v18351_v63, %v18352_v15  ;;  %v18355_v56 = vld [vmem:[#allocation65_spill] sm:$0xff] }
 0x242   :  { %v5097_v59 = vmax.f32 %v3783_v34, %v12513_v57  ;;  %12627 = vmatmul.mubr.bf16.gmra.mrb[4].mxu1 %v16304_v43  ;;  %12667 = vmatmul.mubr.bf16.gmra.mrb[12].mxu0 %v16084_v14  ;;  %v5224_v20 = vmax.f32 %v5096_v42, 0.0  ;;  %v18349_v14 = vld [vmem:[#allocation61_spill] sm:$0xff]  ;;  %v18356_v52 = vmax.f32 %v18354_v17, %v18355_v56  ;;  %v18357_v34 = vld [vmem:[#allocation66_spill] sm:$0xff]  ;;  %v18358_v42 = vld [vmem:[#allocation67_spill] sm:$0xff] }
 0x243   :  { %v5095_v24 = vmax.f32 %v3781_v4, %v4730_v58  ;;  %12670 = vmatprep.mubr.bf16.mxu0 %v16229_v49  ;;  %12699 = vmatpush3.bf16.msra.mxu0 %v13956_v55  ;;  %v5222_v36 = vmax.f32 %v5094_v1, 0.0  ;;  %v18350_v11 = vmax.f32 %v18348_v54, %v18349_v14  ;;  %v18359_v30 = vmax.f32 %v18357_v34, %v18358_v42 }
 0x244   :  { %v5225_v40 = vmax.f32 %v5097_v59, 0.0  ;;  %12700 = vmatprep.subr.bf16.mxu0 %v13957_v29 }
 0x245   :  { %v5223_v2 = vmax.f32 %v5095_v24, 0.0  ;;  %v12384_v18 = vpop.f32.mrb[180].mxu0  ;;  %v12516_v19 = vpop.f32.mrb[180].mxu1 }
 0x246   :  { %v16332_v5 = vpack.c.bf16 %v5225_v40, %v5224_v20  ;;  %v3786_v35 = vmax.f32 %v18350_v11, %v12384_v18  ;;  %v3429_v61 = vpop.f32.mrb[181].mxu0  ;;  %v4743_v55 = vpop.f32.mrb[181].mxu1 }
 0x247   :  { %v16337_v46 = vpack.c.bf16 %v5223_v2, %v5222_v36  ;;  %v3784_v31 = vmax.f32 %v18353_v28, %v3429_v61  ;;  %v12385_v9 = vpop.f32.mrb[182].mxu0  ;;  %v12517_v10 = vpop.f32.mrb[182].mxu1  ;;  %12701 = vmatpush3.bf16.msra.mxu0 %v13957_v29  ;;  %v18360_v36 = vld [vmem:[#allocation68_spill] sm:$0xff]  ;;  %v18361_v2 = vld [vmem:[#allocation69_spill] sm:$0xff]  ;;  %v18364_v61 = vld [vmem:[#allocation71_spill] sm:$0xff] }
 0x248   :  { %v3787_v57 = vmax.f32 %v18356_v52, %v12385_v9  ;;  %v5100_v0 = vmax.f32 %v3786_v35, %v12516_v19  ;;  %v3432_v45 = vpop.f32.mrb[183].mxu0  ;;  %v4746_v62 = vpop.f32.mrb[183].mxu1  ;;  %12734 = vmatprep.subr.bf16.mxu0 %v16330_v37  ;;  %v18362_v18 = vmax.f32 %v18360_v36, %v18361_v2  ;;  %v18363_v35 = vld [vmem:[#allocation70_spill] sm:$0xff]  ;;  %v18367_v9 = vld [vmem:[#allocation73_spill] sm:$0xff] }
 0x249   :  { %v3785_v58 = vmax.f32 %v18359_v30, %v3432_v45  ;;  %v5098_v32 = vmax.f32 %v3784_v31, %v4743_v55  ;;  %12630 = vmatprep.mubr.bf16.mxu1 %v16337_v46  ;;  %v18365_v55 = vmax.f32 %v18363_v35, %v18364_v61  ;;  %v18366_v31 = vld [vmem:[#allocation72_spill] sm:$0xff]  ;;  %v18370_v45 = vld [vmem:[#allocation75_spill] sm:$0xff] }
 0x24a   :  { %v5101_v33 = vmax.f32 %v3787_v57, %v12517_v10  ;;  %12631 = vmatmul.mubr.bf16.gmra.mrb[8].mxu1 %v16332_v5  ;;  %12671 = vmatmul.mubr.bf16.gmra.mrb[16].mxu0 %v16224_v50  ;;  %v5228_v51 = vmax.f32 %v5100_v0, 0.0  ;;  %v18368_v10 = vmax.f32 %v18366_v31, %v18367_v9  ;;  %v18369_v0 = vld [vmem:[#allocation74_spill] sm:$0xff]  ;;  %v18376_v35 = vld [vmem:[#allocation79_spill] sm:$0xff]  ;;  %v18379_v31 = vld [vmem:[#allocation81_spill] sm:$0xff] }
 0x24b   :  { %v5099_v29 = vmax.f32 %v3785_v58, %v4746_v62  ;;  %12674 = vmatprep.mubr.bf16.mxu0 %v16257_v3  ;;  %v5226_v1 = vmax.f32 %v5098_v32, 0.0  ;;  %v18371_v62 = vmax.f32 %v18369_v0, %v18370_v45  ;;  %v18382_v0 = vld [vmem:[#allocation83_spill] sm:$0xff] }
 0x24c   :  { %v5229_v4 = vmax.f32 %v5101_v33, 0.0 }
 0x24d   :  { %v5227_v59 = vmax.f32 %v5099_v29, 0.0  ;;  %v12388_v24 = vpop.f32.mrb[184].mxu0  ;;  %v12520_v20 = vpop.f32.mrb[184].mxu1 }
 0x24e   :  { %v16353_v40 = vpack.c.bf16 %v5229_v4, %v5228_v51  ;;  %v3790_v19 = vmax.f32 %v18362_v18, %v12388_v24  ;;  %v3445_v54 = vpop.f32.mrb[185].mxu0  ;;  %v4759_v14 = vpop.f32.mrb[185].mxu1  ;;  %v18372_v24 = vld [vmem:[#allocation76_spill] sm:$0xff] }
 0x24f   :  { %v16358_v11 = vpack.c.bf16 %v5227_v59, %v5226_v1  ;;  %v3788_v63 = vmax.f32 %v18365_v55, %v3445_v54  ;;  %v12389_v15 = vpop.f32.mrb[186].mxu0  ;;  %v12521_v28 = vpop.f32.mrb[186].mxu1 }
 0x250   :  { %v3791_v17 = vmax.f32 %v18368_v10, %v12389_v15  ;;  %v5104_v56 = vmax.f32 %v3790_v19, %v12520_v20  ;;  %v3448_v52 = vpop.f32.mrb[187].mxu0  ;;  %v4762_v57 = vpop.f32.mrb[187].mxu1  ;;  %v18373_v20 = vld [vmem:[#allocation77_spill] sm:$0xff] }
 0x251   :  { %v3789_v34 = vmax.f32 %v18371_v62, %v3448_v52  ;;  %v5102_v42 = vmax.f32 %v3788_v63, %v4759_v14  ;;  %12634 = vmatprep.mubr.bf16.mxu1 %v16358_v11  ;;  %v18374_v36 = vmax.f32 %v18372_v24, %v18373_v20  ;;  %v18375_v14 = vld [vmem:[#allocation78_spill] sm:$0xff]  ;;  %v18384_v24 = vld [vmem:[#allocation84_spill] sm:$0xff]  ;;  %v18385_v20 = vld [vmem:[#allocation85_spill] sm:$0xff] }
 0x252   :  { %v5105_v30 = vmax.f32 %v3791_v17, %v12521_v28  ;;  %12635 = vmatmul.mubr.bf16.gmra.mrb[12].mxu1 %v16353_v40  ;;  %12675 = vmatmul.mubr.bf16.gmra.mrb[20].mxu0 %v16252_v23  ;;  %v5232_v32 = vmax.f32 %v5104_v56, 0.0  ;;  %v18377_v61 = vmax.f32 %v18375_v14, %v18376_v35  ;;  %v18378_v28 = vld [vmem:[#allocation80_spill] sm:$0xff]  ;;  %v18387_v35 = vld [vmem:[#allocation86_spill] sm:$0xff] }
 0x253   :  { %v5103_v58 = vmax.f32 %v3789_v34, %v4762_v57  ;;  %12678 = vmatprep.mubr.bf16.mxu0 %v16283_v47  ;;  %v5230_v29 = vmax.f32 %v5102_v42, 0.0  ;;  %v18380_v9 = vmax.f32 %v18378_v28, %v18379_v31  ;;  %v18381_v57 = vld [vmem:[#allocation82_spill] sm:$0xff]  ;;  %v18390_v31 = vld [vmem:[#allocation88_spill] sm:$0xff] }
 0x254   :  { %v5233_v33 = vmax.f32 %v5105_v30, 0.0  ;;  %v18383_v45 = vmax.f32 %v18381_v57, %v18382_v0  ;;  %v18393_v0 = vld [vmem:[#allocation90_spill] sm:$0xff] }
 0x255   :  { %v5231_v51 = vmax.f32 %v5103_v58, 0.0  ;;  %v12392_v4 = vpop.f32.mrb[188].mxu0  ;;  %v12524_v1 = vpop.f32.mrb[188].mxu1 }
 0x256   :  { %v16373_v59 = vpack.c.bf16 %v5233_v33, %v5232_v32  ;;  %v3794_v2 = vmax.f32 %v18374_v36, %v12392_v4  ;;  %v3461_v18 = vpop.f32.mrb[189].mxu0  ;;  %v4775_v19 = vpop.f32.mrb[189].mxu1  ;;  %v18386_v36 = vmax.f32 %v18384_v24, %v18385_v20 }
 0x257   :  { %v16378_v54 = vpack.c.bf16 %v5231_v51, %v5230_v29  ;;  %v3792_v55 = vmax.f32 %v18377_v61, %v3461_v18  ;;  %v12393_v63 = vpop.f32.mrb[190].mxu0  ;;  %v12525_v15 = vpop.f32.mrb[190].mxu1  ;;  %v18388_v61 = vld [vmem:[#allocation87_spill] sm:$0xff] }
 0x258   :  { %v3795_v10 = vmax.f32 %v18380_v9, %v12393_v63  ;;  %v5108_v17 = vmax.f32 %v3794_v2, %v12524_v1  ;;  %v3464_v56 = vpop.f32.mrb[191].mxu0  ;;  %v4778_v52 = vpop.f32.mrb[191].mxu1  ;;  %v18391_v9 = vld [vmem:[#allocation89_spill] sm:$0xff] }
 0x259   :  { %v3793_v62 = vmax.f32 %v18383_v45, %v3464_v56  ;;  %v5106_v34 = vmax.f32 %v3792_v55, %v4775_v19  ;;  %v18389_v55 = vmax.f32 %v18387_v35, %v18388_v61  ;;  %v18394_v45 = vld [vmem:[#allocation91_spill] sm:$0xff] }
 0x25a   :  { %v5109_v42 = vmax.f32 %v3795_v10, %v12525_v15  ;;  %12679 = vmatmul.mubr.bf16.gmra.mrb[24].mxu0 %v16278_v27  ;;  %v5236_v58 = vmax.f32 %v5108_v17, 0.0  ;;  %v18392_v10 = vmax.f32 %v18390_v31, %v18391_v9 }
 0x25b   :  { %v5107_v30 = vmax.f32 %v3793_v62, %v4778_v52  ;;  %12682 = vmatprep.mubr.bf16.mxu0 %v16309_v53  ;;  %v5234_v33 = vmax.f32 %v5106_v34, 0.0  ;;  %v18395_v62 = vmax.f32 %v18393_v0, %v18394_v45 }
 0x25c   :  { %v5237_v32 = vmax.f32 %v5109_v42, 0.0 }
 0x25d   :  { %v5235_v29 = vmax.f32 %v5107_v30, 0.0  ;;  %v12396_v51 = vpop.f32.mrb[192].mxu0  ;;  %v12528_v4 = vpop.f32.mrb[192].mxu1 }
 0x25e   :  { %v16391_v1 = vpack.c.bf16 %v5237_v32, %v5236_v58  ;;  %v3798_v2 = vmax.f32 %v18386_v36, %v12396_v51  ;;  %v3477_v18 = vpop.f32.mrb[193].mxu0  ;;  %v4791_v19 = vpop.f32.mrb[193].mxu1  ;;  %v18396_v36 = vld [vmem:[#allocation92_spill] sm:$0xff] }
 0x25f   :  { %v16396_v14 = vpack.c.bf16 %v5235_v29, %v5234_v33  ;;  %v3796_v63 = vmax.f32 %v18389_v55, %v3477_v18  ;;  %v12397_v15 = vpop.f32.mrb[194].mxu0  ;;  %v12529_v28 = vpop.f32.mrb[194].mxu1 }
 0x260   :  { %v3799_v17 = vmax.f32 %v18392_v10, %v12397_v15  ;;  %v5112_v56 = vmax.f32 %v3798_v2, %v12528_v4  ;;  %v3480_v52 = vpop.f32.mrb[195].mxu0  ;;  %v4794_v57 = vpop.f32.mrb[195].mxu1  ;;  %v18397_v2 = vld [vmem:[#allocation93_spill] sm:$0xff]  ;;  %v18400_v15 = vld [vmem:[#allocation95_spill] sm:$0xff]  ;;  %v18402_v10 = vld [vmem:[#allocation96_spill] sm:$0xff] }
 0x261   :  { %v3797_v34 = vmax.f32 %v18395_v62, %v3480_v52  ;;  %v5110_v42 = vmax.f32 %v3796_v63, %v4791_v19  ;;  %v18398_v18 = vmax.f32 %v18396_v36, %v18397_v2  ;;  %v18399_v63 = vld [vmem:[#allocation94_spill] sm:$0xff]  ;;  %v13959_v62 = vld [vmem:[%s17805_s2 + $0xc8] sm:$0xff]  }
 0x262   :  { %v5113_v30 = vmax.f32 %v3799_v17, %v12529_v28  ;;  %12683 = vmatmul.mubr.bf16.gmra.mrb[28].mxu0 %v16304_v43  ;;  %v5240_v32 = vmax.f32 %v5112_v56, 0.0  ;;  %v18401_v28 = vmax.f32 %v18399_v63, %v18400_v15  ;;  %v18403_v17 = vld [vmem:[#allocation97_spill] sm:$0xff] }
 0x263   :  { %v5111_v58 = vmax.f32 %v3797_v34, %v4794_v57  ;;  %12702 = vmatprep.mubr.bf16.mxu0 %v16114_v22  ;;  %v5238_v29 = vmax.f32 %v5110_v42, 0.0  ;;  %v18404_v56 = vmax.f32 %v18402_v10, %v18403_v17  ;;  %v18405_v34 = vld [vmem:[#allocation98_spill] sm:$0xff]  ;;  %v18406_v42 = vld [vmem:[#allocation99_spill] sm:$0xff] }
 0x264   :  { %v5241_v33 = vmax.f32 %v5113_v30, 0.0  ;;  %v18407_v30 = vmax.f32 %v18405_v34, %v18406_v42 }
 0x265   :  { %v5239_v51 = vmax.f32 %v5111_v58, 0.0  ;;  %v12400_v24 = vpop.f32.mrb[196].mxu0  ;;  %v12532_v20 = vpop.f32.mrb[196].mxu1 }
 0x266   :  { %v16409_v4 = vpack.c.bf16 %v5241_v33, %v5240_v32  ;;  %v3802_v35 = vmax.f32 %v18398_v18, %v12400_v24  ;;  %v3493_v61 = vpop.f32.mrb[197].mxu0  ;;  %v4807_v19 = vpop.f32.mrb[197].mxu1 }
 0x267   :  { %v16414_v55 = vpack.c.bf16 %v5239_v51, %v5238_v29  ;;  %v3800_v22 = vmax.f32 %v18401_v28, %v3493_v61  ;;  %v12401_v31 = vpop.f32.mrb[198].mxu0  ;;  %v12533_v9 = vpop.f32.mrb[198].mxu1 }
 0x268   :  { %v3803_v52 = vmax.f32 %v18404_v56, %v12401_v31  ;;  %v5116_v57 = vmax.f32 %v3802_v35, %v12532_v20  ;;  %v3496_v0 = vpop.f32.mrb[199].mxu0  ;;  %v4810_v45 = vpop.f32.mrb[199].mxu1  ;;  %v13960_v20 = vld [vmem:[%s17805_s2 + $0xd0] sm:$0xff]   ;;  %v18412_v31 = vld [vmem:[#allocation103_spill] sm:$0xff] }
 0x269   :  { %v3801_v58 = vmax.f32 %v18407_v30, %v3496_v0  ;;  %v5114_v32 = vmax.f32 %v3800_v22, %v4807_v19  ;;  %v18408_v19 = vld [vmem:[#allocation100_spill] sm:$0xff]  ;;  %v18411_v22 = vld [vmem:[#allocation102_spill] sm:$0xff] }
 0x26a   :  { %v5117_v33 = vmax.f32 %v3803_v52, %v12533_v9  ;;  %12703 = vmatmul.mubr.bf16.vlgmr.msra.gmra.mrb[0].mxu0 %v16109_v6  ;;  %v5244_v51 = vmax.f32 %v5116_v57, 0.0  ;;  %v18409_v6 = vld [vmem:[#allocation101_spill] sm:$0xff]  ;;  %v18413_v9 = vmax.f32 %v18411_v22, %v18412_v31  ;;  %v18414_v52 = vld [vmem:[#allocation104_spill] sm:$0xff] }
 0x26b   :  { %v5115_v29 = vmax.f32 %v3801_v58, %v4810_v45  ;;  %12706 = vmatprep.mubr.bf16.mxu0 %v16139_v21  ;;  %12735 = vmatpush3.bf16.msra.mxu0 %v16330_v37  ;;  %v5242_v36 = vmax.f32 %v5114_v32, 0.0  ;;  %v18410_v63 = vmax.f32 %v18408_v19, %v18409_v6  ;;  %v18415_v57 = vld [vmem:[#allocation105_spill] sm:$0xff]  ;;  %v13961_v58 = vld [vmem:[%s17805_s2 + $0xd8] sm:$0xff]   ;;  %v18417_v32 = vld [vmem:[#allocation106_spill] sm:$0xff] }
 0x26c   :  { %v5245_v24 = vmax.f32 %v5117_v33, 0.0  ;;  %12736 = vmatprep.subr.bf16.mxu0 %v13959_v62  ;;  %v18416_v0 = vmax.f32 %v18414_v52, %v18415_v57  ;;  %v18418_v33 = vld [vmem:[#allocation107_spill] sm:$0xff]  ;;  %v18426_v57 = vld [vmem:[#allocation112_spill] sm:$0xff] }
 0x26d   :  { %v5243_v2 = vmax.f32 %v5115_v29, 0.0  ;;  %v12404_v18 = vpop.f32.mrb[200].mxu0  ;;  %v12536_v35 = vpop.f32.mrb[200].mxu1  ;;  %v18419_v29 = vmax.f32 %v18417_v32, %v18418_v33  ;;  %v13963_v33 = vld [vmem:[%s17805_s2 + $0xe8] sm:$0xff]  }
 0x26e   :  { %v16434_v61 = vpack.c.bf16 %v5245_v24, %v5244_v51  ;;  %v3806_v15 = vmax.f32 %v18410_v63, %v12404_v18  ;;  %v3509_v21 = vpop.f32.mrb[201].mxu0  ;;  %v4823_v28 = vpop.f32.mrb[201].mxu1 }
 0x26f   :  { %v16439_v37 = vpack.c.bf16 %v5243_v2, %v5242_v36  ;;  %v3804_v10 = vmax.f32 %v18413_v9, %v3509_v21  ;;  %v12405_v17 = vpop.f32.mrb[202].mxu0  ;;  %v12537_v56 = vpop.f32.mrb[202].mxu1  ;;  %12737 = vmatpush3.bf16.msra.mxu0 %v13959_v62  ;;  %v18424_v9 = vld [vmem:[#allocation111_spill] sm:$0xff] }
 0x270   :  { %v3807_v45 = vmax.f32 %v18416_v0, %v12405_v17  ;;  %v5120_v34 = vmax.f32 %v3806_v15, %v12536_v35  ;;  %v3512_v42 = vpop.f32.mrb[203].mxu0  ;;  %v4826_v30 = vpop.f32.mrb[203].mxu1  ;;  %12738 = vmatprep.subr.bf16.mxu0 %v13960_v20  ;;  %v13962_v35 = vld [vmem:[%s17805_s2 + $0xe0] sm:$0xff]   ;;  %v18427_v0 = vld [vmem:[#allocation113_spill] sm:$0xff] }
 0x271   :  { %v3805_v51 = vmax.f32 %v18419_v29, %v3512_v42  ;;  %v5118_v24 = vmax.f32 %v3804_v10, %v4823_v28  ;;  %v18421_v28 = vld [vmem:[#allocation109_spill] sm:$0xff]  ;;  %v18429_v29 = vld [vmem:[#allocation114_spill] sm:$0xff] }
 0x272   :  { %v5121_v36 = vmax.f32 %v3807_v45, %v12537_v56  ;;  %12707 = vmatmul.mubr.bf16.gmra.mrb[4].mxu0 %v16134_v8  ;;  %v5248_v2 = vmax.f32 %v5120_v34, 0.0  ;;  %v18420_v8 = vld [vmem:[#allocation108_spill] sm:$0xff]  ;;  %v18428_v45 = vmax.f32 %v18426_v57, %v18427_v0 }
 0x273   :  { %v5119_v62 = vmax.f32 %v3805_v51, %v4826_v30  ;;  %12710 = vmatprep.mubr.bf16.mxu0 %v5314_v60  ;;  %12739 = vmatpush3.bf16.msra.mxu0 %v13960_v20  ;;  %v5246_v19 = vmax.f32 %v5118_v24, 0.0  ;;  %v18422_v22 = vmax.f32 %v18420_v8, %v18421_v28  ;;  %v18423_v20 = vld [vmem:[#allocation110_spill] sm:$0xff]  ;;  %v18430_v51 = vld [vmem:[#allocation115_spill] sm:$0xff] }
 0x274   :  { %v5249_v18 = vmax.f32 %v5121_v36, 0.0  ;;  %12740 = vmatprep.subr.bf16.mxu0 %v13961_v58  ;;  %v18425_v10 = vmax.f32 %v18423_v20, %v18424_v9  ;;  %v18431_v24 = vmax.f32 %v18429_v29, %v18430_v51 }
 0x275   :  { %v5247_v6 = vmax.f32 %v5119_v62, 0.0  ;;  %v12408_v63 = vpop.f32.mrb[204].mxu0  ;;  %v12540_v15 = vpop.f32.mrb[204].mxu1 }
 0x276   :  { %v16460_v21 = vpack.c.bf16 %v5249_v18, %v5248_v2  ;;  %v3810_v31 = vmax.f32 %v18422_v22, %v12408_v63  ;;  %v3525_v48 = vpop.f32.mrb[205].mxu0  ;;  %v4839_v44 = vpop.f32.mrb[205].mxu1 }
 0x277   :  { %v16465_v60 = vpack.c.bf16 %v5247_v6, %v5246_v19  ;;  %v3808_v17 = vmax.f32 %v18425_v10, %v3525_v48  ;;  %v12409_v56 = vpop.f32.mrb[206].mxu0  ;;  %v12541_v52 = vpop.f32.mrb[206].mxu1  ;;  %12741 = vmatpush3.bf16.msra.mxu0 %v13961_v58  ;;  %v13964_v6 = vld [vmem:[%s17805_s2 + $0xf0] sm:$0xff]   ;;  %v18436_v48 = vld [vmem:[#allocation119_spill] sm:$0xff] }
 0x278   :  { %v3811_v34 = vmax.f32 %v18428_v45, %v12409_v56  ;;  %v5124_v42 = vmax.f32 %v3810_v31, %v12540_v15  ;;  %v3528_v30 = vpop.f32.mrb[207].mxu0  ;;  %v4842_v32 = vpop.f32.mrb[207].mxu1  ;;  %12742 = vmatprep.subr.bf16.mxu0 %v13962_v35  ;;  %v18439_v56 = vld [vmem:[#allocation121_spill] sm:$0xff] }
 0x279   :  { %v3809_v36 = vmax.f32 %v18431_v24, %v3528_v30  ;;  %v5122_v62 = vmax.f32 %v3808_v17, %v4839_v44  ;;  %v18438_v17 = vld [vmem:[#allocation120_spill] sm:$0xff]  ;;  %v18441_v30 = vld [vmem:[#allocation122_spill] sm:$0xff] }
 0x27a   :  { %v5125_v2 = vmax.f32 %v3811_v34, %v12541_v52  ;;  %12711 = vmatmul.mubr.bf16.gmra.mrb[8].mxu0 %v5315_v12  ;;  %v5252_v18 = vmax.f32 %v5124_v42, 0.0  ;;  %v18434_v12 = vmax.f32 %v18432_v25, %v18433_v26  ;;  %v18440_v52 = vmax.f32 %v18438_v17, %v18439_v56  ;;  %v13965_v42 = vld [vmem:[%s17805_s2 + $0xf8] sm:$0xff]  }
 0x27b   :  { %v5123_v58 = vmax.f32 %v3809_v36, %v4842_v32  ;;  %12714 = vmatprep.mubr.bf16.mxu0 %v5316_v13  ;;  %12743 = vmatpush3.bf16.msra.mxu0 %v13962_v35  ;;  %v5250_v63 = vmax.f32 %v5122_v62, 0.0  ;;  %v18435_v35 = vld [vmem:[#allocation118_spill] sm:$0xff]  ;;  %v18442_v32 = vld [vmem:[#allocation123_spill] sm:$0xff] }
 0x27c   :  { %v5253_v19 = vmax.f32 %v5125_v2, 0.0  ;;  %12744 = vmatprep.subr.bf16.mxu0 %v13963_v33  ;;  %v18437_v44 = vmax.f32 %v18435_v35, %v18436_v48  ;;  %v18443_v29 = vmax.f32 %v18441_v30, %v18442_v32 }
 0x27d   :  { %v5251_v15 = vmax.f32 %v5123_v58, 0.0  ;;  %v12412_v8 = vpop.f32.mrb[208].mxu0  ;;  %v12544_v28 = vpop.f32.mrb[208].mxu1  ;;  %v16514_v58 = vld [vmem:[%s17805_s2 + $0x100] sm:$0xff]  }
 0x27e   :  { %v16488_v22 = vpack.c.bf16 %v5253_v19, %v5252_v18  ;;  %v3814_v31 = vmax.f32 %v18434_v12, %v12412_v8  ;;  %v3541_v7 = vpop.f32.mrb[209].mxu0  ;;  %v4855_v41 = vpop.f32.mrb[209].mxu1  ;;  %v18447_v12 = vld [vmem:[#allocation126_spill] sm:$0xff] }
 0x27f   :  { %v16493_v13 = vpack.c.bf16 %v5251_v15, %v5250_v63  ;;  %v3812_v20 = vmax.f32 %v18437_v44, %v3541_v7  ;;  %v12413_v9 = vpop.f32.mrb[210].mxu0  ;;  %v12545_v10 = vpop.f32.mrb[210].mxu1  ;;  %12745 = vmatpush3.bf16.msra.mxu0 %v13963_v33  ;;  %v18450_v44 = vld [vmem:[#allocation128_spill] sm:$0xff] }
 0x280   :  { %v3815_v57 = vmax.f32 %v18440_v52, %v12413_v9  ;;  %v5128_v0 = vmax.f32 %v3814_v31, %v12544_v28  ;;  %v3544_v45 = vpop.f32.mrb[211].mxu0  ;;  %v4858_v34 = vpop.f32.mrb[211].mxu1  ;;  %12746 = vmatprep.subr.bf16.mxu0 %v13964_v6  ;;  %v18448_v31 = vld [vmem:[#allocation127_spill] sm:$0xff] }
 0x281   :  { %v3813_v51 = vmax.f32 %v18443_v29, %v3544_v45  ;;  %v5126_v24 = vmax.f32 %v3812_v20, %v4855_v41  ;;  %v18449_v7 = vmax.f32 %v18447_v12, %v18448_v31  ;;  %v18451_v20 = vld [vmem:[#allocation129_spill] sm:$0xff] }
 0x282   :  { %v5129_v36 = vmax.f32 %v3815_v57, %v12545_v10  ;;  %12715 = vmatmul.mubr.bf16.gmra.mrb[12].mxu0 %v5317_v16  ;;  %v5256_v62 = vmax.f32 %v5128_v0, 0.0  ;;  %v18446_v16 = vmax.f32 %v18444_v38, %v18445_v39  ;;  %v18452_v9 = vmax.f32 %v18450_v44, %v18451_v20  ;;  %v18453_v57 = vld [vmem:[#allocation130_spill] sm:$0xff]  ;;  %v18454_v0 = vld [vmem:[#allocation131_spill] sm:$0xff] }
 0x283   :  { %v5127_v33 = vmax.f32 %v3813_v51, %v4858_v34  ;;  %12718 = vmatprep.mubr.bf16.mxu0 %v16337_v46  ;;  %12747 = vmatpush3.bf16.msra.mxu0 %v13964_v6  ;;  %v5254_v18 = vmax.f32 %v5126_v24, 0.0  ;;  %v18455_v45 = vmax.f32 %v18453_v57, %v18454_v0 }
 0x284   :  { %v5257_v2 = vmax.f32 %v5129_v36, 0.0  ;;  %12748 = vmatprep.subr.bf16.mxu0 %v13965_v42 }
 0x285   :  { %v5255_v19 = vmax.f32 %v5127_v33, 0.0  ;;  %v12416_v63 = vpop.f32.mrb[212].mxu0  ;;  %v12548_v15 = vpop.f32.mrb[212].mxu1 }
 0x286   :  { %v16516_v8 = vpack.c.bf16 %v5257_v2, %v5256_v62  ;;  %v3818_v28 = vmax.f32 %v18446_v16, %v12416_v63  ;;  %v3557_v25 = vpop.f32.mrb[213].mxu0  ;;  %v4871_v6 = vpop.f32.mrb[213].mxu1 }
 0x287   :  { %v16521_v26 = vpack.c.bf16 %v5255_v19, %v5254_v18  ;;  %v3816_v41 = vmax.f32 %v18449_v7, %v3557_v25  ;;  %v12417_v35 = vpop.f32.mrb[214].mxu0  ;;  %v12549_v48 = vpop.f32.mrb[214].mxu1  ;;  %12749 = vmatpush3.bf16.msra.mxu0 %v13965_v42  ;;  %v18456_v18 = vld [vmem:[#allocation133_spill] sm:$0xff]  ;;  %v18457_v19 = vld [vmem:[#allocation134_spill] sm:$0xff]  ;;  %v18460_v25 = vld [vmem:[#allocation136_spill] sm:$0xff] }
 0x288   :  { %v3819_v10 = vmax.f32 %v18452_v9, %v12417_v35  ;;  %v5132_v17 = vmax.f32 %v3818_v28, %v12548_v15  ;;  %v3560_v56 = vpop.f32.mrb[215].mxu0  ;;  %v4874_v52 = vpop.f32.mrb[215].mxu1  ;;  %12782 = vmatprep.subr.bf16.mxu0 %v16514_v58  ;;  %v18458_v63 = vmax.f32 %v18456_v18, %v18457_v19  ;;  %v18459_v28 = vld [vmem:[#allocation135_spill] sm:$0xff]  ;;  %v18463_v35 = vld [vmem:[#allocation138_spill] sm:$0xff] }
 0x289   :  { %v3817_v34 = vmax.f32 %v18455_v45, %v3560_v56  ;;  %v5130_v30 = vmax.f32 %v3816_v41, %v4871_v6  ;;  %v18461_v6 = vmax.f32 %v18459_v28, %v18460_v25  ;;  %v18462_v41 = vld [vmem:[#allocation137_spill] sm:$0xff]  ;;  %v18466_v56 = vld [vmem:[#allocation140_spill] sm:$0xff] }
 0x28a   :  { %v5133_v32 = vmax.f32 %v3819_v10, %v12549_v48  ;;  %12719 = vmatmul.mubr.bf16.gmra.mrb[16].mxu0 %v16332_v5  ;;  %v5260_v42 = vmax.f32 %v5132_v17, 0.0  ;;  %v18464_v48 = vmax.f32 %v18462_v41, %v18463_v35  ;;  %v18465_v17 = vld [vmem:[#allocation139_spill] sm:$0xff]  ;;  %v18472_v28 = vld [vmem:[#allocation144_spill] sm:$0xff]  ;;  %v18475_v41 = vld [vmem:[#allocation146_spill] sm:$0xff] }
 0x28b   :  { %v5131_v29 = vmax.f32 %v3817_v34, %v4874_v52  ;;  %12722 = vmatprep.mubr.bf16.mxu0 %v16358_v11  ;;  %v5258_v24 = vmax.f32 %v5130_v30, 0.0  ;;  %v18467_v52 = vmax.f32 %v18465_v17, %v18466_v56  ;;  %v18478_v17 = vld [vmem:[#allocation148_spill] sm:$0xff] }
 0x28c   :  { %v5261_v51 = vmax.f32 %v5133_v32, 0.0 }
 0x28d   :  { %v5259_v36 = vmax.f32 %v5131_v29, 0.0  ;;  %v12420_v33 = vpop.f32.mrb[216].mxu0  ;;  %v12552_v62 = vpop.f32.mrb[216].mxu1 }
 0x28e   :  { %v16535_v2 = vpack.c.bf16 %v5261_v51, %v5260_v42  ;;  %v3822_v15 = vmax.f32 %v18458_v63, %v12420_v33  ;;  %v3573_v38 = vpop.f32.mrb[217].mxu0  ;;  %v4887_v39 = vpop.f32.mrb[217].mxu1  ;;  %v18468_v33 = vld [vmem:[#allocation141_spill] sm:$0xff] }
 0x28f   :  { %v16540_v16 = vpack.c.bf16 %v5259_v36, %v5258_v24  ;;  %v3820_v12 = vmax.f32 %v18461_v6, %v3573_v38  ;;  %v12421_v31 = vpop.f32.mrb[218].mxu0  ;;  %v12553_v7 = vpop.f32.mrb[218].mxu1 }
 0x290   :  { %v3823_v44 = vmax.f32 %v18464_v48, %v12421_v31  ;;  %v5136_v20 = vmax.f32 %v3822_v15, %v12552_v62  ;;  %v3576_v9 = vpop.f32.mrb[219].mxu0  ;;  %v4890_v10 = vpop.f32.mrb[219].mxu1  ;;  %v18469_v62 = vld [vmem:[#allocation142_spill] sm:$0xff] }
 0x291   :  { %v3821_v57 = vmax.f32 %v18467_v52, %v3576_v9  ;;  %v5134_v0 = vmax.f32 %v3820_v12, %v4887_v39  ;;  %v18470_v18 = vmax.f32 %v18468_v33, %v18469_v62  ;;  %v18471_v39 = vld [vmem:[#allocation143_spill] sm:$0xff]  ;;  %v18480_v33 = vld [vmem:[#allocation149_spill] sm:$0xff]  ;;  %v18481_v62 = vld [vmem:[#allocation150_spill] sm:$0xff] }
 0x292   :  { %v5137_v45 = vmax.f32 %v3823_v44, %v12553_v7  ;;  %12723 = vmatmul.mubr.bf16.gmra.mrb[20].mxu0 %v16353_v40  ;;  %v5264_v30 = vmax.f32 %v5136_v20, 0.0  ;;  %v18473_v25 = vmax.f32 %v18471_v39, %v18472_v28  ;;  %v18474_v7 = vld [vmem:[#allocation145_spill] sm:$0xff]  ;;  %v18483_v28 = vld [vmem:[#allocation151_spill] sm:$0xff] }
 0x293   :  { %v5135_v34 = vmax.f32 %v3821_v57, %v4890_v10  ;;  %12726 = vmatprep.mubr.bf16.mxu0 %v16378_v54  ;;  %v5262_v29 = vmax.f32 %v5134_v0, 0.0  ;;  %v18476_v35 = vmax.f32 %v18474_v7, %v18475_v41  ;;  %v18477_v10 = vld [vmem:[#allocation147_spill] sm:$0xff]  ;;  %v18486_v41 = vld [vmem:[#allocation153_spill] sm:$0xff] }
 0x294   :  { %v5265_v32 = vmax.f32 %v5137_v45, 0.0  ;;  %v18479_v56 = vmax.f32 %v18477_v10, %v18478_v17  ;;  %v18489_v17 = vld [vmem:[#allocation155_spill] sm:$0xff] }
 0x295   :  { %v5263_v42 = vmax.f32 %v5135_v34, 0.0  ;;  %v12424_v51 = vpop.f32.mrb[220].mxu0  ;;  %v12556_v24 = vpop.f32.mrb[220].mxu1 }
 0x296   :  { %v16553_v36 = vpack.c.bf16 %v5265_v32, %v5264_v30  ;;  %v3826_v19 = vmax.f32 %v18470_v18, %v12424_v51  ;;  %v3589_v63 = vpop.f32.mrb[221].mxu0  ;;  %v4903_v15 = vpop.f32.mrb[221].mxu1  ;;  %v18482_v18 = vmax.f32 %v18480_v33, %v18481_v62 }
 0x297   :  { %v16558_v38 = vpack.c.bf16 %v5263_v42, %v5262_v29  ;;  %v3824_v6 = vmax.f32 %v18473_v25, %v3589_v63  ;;  %v12425_v12 = vpop.f32.mrb[222].mxu0  ;;  %v12557_v31 = vpop.f32.mrb[222].mxu1  ;;  %v18484_v25 = vld [vmem:[#allocation152_spill] sm:$0xff] }
 0x298   :  { %v3827_v48 = vmax.f32 %v18476_v35, %v12425_v12  ;;  %v5140_v44 = vmax.f32 %v3826_v19, %v12556_v24  ;;  %v3592_v20 = vpop.f32.mrb[223].mxu0  ;;  %v4906_v9 = vpop.f32.mrb[223].mxu1  ;;  %v18487_v35 = vld [vmem:[#allocation154_spill] sm:$0xff] }
 0x299   :  { %v3825_v52 = vmax.f32 %v18479_v56, %v3592_v20  ;;  %v5138_v57 = vmax.f32 %v3824_v6, %v4903_v15  ;;  %v18485_v6 = vmax.f32 %v18483_v28, %v18484_v25  ;;  %v18490_v56 = vld [vmem:[#allocation156_spill] sm:$0xff] }
 0x29a   :  { %v5141_v0 = vmax.f32 %v3827_v48, %v12557_v31  ;;  %12727 = vmatmul.mubr.bf16.gmra.mrb[24].mxu0 %v16373_v59  ;;  %v5268_v34 = vmax.f32 %v5140_v44, 0.0  ;;  %v18488_v48 = vmax.f32 %v18486_v41, %v18487_v35 }
 0x29b   :  { %v5139_v45 = vmax.f32 %v3825_v52, %v4906_v9  ;;  %12730 = vmatprep.mubr.bf16.mxu0 %v16396_v14  ;;  %v5266_v32 = vmax.f32 %v5138_v57, 0.0  ;;  %v18491_v52 = vmax.f32 %v18489_v17, %v18490_v56 }
 0x29c   :  { %v5269_v30 = vmax.f32 %v5141_v0, 0.0 }
 0x29d   :  { %v5267_v29 = vmax.f32 %v5139_v45, 0.0  ;;  %v12428_v42 = vpop.f32.mrb[224].mxu0  ;;  %v12560_v51 = vpop.f32.mrb[224].mxu1 }
 0x29e   :  { %v16571_v24 = vpack.c.bf16 %v5269_v30, %v5268_v34  ;;  %v3830_v19 = vmax.f32 %v18482_v18, %v12428_v42  ;;  %v3605_v63 = vpop.f32.mrb[225].mxu0  ;;  %v4919_v15 = vpop.f32.mrb[225].mxu1  ;;  %v18492_v18 = vld [vmem:[#allocation157_spill] sm:$0xff] }
 0x29f   :  { %v16576_v39 = vpack.c.bf16 %v5267_v29, %v5266_v32  ;;  %v3828_v12 = vmax.f32 %v18485_v6, %v3605_v63  ;;  %v12429_v31 = vpop.f32.mrb[226].mxu0  ;;  %v12561_v7 = vpop.f32.mrb[226].mxu1  ;;  %v18495_v6 = vld [vmem:[#allocation159_spill] sm:$0xff] }
 0x2a0   :  { %v3831_v44 = vmax.f32 %v18488_v48, %v12429_v31  ;;  %v5144_v20 = vmax.f32 %v3830_v19, %v12560_v51  ;;  %v3608_v9 = vpop.f32.mrb[227].mxu0  ;;  %v4922_v10 = vpop.f32.mrb[227].mxu1  ;;  %v18493_v19 = vld [vmem:[#allocation158_spill] sm:$0xff]  ;;  %v18498_v48 = vld [vmem:[#allocation161_spill] sm:$0xff] }
 0x2a1   :  { %v3829_v57 = vmax.f32 %v18491_v52, %v3608_v9  ;;  %v5142_v0 = vmax.f32 %v3828_v12, %v4919_v15  ;;  %v18494_v63 = vmax.f32 %v18492_v18, %v18493_v19  ;;  %v18496_v12 = vld [vmem:[#allocation160_spill] sm:$0xff]  ;;  %v13967_v52 = vld [vmem:[%s17805_s2 + $0x108] sm:$0xff]  }
 0x2a2   :  { %v5145_v45 = vmax.f32 %v3831_v44, %v12561_v7  ;;  %12731 = vmatmul.mubr.bf16.gmra.mrb[28].mxu0 %v16391_v1  ;;  %v16589_v30 = vmax.f32 %v5144_v20, 0.0  ;;  %v18497_v31 = vmax.f32 %v18495_v6, %v18496_v12  ;;  %v18499_v44 = vld [vmem:[#allocation162_spill] sm:$0xff]  ;;  %v18504_v12 = vld [vmem:[#allocation165_spill] sm:$0xff] }
 0x2a3   :  { %v5143_v34 = vmax.f32 %v3829_v57, %v4922_v10  ;;  %12750 = vmatprep.mubr.bf16.mxu0 %v16229_v49  ;;  %v16593_v29 = vmax.f32 %v5142_v0, 0.0  ;;  %v18500_v20 = vmax.f32 %v18498_v48, %v18499_v44  ;;  %v18501_v57 = vld [vmem:[#allocation163_spill] sm:$0xff]  ;;  %v18502_v0 = vld [vmem:[#allocation164_spill] sm:$0xff] }
 0x2a4   :  { %v16591_v32 = vmax.f32 %v5145_v45, 0.0  ;;  %v18503_v45 = vmax.f32 %v18501_v57, %v18502_v0  ;;  %v18507_v44 = vld [vmem:[#allocation167_spill] sm:$0xff]  ;;  %v18510_v57 = vld [vmem:[#allocation169_spill] sm:$0xff]  ;;  %v18511_v0 = vld [vmem:[#allocation170_spill] sm:$0xff] }
 0x2a5   :  { %v16595_v42 = vmax.f32 %v5143_v34, 0.0  ;;  %v12432_v51 = vpop.f32.mrb[228].mxu0  ;;  %v12564_v33 = vpop.f32.mrb[228].mxu1 }
 0x2a6   :  { %v3834_v15 = vmax.f32 %v18494_v63, %v12432_v51  ;;  %v3621_v28 = vpop.f32.mrb[229].mxu0  ;;  %v4935_v25 = vpop.f32.mrb[229].mxu1 }
 0x2a7   :  { %v3832_v7 = vmax.f32 %v18497_v31, %v3621_v28  ;;  %v12433_v41 = vpop.f32.mrb[230].mxu0  ;;  %v12565_v35 = vpop.f32.mrb[230].mxu1 }
 0x2a8   :  { %v3835_v9 = vmax.f32 %v18500_v20, %v12433_v41  ;;  %v5148_v10 = vmax.f32 %v3834_v15, %v12564_v33  ;;  %v3624_v17 = vpop.f32.mrb[231].mxu0  ;;  %v4938_v56 = vpop.f32.mrb[231].mxu1  ;;  %v13968_v15 = vld [vmem:[%s17805_s2 + $0x110] sm:$0xff]   ;;  %v18508_v20 = vld [vmem:[#allocation168_spill] sm:$0xff] }
 0x2a9   :  { %v3833_v34 = vmax.f32 %v18503_v45, %v3624_v17  ;;  %v5146_v51 = vmax.f32 %v3832_v7, %v4935_v25  ;;  %v18512_v45 = vmax.f32 %v18510_v57, %v18511_v0 }
 0x2aa   :  { %v5149_v18 = vmax.f32 %v3835_v9, %v12565_v35  ;;  %12751 = vmatmul.mubr.bf16.vlgmr.msra.gmra.mrb[0].mxu0 %v16224_v50  ;;  %v16619_v33 = vmax.f32 %v5148_v10, 0.0  ;;  %v18509_v9 = vmax.f32 %v18507_v44, %v18508_v20 }
 0x2ab   :  { %v5147_v19 = vmax.f32 %v3833_v34, %v4938_v56  ;;  %12754 = vmatprep.mubr.bf16.mxu0 %v16257_v3  ;;  %12783 = vmatpush3.bf16.msra.mxu0 %v16514_v58  ;;  %v16626_v28 = vmax.f32 %v5146_v51, 0.0  ;;  %v18505_v58 = vld [vmem:[#allocation166_spill] sm:$0xff] }
 0x2ac   :  { %v16621_v63 = vmax.f32 %v5149_v18, 0.0  ;;  %12784 = vmatprep.subr.bf16.mxu0 %v13967_v52  ;;  %v18506_v31 = vmax.f32 %v18504_v12, %v18505_v58  ;;  %v18513_v12 = vld [vmem:[#allocation171_spill] sm:$0xff]  ;;  %v18514_v58 = vld [vmem:[#allocation172_spill] sm:$0xff] }
 0x2ad   :  { %v16628_v25 = vmax.f32 %v5147_v19, 0.0  ;;  %v12436_v6 = vpop.f32.mrb[232].mxu0  ;;  %v12568_v50 = vpop.f32.mrb[232].mxu1 }
 0x2ae   :  { %v3838_v7 = vmax.f32 %v18506_v31, %v12436_v6  ;;  %v3637_v41 = vpop.f32.mrb[233].mxu0  ;;  %v4951_v35 = vpop.f32.mrb[233].mxu1  ;;  %v13969_v6 = vld [vmem:[%s17805_s2 + $0x118] sm:$0xff]   ;;  %v18515_v31 = vmax.f32 %v18513_v12, %v18514_v58  ;;  %v18521_v12 = vld [vmem:[#allocation176_spill] sm:$0xff] }
 0x2af   :  { %v3836_v10 = vmax.f32 %v18509_v9, %v3637_v41  ;;  %v12437_v17 = vpop.f32.mrb[234].mxu0  ;;  %v12569_v56 = vpop.f32.mrb[234].mxu1  ;;  %12785 = vmatpush3.bf16.msra.mxu0 %v13967_v52  ;;  %v13970_v9 = vld [vmem:[%s17805_s2 + $0x120] sm:$0xff]  }
 0x2b0   :  { %v3839_v34 = vmax.f32 %v18512_v45, %v12437_v17  ;;  %v5152_v51 = vmax.f32 %v3838_v7, %v12568_v50  ;;  %v3640_v18 = vpop.f32.mrb[235].mxu0  ;;  %v4954_v19 = vpop.f32.mrb[235].mxu1  ;;  %12786 = vmatprep.subr.bf16.mxu0 %v13968_v15 }
 0x2b1   :  { %v3837_v44 = vmax.f32 %v18515_v31, %v3640_v18  ;;  %v5150_v41 = vmax.f32 %v3836_v10, %v4951_v35  ;;  %v18517_v35 = vld [vmem:[#allocation173_spill] sm:$0xff]  ;;  %v18518_v10 = vld [vmem:[#allocation174_spill] sm:$0xff] }
 0x2b2   :  { %v5153_v20 = vmax.f32 %v3839_v34, %v12569_v56  ;;  %12755 = vmatmul.mubr.bf16.gmra.mrb[4].mxu0 %v16252_v23  ;;  %v5280_v50 = vmax.f32 %v5152_v51, 0.0  ;;  %v18519_v23 = vmax.f32 %v18517_v35, %v18518_v10  ;;  %v18520_v51 = vld [vmem:[#allocation175_spill] sm:$0xff] }
 0x2b3   :  { %v5151_v52 = vmax.f32 %v3837_v44, %v4954_v19  ;;  %12758 = vmatprep.mubr.bf16.mxu0 %v16283_v47  ;;  %12787 = vmatpush3.bf16.msra.mxu0 %v13968_v15  ;;  %v5278_v17 = vmax.f32 %v5150_v41, 0.0  ;;  %v18522_v58 = vmax.f32 %v18520_v51, %v18521_v12  ;;  %v18523_v41 = vld [vmem:[#allocation177_spill] sm:$0xff] }
 0x2b4   :  { %v5281_v7 = vmax.f32 %v5153_v20, 0.0  ;;  %12788 = vmatprep.subr.bf16.mxu0 %v13969_v6 }
 0x2b5   :  { %v5279_v57 = vmax.f32 %v5151_v52, 0.0  ;;  %v12440_v0 = vpop.f32.mrb[236].mxu0  ;;  %v12572_v45 = vpop.f32.mrb[236].mxu1  ;;  %v18524_v52 = vld [vmem:[#allocation178_spill] sm:$0xff] }
 0x2b6   :  { %v16654_v18 = vpack.c.bf16 %v5281_v7, %v5280_v50  ;;  %v3842_v56 = vmax.f32 %v18519_v23, %v12440_v0  ;;  %v3653_v34 = vpop.f32.mrb[237].mxu0  ;;  %v4967_v19 = vpop.f32.mrb[237].mxu1  ;;  %v18525_v3 = vmax.f32 %v18523_v41, %v18524_v52  ;;  %v18527_v0 = vld [vmem:[#allocation180_spill] sm:$0xff] }
 0x2b7   :  { %v16659_v15 = vpack.c.bf16 %v5279_v57, %v5278_v17  ;;  %v3840_v31 = vmax.f32 %v18522_v58, %v3653_v34  ;;  %v12441_v44 = vpop.f32.mrb[238].mxu0  ;;  %v12573_v20 = vpop.f32.mrb[238].mxu1  ;;  %12789 = vmatpush3.bf16.msra.mxu0 %v13969_v6  ;;  %v13971_v17 = vld [vmem:[%s17805_s2 + $0x128] sm:$0xff]   ;;  %v18526_v57 = vld [vmem:[#allocation179_spill] sm:$0xff] }
 0x2b8   :  { %18516 = vst [vmem:[#allocation132_spill] sm:$0xff] %v16654_v18  ;;  %v3843_v50 = vmax.f32 %v18525_v3, %v12441_v44  ;;  %v5156_v7 = vmax.f32 %v3842_v56, %v12572_v45  ;;  %v3656_v48 = vpop.f32.mrb[239].mxu0  ;;  %v4970_v62 = vpop.f32.mrb[239].mxu1  ;;  %12790 = vmatprep.subr.bf16.mxu0 %v13970_v9  ;;  %v18528_v35 = vmax.f32 %v18526_v57, %v18527_v0  ;;  %v13972_v56 = vld [vmem:[%s17805_s2 + $0x130] sm:$0xff]  }
 0x2b9   :  { %v5154_v23 = vmax.f32 %v3840_v31, %v4967_v19  ;;  %v18530_v19 = vld [vmem:[#allocation181_spill] sm:$0xff]  ;;  %v18531_v31 = vld [vmem:[#allocation182_spill] sm:$0xff] }
 0x2ba   :  { %v3841_v10 = vmax.f32 %v18528_v35, %v3656_v48  ;;  %v5157_v34 = vmax.f32 %v3843_v50, %v12573_v20  ;;  %12759 = vmatmul.mubr.bf16.gmra.mrb[8].mxu0 %v16278_v27  ;;  %v5284_v3 = vmax.f32 %v5156_v7, 0.0  ;;  %v18532_v20 = vmax.f32 %v18530_v19, %v18531_v31  ;;  %v18534_v50 = vld [vmem:[#allocation183_spill] sm:$0xff]  ;;  %v18535_v7 = vld [vmem:[#allocation184_spill] sm:$0xff] }
 0x2bb   :  { %12762 = vmatprep.mubr.bf16.mxu0 %v16309_v53  ;;  %12791 = vmatpush3.bf16.msra.mxu0 %v13970_v9  ;;  %v5282_v51 = vmax.f32 %v5154_v23, 0.0  ;;  %v18536_v57 = vmax.f32 %v18534_v50, %v18535_v7  ;;  %v18537_v23 = vld [vmem:[#allocation185_spill] sm:$0xff]  ;;  %v16702_v50 = vld [vmem:[%s17805_s2 + $0x140] sm:$0xff]  }
 0x2bc   :  { %v5155_v6 = vmax.f32 %v3841_v10, %v4970_v62  ;;  %v5285_v45 = vmax.f32 %v5157_v34, 0.0  ;;  %12792 = vmatprep.subr.bf16.mxu0 %v13971_v17  ;;  %v18538_v34 = vld [vmem:[#allocation186_spill] sm:$0xff] }
 0x2bd   :  { %v12444_v58 = vpop.f32.mrb[240].mxu0  ;;  %v12576_v44 = vpop.f32.mrb[240].mxu1 }
 0x2be   :  { %v5283_v12 = vmax.f32 %v5155_v6, 0.0  ;;  %v16678_v48 = vpack.c.bf16 %v5285_v45, %v5284_v3  ;;  %v3846_v62 = vmax.f32 %v18532_v20, %v12444_v58  ;;  %v3669_v41 = vpop.f32.mrb[241].mxu0  ;;  %v4983_v52 = vpop.f32.mrb[241].mxu1  ;;  %v18539_v6 = vmax.f32 %v18537_v23, %v18538_v34  ;;  %v18541_v58 = vld [vmem:[#allocation188_spill] sm:$0xff] }
 0x2bf   :  { %v3844_v0 = vmax.f32 %v18536_v57, %v3669_v41  ;;  %v12445_v35 = vpop.f32.mrb[242].mxu0  ;;  %v12577_v10 = vpop.f32.mrb[242].mxu1  ;;  %12793 = vmatpush3.bf16.msra.mxu0 %v13971_v17 }
 0x2c0   :  { %18529 = vst [vmem:[#allocation4_spill] sm:$0xff] %v16678_v48  ;;  %v16683_v9 = vpack.c.bf16 %v5283_v12, %v5282_v51  ;;  %v3847_v3 = vmax.f32 %v18539_v6, %v12445_v35  ;;  %v5160_v45 = vmax.f32 %v3846_v62, %v12576_v44  ;;  %v3672_v49 = vpop.f32.mrb[243].mxu0  ;;  %v4986_v48 = vpop.f32.mrb[243].mxu1  ;;  %12794 = vmatprep.subr.bf16.mxu0 %v13972_v56  ;;  %v13973_v51 = vld [vmem:[%s17805_s2 + $0x138] sm:$0xff]  }
 0x2c1   :  { %v18540_v12 = vld [vmem:[#allocation187_spill] sm:$0xff]  ;;  %v5158_v20 = vmax.f32 %v3844_v0, %v4983_v52  ;;  %v18544_v0 = vld [vmem:[#allocation189_spill] sm:$0xff] }
 0x2c2   :  { %18533 = vst [vmem:[#allocation5_spill] sm:$0xff] %v16683_v9  ;;  %v18542_v19 = vmax.f32 %v18540_v12, %v18541_v58  ;;  %v5161_v41 = vmax.f32 %v3847_v3, %v12577_v10  ;;  %12763 = vmatmul.mubr.bf16.gmra.mrb[12].mxu0 %v16304_v43  ;;  %v5288_v44 = vmax.f32 %v5160_v45, 0.0  ;;  %v18545_v10 = vld [vmem:[#allocation190_spill] sm:$0xff]  ;;  %v18548_v3 = vld [vmem:[#allocation191_spill] sm:$0xff]  ;;  %v18549_v45 = vld [vmem:[#allocation192_spill] sm:$0xff] }
 0x2c3   :  { %12766 = vmatprep.mubr.bf16.mxu0 %v16414_v55  ;;  %12795 = vmatpush3.bf16.msra.mxu0 %v13972_v56  ;;  %v5286_v7 = vmax.f32 %v5158_v20, 0.0  ;;  %v18550_v12 = vmax.f32 %v18548_v3, %v18549_v45  ;;  %v18551_v20 = vld [vmem:[#allocation193_spill] sm:$0xff] }
 0x2c4   :  { %v3845_v31 = vmax.f32 %v18542_v19, %v3672_v49  ;;  %v5289_v62 = vmax.f32 %v5161_v41, 0.0  ;;  %12796 = vmatprep.subr.bf16.mxu0 %v13973_v51  ;;  %v18552_v41 = vld [vmem:[#allocation194_spill] sm:$0xff] }
 0x2c5   :  { %v12448_v35 = vpop.f32.mrb[244].mxu0  ;;  %v12580_v49 = vpop.f32.mrb[244].mxu1 }
 0x2c6   :  { %v5159_v17 = vmax.f32 %v3845_v31, %v4986_v48  ;;  %v16704_v52 = vpack.c.bf16 %v5289_v62, %v5288_v44  ;;  %v18546_v48 = vmax.f32 %v18544_v0, %v18545_v10  ;;  %v3685_v34 = vpop.f32.mrb[245].mxu0  ;;  %v4999_v56 = vpop.f32.mrb[245].mxu1  ;;  %v18555_v0 = vld [vmem:[#allocation196_spill] sm:$0xff] }
 0x2c7   :  { %v3848_v58 = vmax.f32 %v18550_v12, %v3685_v34  ;;  %v12449_v19 = vpop.f32.mrb[246].mxu0  ;;  %v12581_v31 = vpop.f32.mrb[246].mxu1  ;;  %12797 = vmatpush3.bf16.msra.mxu0 %v13973_v51 }
 0x2c8   :  { %v5287_v57 = vmax.f32 %v5159_v17, 0.0  ;;  %18543 = vst [vmem:[#allocation6_spill] sm:$0xff] %v16704_v52  ;;  %v3850_v23 = vmax.f32 %v18546_v48, %v12448_v35  ;;  %v18553_v17 = vmax.f32 %v18551_v20, %v18552_v41  ;;  %v3688_v52 = vpop.f32.mrb[247].mxu0  ;;  %v5002_v9 = vpop.f32.mrb[247].mxu1  ;;  %12830 = vmatprep.subr.bf16.mxu0 %v16702_v50  ;;  %v18554_v35 = vld [vmem:[#allocation195_spill] sm:$0xff]  ;;  %v18558_v20 = vld [vmem:[#allocation197_spill] sm:$0xff] }
 0x2c9   :  { %v5162_v10 = vmax.f32 %v3848_v58, %v4999_v56  ;;  %v18559_v41 = vld [vmem:[#allocation198_spill] sm:$0xff] }
 0x2ca   :  { %v16709_v6 = vpack.c.bf16 %v5287_v57, %v5286_v7  ;;  %v3851_v44 = vmax.f32 %v18553_v17, %v12449_v19  ;;  %v5164_v62 = vmax.f32 %v3850_v23, %v12580_v49  ;;  %v18556_v7 = vmax.f32 %v18554_v35, %v18555_v0  ;;  %12767 = vmatmul.mubr.bf16.gmra.mrb[16].mxu0 %v16409_v4 }
 0x2cb   :  { %12770 = vmatprep.mubr.bf16.mxu0 %v16439_v37  ;;  %v5290_v45 = vmax.f32 %v5162_v10, 0.0  ;;  %v18560_v17 = vmax.f32 %v18558_v20, %v18559_v41  ;;  %v18566_v10 = vld [vmem:[#allocation202_spill] sm:$0xff]  ;;  %v18569_v20 = vld [vmem:[#allocation204_spill] sm:$0xff] }
 0x2cc   :  { %18547 = vst [vmem:[#allocation7_spill] sm:$0xff] %v16709_v6  ;;  %v3849_v57 = vmax.f32 %v18556_v7, %v3688_v52  ;;  %v5165_v48 = vmax.f32 %v3851_v44, %v12581_v31  ;;  %v5292_v51 = vmax.f32 %v5164_v62, 0.0  ;;  %v18562_v31 = vld [vmem:[#allocation199_spill] sm:$0xff] }
 0x2cd   :  { %v12452_v49 = vpop.f32.mrb[248].mxu0  ;;  %v12584_v23 = vpop.f32.mrb[248].mxu1  ;;  %v18568_v6 = vld [vmem:[#allocation203_spill] sm:$0xff] }
 0x2ce   :  { %v5163_v34 = vmax.f32 %v3849_v57, %v5002_v9  ;;  %v5293_v3 = vmax.f32 %v5165_v48, 0.0  ;;  %v3854_v35 = vmax.f32 %v18560_v17, %v12452_v49  ;;  %v3701_v52 = vpop.f32.mrb[249].mxu0  ;;  %v5015_v56 = vpop.f32.mrb[249].mxu1  ;;  %v18563_v9 = vld [vmem:[#allocation200_spill] sm:$0xff]  ;;  %v18565_v57 = vld [vmem:[#allocation201_spill] sm:$0xff]  ;;  %v18570_v49 = vmax.f32 %v18568_v6, %v18569_v20 }
 0x2cf   :  { %v18564_v44 = vmax.f32 %v18562_v31, %v18563_v9  ;;  %v12453_v62 = vpop.f32.mrb[250].mxu0  ;;  %v12585_v7 = vpop.f32.mrb[250].mxu1  ;;  %v18567_v48 = vmax.f32 %v18565_v57, %v18566_v10 }
 0x2d0   :  { %v5291_v12 = vmax.f32 %v5163_v34, 0.0  ;;  %v16723_v19 = vpack.c.bf16 %v5293_v3, %v5292_v51  ;;  %v5168_v51 = vmax.f32 %v3854_v35, %v12584_v23  ;;  %v3704_v3 = vpop.f32.mrb[251].mxu0 }
 0x2d1   :  { %v3852_v0 = vmax.f32 %v18564_v44, %v3701_v52  ;;  %v3855_v34 = vmax.f32 %v18567_v48, %v12453_v62  ;;  %v3853_v41 = vmax.f32 %v18570_v49, %v3704_v3  ;;  %v18576_v48 = vld [vmem:[#allocation207_spill] sm:$0xff] }
 0x2d2   :  { %18557 = vst [vmem:[#allocation8_spill] sm:$0xff] %v16723_v19  ;;  %v16728_v58 = vpack.c.bf16 %v5291_v12, %v5290_v45  ;;  %v5018_v19 = vpop.f32.mrb[251].mxu1  ;;  %12771 = vmatmul.mubr.bf16.gmra.mrb[20].mxu0 %v16434_v61  ;;  %v16741_v52 = vmax.f32 %v5168_v51, 0.0 }
 0x2d3   :  { %v5166_v17 = vmax.f32 %v3852_v0, %v5015_v56  ;;  %v5169_v45 = vmax.f32 %v3855_v34, %v12585_v7  ;;  %v5167_v12 = vmax.f32 %v3853_v41, %v5018_v19  ;;  %12774 = vmatprep.mubr.bf16.mxu0 %v16465_v60  ;;  %v18573_v56 = vld [vmem:[#allocation205_spill] sm:$0xff]  ;;  %v18574_v0 = vld [vmem:[#allocation206_spill] sm:$0xff]  ;;  %v18577_v34 = vld [vmem:[#allocation208_spill] sm:$0xff] }
 0x2d4   :  { %18561 = vst [vmem:[#allocation9_spill] sm:$0xff] %v16728_v58  ;;  %18571 = vst [vmem:[#allocation10_spill] sm:$0xff] %v16741_v52  ;;  %v18575_v62 = vmax.f32 %v18573_v56, %v18574_v0  ;;  %v18578_v51 = vmax.f32 %v18576_v48, %v18577_v34  ;;  %v18579_v41 = vld [vmem:[#allocation209_spill] sm:$0xff]  ;;  %v18582_v56 = vld [vmem:[#allocation211_spill] sm:$0xff] }
 0x2d5   :  { %v16743_v31 = vmax.f32 %v5169_v45, 0.0  ;;  %v16745_v9 = vmax.f32 %v5166_v17, 0.0  ;;  %v16747_v23 = vmax.f32 %v5167_v12, 0.0  ;;  %v12456_v35 = vpop.f32.mrb[252].mxu0  ;;  %v12588_v44 = vpop.f32.mrb[252].mxu1  ;;  %v18580_v17 = vld [vmem:[#allocation210_spill] sm:$0xff] }
 0x2d6   :  { %v3858_v7 = vmax.f32 %v18575_v62, %v12456_v35  ;;  %v3717_v19 = vpop.f32.mrb[253].mxu0  ;;  %v5031_v57 = vpop.f32.mrb[253].mxu1  ;;  %v18581_v45 = vmax.f32 %v18579_v41, %v18580_v17  ;;  %v18583_v35 = vld [vmem:[#allocation212_spill] sm:$0xff] }
 0x2d7   :  { %18572 = vst [vmem:[#allocation11_spill] sm:$0xff] %v16743_v31  ;;  %v3856_v3 = vmax.f32 %v18578_v51, %v3717_v19  ;;  %v12457_v20 = vpop.f32.mrb[254].mxu0  ;;  %v12589_v49 = vpop.f32.mrb[254].mxu1  ;;  %v18584_v0 = vmax.f32 %v18582_v56, %v18583_v35 }
 0x2d8   :  { %v3859_v12 = vmax.f32 %v18581_v45, %v12457_v20  ;;  %v5172_v6 = vmax.f32 %v3858_v7, %v12588_v44  ;;  %v3720_v52 = vpop.f32.mrb[255].mxu0  ;;  %v5034_v31 = vpop.f32.mrb[255].mxu1 }
 0x2d9   :  { %v3857_v62 = vmax.f32 %v18584_v0, %v3720_v52  ;;  %v5170_v58 = vmax.f32 %v3856_v3, %v5031_v57 }
 0x2da   :  { %v5173_v18 = vmax.f32 %v3859_v12, %v12589_v49  ;;  %12775 = vmatmul.mubr.bf16.gmra.mrb[24].mxu0 %v16460_v21  ;;  %v16767_v19 = vmax.f32 %v5172_v6, 0.0 }
 0x2db   :  { %v5171_v10 = vmax.f32 %v3857_v62, %v5034_v31  ;;  %12778 = vmatprep.mubr.bf16.mxu0 %v16493_v13  ;;  %v16771_v34 = vmax.f32 %v5170_v58, 0.0  ;;  %v13975_v31 = vld [vmem:[%s17805_s2 + $0x148] sm:$0xff]   ;;  %v13982_v58 = vld [vmem:[%s17805_s2 + $0x180] sm:$0xff]  }
 0x2dc   :  { %v16769_v48 = vmax.f32 %v5173_v18, 0.0  ;;  %v13976_v18 = vld [vmem:[%s17805_s2 + $0x150] sm:$0xff]  }
 0x2dd   :  { %v16773_v44 = vmax.f32 %v5171_v10, 0.0 }
 0x2de   :  { %v5365_v7 = vpack.c.bf16 %v16769_v48, %v16767_v19  ;;  %v14012_v19 = vld [vmem:[%s17806_s4 + $0x70] sm:$0xff]   ;;  %v14013_v48 = vld [vmem:[%s17806_s4 + $0x78] sm:$0xff]  }
 0x2df   :  { %v5364_v52 = vpack.c.bf16 %v16773_v44, %v16771_v34 }
 0x2e2   :  { %12779 = vmatmul.mubr.bf16.gmra.mrb[28].mxu0 %v16488_v22 }
 0x2e3   :  { %12798 = vmatprep.mubr.bf16.mxu0 %v16283_v47  ;;  %v13977_v47 = vld [vmem:[%s17805_s2 + $0x158] sm:$0xff]  }
 0x2ea   :  { %12799 = vmatmul.mubr.bf16.vlgmr.msra.gmra.mrb[0].mxu0 %v16278_v27  ;;  %v13978_v27 = vld [vmem:[%s17805_s2 + $0x160] sm:$0xff]  }
 0x2eb   :  { %12802 = vmatprep.mubr.bf16.mxu0 %v16309_v53  ;;  %12831 = vmatpush3.bf16.msra.mxu0 %v16702_v50  ;;  %v13979_v53 = vld [vmem:[%s17805_s2 + $0x168] sm:$0xff]   ;;  %v13981_v50 = vld [vmem:[%s17805_s2 + $0x178] sm:$0xff]  }
 0x2ec   :  { %12832 = vmatprep.subr.bf16.mxu0 %v13975_v31 }
 0x2ef   :  { %12833 = vmatpush3.bf16.msra.mxu0 %v13975_v31 }
 0x2f0   :  { %12834 = vmatprep.subr.bf16.mxu0 %v13976_v18 }
 0x2f2   :  { %12803 = vmatmul.mubr.bf16.gmra.mrb[4].mxu0 %v16304_v43  ;;  %v13980_v43 = vld [vmem:[%s17805_s2 + $0x170] sm:$0xff]  }
 0x2f3   :  { %12806 = vmatprep.mubr.bf16.mxu0 %v16337_v46  ;;  %12835 = vmatpush3.bf16.msra.mxu0 %v13976_v18  ;;  %v13983_v18 = vld [vmem:[%s17805_s2 + $0x188] sm:$0xff]  }
 0x2f4   :  { %12836 = vmatprep.subr.bf16.mxu0 %v13977_v47 }
 0x2f7   :  { %12837 = vmatpush3.bf16.msra.mxu0 %v13977_v47  ;;  %v13985_v47 = vld [vmem:[%s17805_s2 + $0x198] sm:$0xff]  }
 0x2f8   :  { %12838 = vmatprep.subr.bf16.mxu0 %v13978_v27 }
 0x2fa   :  { %12807 = vmatmul.mubr.bf16.gmra.mrb[8].mxu0 %v16332_v5 }
 0x2fb   :  { %12810 = vmatprep.mubr.bf16.mxu0 %v16358_v11  ;;  %12839 = vmatpush3.bf16.msra.mxu0 %v13978_v27  ;;  %v13997_v27 = vld [vmem:[%s17805_s2 + $0x1f8] sm:$0xff]  }
 0x2fc   :  { %12840 = vmatprep.subr.bf16.mxu0 %v13979_v53 }
 0x2ff   :  { %12841 = vmatpush3.bf16.msra.mxu0 %v13979_v53  ;;  %v18585_v53 = vpack.c.bf16 %v16595_v42, %v16593_v29  ;;  %v18588_v29 = vpack.c.bf16 %v16621_v63, %v16619_v33  ;;  %v18589_v42 = vld [vmem:[#allocation132_spill] sm:$0xff]  ;;  %v14005_v33 = vld [vmem:[%s17805_s2 + $0x238] sm:$0xff]  }
 0x300   :  { %12842 = vmatprep.subr.bf16.mxu0 %v13980_v43  ;;  %v18592_v63 = vld [vmem:[#allocation7_spill] sm:$0xff] }
 0x302   :  { %12811 = vmatmul.mubr.bf16.gmra.mrb[12].mxu0 %v16353_v40 }
 0x303   :  { %12814 = vmatprep.mubr.bf16.mxu0 %v16465_v60  ;;  %12843 = vmatpush3.bf16.msra.mxu0 %v13980_v43  ;;  %v13998_v43 = vld [vmem:[%s17805_s2 + $0x200] sm:$0xff]  }
 0x304   :  { %12844 = vmatprep.subr.bf16.mxu0 %v13981_v50 }
 0x307   :  { %12845 = vmatpush3.bf16.msra.mxu0 %v13981_v50  ;;  %v18586_v50 = vpack.c.bf16 %v16591_v32, %v16589_v30  ;;  %v13999_v30 = vld [vmem:[%s17805_s2 + $0x208] sm:$0xff]   ;;  %v14000_v32 = vld [vmem:[%s17805_s2 + $0x210] sm:$0xff]  }
 0x308   :  { %12878 = vmatprep.subr.bf16.mxu0 %v13982_v58 }
 0x30a   :  { %12815 = vmatmul.mubr.bf16.gmra.mrb[16].mxu0 %v16460_v21 }
 0x30b   :  { %12818 = vmatprep.mubr.bf16.mxu0 %v16493_v13 }
 0x30d   :  { %v16816_v6 = vpop.f32.mrb[0].mxu1 }
 0x30e   :  { %v16818_v57 = vpop.f32.mrb[1].mxu1 }
 0x30f   :  { %v16820_v10 = vpop.f32.mrb[2].mxu1 }
 0x310   :  { %v16822_v51 = vpop.f32.mrb[3].mxu1 }
 0x312   :  { %12819 = vmatmul.mubr.bf16.gmra.mrb[20].mxu0 %v16488_v22 }
 0x313   :  { %12822 = vmatprep.mubr.bf16.mxu0 %v16521_v26 }
 0x315   :  { %v16826_v3 = vpop.f32.mrb[4].mxu1 }
 0x316   :  { %v16828_v20 = vpop.f32.mrb[5].mxu1 }
 0x317   :  { %v16830_v49 = vpop.f32.mrb[6].mxu1 }
 0x318   :  { %v16832_v41 = vpop.f32.mrb[7].mxu1 }
 0x31a   :  { %12823 = vmatmul.mubr.bf16.gmra.mrb[24].mxu0 %v16516_v8 }
 0x31b   :  { %12826 = vmatprep.mubr.bf16.mxu0 %v16540_v16 }
 0x31d   :  { %v16836_v17 = vpop.f32.mrb[8].mxu1 }
 0x31e   :  { %v16838_v45 = vpop.f32.mrb[9].mxu1 }
 0x31f   :  { %v16840_v12 = vpop.f32.mrb[10].mxu1 }
 0x320   :  { %v16842_v56 = vpop.f32.mrb[11].mxu1 }
 0x322   :  { %12827 = vmatmul.mubr.bf16.gmra.mrb[28].mxu0 %v16535_v2 }
 0x323   :  { %12846 = vmatprep.mubr.bf16.mxu0 %v16337_v46  ;;  %v13984_v46 = vld [vmem:[%s17805_s2 + $0x190] sm:$0xff]  }
 0x325   :  { %v16846_v35 = vpop.f32.mrb[12].mxu1 }
 0x326   :  { %v16848_v0 = vpop.f32.mrb[13].mxu1 }
 0x327   :  { %v16850_v62 = vpop.f32.mrb[14].mxu1 }
 0x328   :  { %v16852_v31 = vpop.f32.mrb[15].mxu1 }
 0x32a   :  { %12847 = vmatmul.mubr.bf16.vlgmr.msra.gmra.mrb[0].mxu0 %v16332_v5  ;;  %v13986_v5 = vld [vmem:[%s17805_s2 + $0x1a0] sm:$0xff]  }
 0x32b   :  { %12850 = vmatprep.mubr.bf16.mxu0 %v16358_v11  ;;  %12879 = vmatpush3.bf16.msra.mxu0 %v13982_v58  ;;  %v13987_v11 = vld [vmem:[%s17805_s2 + $0x1a8] sm:$0xff]   ;;  %v18587_v58 = vpack.c.bf16 %v16628_v25, %v16626_v28  ;;  %v18593_v28 = vld [vmem:[#allocation6_spill] sm:$0xff] }
 0x32c   :  { %12880 = vmatprep.subr.bf16.mxu0 %v13983_v18  ;;  %v18594_v25 = vld [vmem:[#allocation9_spill] sm:$0xff] }
 0x32f   :  { %12881 = vmatpush3.bf16.msra.mxu0 %v13983_v18  ;;  %v18590_v18 = vld [vmem:[#allocation5_spill] sm:$0xff] }
 0x330   :  { %12882 = vmatprep.subr.bf16.mxu0 %v13984_v46 }
 0x332   :  { %12851 = vmatmul.mubr.bf16.gmra.mrb[4].mxu0 %v16353_v40  ;;  %v13988_v40 = vld [vmem:[%s17805_s2 + $0x1b0] sm:$0xff]  }
 0x333   :  { %12854 = vmatprep.mubr.bf16.mxu0 %v16378_v54  ;;  %12883 = vmatpush3.bf16.msra.mxu0 %v13984_v46  ;;  %v13989_v54 = vld [vmem:[%s17805_s2 + $0x1b8] sm:$0xff]   ;;  %v18591_v46 = vld [vmem:[#allocation4_spill] sm:$0xff] }
 0x334   :  { %12884 = vmatprep.subr.bf16.mxu0 %v13985_v47 }
 0x337   :  { %12885 = vmatpush3.bf16.msra.mxu0 %v13985_v47  ;;  %v18595_v47 = vld [vmem:[#allocation8_spill] sm:$0xff] }
 0x338   :  { %12886 = vmatprep.subr.bf16.mxu0 %v13986_v5 }
 0x33a   :  { %12855 = vmatmul.mubr.bf16.gmra.mrb[8].mxu0 %v16373_v59  ;;  %v13990_v59 = vld [vmem:[%s17805_s2 + $0x1c0] sm:$0xff]  }
 0x33b   :  { %12858 = vmatprep.mubr.bf16.mxu0 %v16396_v14  ;;  %12887 = vmatpush3.bf16.msra.mxu0 %v13986_v5  ;;  %v13992_v14 = vld [vmem:[%s17805_s2 + $0x1d0] sm:$0xff]  }
 0x33c   :  { %12888 = vmatprep.subr.bf16.mxu0 %v13987_v11 }
 0x33f   :  { %12889 = vmatpush3.bf16.msra.mxu0 %v13987_v11 }
 0x340   :  { %12890 = vmatprep.subr.bf16.mxu0 %v13988_v40 }
 0x342   :  { %12859 = vmatmul.mubr.bf16.gmra.mrb[12].mxu0 %v16391_v1  ;;  %v13991_v1 = vld [vmem:[%s17805_s2 + $0x1c8] sm:$0xff]  }
 0x343   :  { %12862 = vmatprep.mubr.bf16.mxu0 %v16521_v26  ;;  %12891 = vmatpush3.bf16.msra.mxu0 %v13988_v40 }
 0x344   :  { %12892 = vmatprep.subr.bf16.mxu0 %v13989_v54 }
 0x347   :  { %12893 = vmatpush3.bf16.msra.mxu0 %v13989_v54 }
 0x348   :  { %12926 = vmatprep.subr.bf16.mxu0 %v13990_v59 }
 0x34a   :  { %12863 = vmatmul.mubr.bf16.gmra.mrb[16].mxu0 %v16516_v8 }
 0x34b   :  { %12866 = vmatprep.mubr.bf16.mxu0 %v16540_v16 }
 0x352   :  { %12867 = vmatmul.mubr.bf16.gmra.mrb[20].mxu0 %v16535_v2 }
 0x353   :  { %12870 = vmatprep.mubr.bf16.mxu0 %v16558_v38 }
 0x35a   :  { %12871 = vmatmul.mubr.bf16.gmra.mrb[24].mxu0 %v16553_v36 }
 0x35b   :  { %12874 = vmatprep.mubr.bf16.mxu0 %v16576_v39 }
 0x362   :  { %12875 = vmatmul.mubr.bf16.gmra.mrb[28].mxu0 %v16571_v24 }
 0x363   :  { %12894 = vmatprep.mubr.bf16.mxu0 %v16414_v55  ;;  %v13993_v55 = vld [vmem:[%s17805_s2 + $0x1d8] sm:$0xff]  }
 0x36a   :  { %12895 = vmatmul.mubr.bf16.vlgmr.msra.gmra.mrb[0].mxu0 %v16409_v4  ;;  %v13994_v4 = vld [vmem:[%s17805_s2 + $0x1e0] sm:$0xff]  }
 0x36b   :  { %12898 = vmatprep.mubr.bf16.mxu0 %v16439_v37  ;;  %12927 = vmatpush3.bf16.msra.mxu0 %v13990_v59  ;;  %v13995_v37 = vld [vmem:[%s17805_s2 + $0x1e8] sm:$0xff]  }
 0x36c   :  { %12928 = vmatprep.subr.bf16.mxu0 %v13991_v1 }
 0x36f   :  { %12929 = vmatpush3.bf16.msra.mxu0 %v13991_v1 }
 0x370   :  { %12930 = vmatprep.subr.bf16.mxu0 %v13992_v14 }
 0x372   :  { %12899 = vmatmul.mubr.bf16.gmra.mrb[4].mxu0 %v16434_v61  ;;  %v13996_v61 = vld [vmem:[%s17805_s2 + $0x1f0] sm:$0xff]  }
 0x373   :  { %12902 = vmatprep.mubr.bf16.mxu0 %v16465_v60  ;;  %12931 = vmatpush3.bf16.msra.mxu0 %v13992_v14 }
 0x374   :  { %12932 = vmatprep.subr.bf16.mxu0 %v13993_v55 }
 0x377   :  { %12933 = vmatpush3.bf16.msra.mxu0 %v13993_v55 }
 0x378   :  { %12934 = vmatprep.subr.bf16.mxu0 %v13994_v4 }
 0x37a   :  { %12903 = vmatmul.mubr.bf16.gmra.mrb[8].mxu0 %v16460_v21 }
 0x37b   :  { %12906 = vmatprep.mubr.bf16.mxu0 %v16493_v13  ;;  %12935 = vmatpush3.bf16.msra.mxu0 %v13994_v4 }
 0x37c   :  { %12936 = vmatprep.subr.bf16.mxu0 %v13995_v37 }
 0x37f   :  { %12937 = vmatpush3.bf16.msra.mxu0 %v13995_v37 }
 0x380   :  { %12938 = vmatprep.subr.bf16.mxu0 %v13996_v61 }
 0x382   :  { %12907 = vmatmul.mubr.bf16.gmra.mrb[12].mxu0 %v16488_v22 }
 0x383   :  { %12910 = vmatprep.mubr.bf16.mxu0 %v18585_v53  ;;  %12939 = vmatpush3.bf16.msra.mxu0 %v13996_v61 }
 0x384   :  { %12940 = vmatprep.subr.bf16.mxu0 %v13997_v27 }
 0x387   :  { %12941 = vmatpush3.bf16.msra.mxu0 %v13997_v27 }
 0x388   :  { %12974 = vmatprep.subr.bf16.mxu0 %v13998_v43 }
 0x38a   :  { %12911 = vmatmul.mubr.bf16.gmra.mrb[16].mxu0 %v18586_v50 }
 0x38b   :  { %12914 = vmatprep.mubr.bf16.mxu0 %v18587_v58 }
 0x392   :  { %12915 = vmatmul.mubr.bf16.gmra.mrb[20].mxu0 %v18588_v29 }
 0x393   :  { %12918 = vmatprep.mubr.bf16.mxu0 %v16659_v15 }
 0x39a   :  { %12919 = vmatmul.mubr.bf16.gmra.mrb[24].mxu0 %v18589_v42 }
 0x39b   :  { %12922 = vmatprep.mubr.bf16.mxu0 %v18590_v18 }
 0x3a2   :  { %12923 = vmatmul.mubr.bf16.gmra.mrb[28].mxu0 %v18591_v46 }
 0x3a3   :  { %12942 = vmatprep.mubr.bf16.mxu0 %v16465_v60  ;;  %v14001_v60 = vld [vmem:[%s17805_s2 + $0x218] sm:$0xff]  }
 0x3aa   :  { %12943 = vmatmul.mubr.bf16.vlgmr.msra.gmra.mrb[0].mxu0 %v16460_v21  ;;  %v14002_v21 = vld [vmem:[%s17805_s2 + $0x220] sm:$0xff]  }
 0x3ab   :  { %12946 = vmatprep.mubr.bf16.mxu0 %v16493_v13  ;;  %12975 = vmatpush3.bf16.msra.mxu0 %v13998_v43  ;;  %v14003_v13 = vld [vmem:[%s17805_s2 + $0x228] sm:$0xff]  }
 0x3ac   :  { %12976 = vmatprep.subr.bf16.mxu0 %v13999_v30 }
 0x3af   :  { %12977 = vmatpush3.bf16.msra.mxu0 %v13999_v30 }
 0x3b0   :  { %12978 = vmatprep.subr.bf16.mxu0 %v14000_v32 }
 0x3b2   :  { %12947 = vmatmul.mubr.bf16.gmra.mrb[4].mxu0 %v16488_v22  ;;  %v14004_v22 = vld [vmem:[%s17805_s2 + $0x230] sm:$0xff]  }
 0x3b3   :  { %12950 = vmatprep.mubr.bf16.mxu0 %v16521_v26  ;;  %12979 = vmatpush3.bf16.msra.mxu0 %v14000_v32 }
 0x3b4   :  { %12980 = vmatprep.subr.bf16.mxu0 %v14001_v60 }
 0x3b7   :  { %12981 = vmatpush3.bf16.msra.mxu0 %v14001_v60 }
 0x3b8   :  { %12982 = vmatprep.subr.bf16.mxu0 %v14002_v21 }
 0x3ba   :  { %12951 = vmatmul.mubr.bf16.gmra.mrb[8].mxu0 %v16516_v8 }
 0x3bb   :  { %12954 = vmatprep.mubr.bf16.mxu0 %v16540_v16  ;;  %12983 = vmatpush3.bf16.msra.mxu0 %v14002_v21 }
 0x3bc   :  { %12984 = vmatprep.subr.bf16.mxu0 %v14003_v13 }
 0x3bf   :  { %12985 = vmatpush3.bf16.msra.mxu0 %v14003_v13 }
 0x3c0   :  { %12986 = vmatprep.subr.bf16.mxu0 %v14004_v22 }
 0x3c2   :  { %12955 = vmatmul.mubr.bf16.gmra.mrb[12].mxu0 %v16535_v2 }
 0x3c3   :  { %12958 = vmatprep.mubr.bf16.mxu0 %v16659_v15  ;;  %12987 = vmatpush3.bf16.msra.mxu0 %v14004_v22  ;;  %v14009_v15 = vld [vmem:[%s17806_s4 + $0x58] sm:$0xff]  }
 0x3c4   :  { %12988 = vmatprep.subr.bf16.mxu0 %v14005_v33 }
 0x3c7   :  { %12989 = vmatpush3.bf16.msra.mxu0 %v14005_v33 }
 0x3ca   :  { %12959 = vmatmul.mubr.bf16.gmra.mrb[16].mxu0 %v18589_v42 }
 0x3cb   :  { %12962 = vmatprep.mubr.bf16.mxu0 %v18590_v18 }
 0x3d2   :  { %12963 = vmatmul.mubr.bf16.gmra.mrb[20].mxu0 %v18591_v46 }
 0x3d3   :  { %12966 = vmatprep.mubr.bf16.mxu0 %v18592_v63 }
 0x3da   :  { %12967 = vmatmul.mubr.bf16.gmra.mrb[24].mxu0 %v18593_v28 }
 0x3db   :  { %12970 = vmatprep.mubr.bf16.mxu0 %v18594_v25 }
 0x3e2   :  { %12971 = vmatmul.mubr.bf16.gmra.mrb[28].mxu0 %v18595_v47 }
 0x3e3   :  { %12990 = vmatprep.mubr.bf16.mxu0 %v16521_v26  ;;  %v18597_v26 = vld [vmem:[#allocation11_spill] sm:$0xff] }
 0x3ea   :  { %12991 = vmatmul.mubr.bf16.vlgmr.msra.gmra.mrb[0].mxu0 %v16516_v8  ;;  %v18596_v8 = vpack.c.bf16 %v16747_v23, %v16745_v9  ;;  %v14010_v9 = vld [vmem:[%s17806_s4 + $0x60] sm:$0xff]   ;;  %v14011_v23 = vld [vmem:[%s17806_s4 + $0x68] sm:$0xff]  }
 0x3eb   :  { %12994 = vmatprep.mubr.bf16.mxu0 %v16540_v16 }
 0x3f2   :  { %12995 = vmatmul.mubr.bf16.gmra.mrb[4].mxu0 %v16535_v2  ;;  %v18598_v2 = vld [vmem:[#allocation10_spill] sm:$0xff] }
 0x3f3   :  { %12998 = vmatprep.mubr.bf16.mxu0 %v16558_v38  ;;  %v18599_v16 = vpack.c.bf16 %v18597_v26, %v18598_v2  ;;  %v14134_v38 = vmov 0.0  }
 0x3f4   :  { %13022 = vmatprep.subr.bf16.mxu1 %v14134_v38  ;;  %13038 = vmatprep.mubr.msk.bf16.mxu1 %vm14135_vm1, %v14134_v38 }
 0x3fa   :  { %12999 = vmatmul.mubr.bf16.gmra.mrb[8].mxu0 %v16553_v36  ;;  %v14006_v36 = vld [vmem:[%s17806_s4 + $0x40] sm:$0xff]  }
 0x3fb   :  { %13002 = vmatprep.mubr.bf16.mxu0 %v16576_v39  ;;  %13023 = vmatpush3.bf16.msra.mxu1 %v14006_v36  ;;  %v14008_v39 = vld [vmem:[%s17806_s4 + $0x50] sm:$0xff]  }
 0x3fc   :  { %13024 = vmatprep.subr.bf16.mxu1 %v14134_v38 }
 0x402   :  { %13003 = vmatmul.mubr.bf16.gmra.mrb[12].mxu0 %v16571_v24  ;;  %v14007_v24 = vld [vmem:[%s17806_s4 + $0x48] sm:$0xff]  }
 0x403   :  { %13006 = vmatprep.mubr.bf16.mxu0 %v18592_v63  ;;  %13025 = vmatpush3.bf16.msra.mxu1 %v14007_v24 }
 0x404   :  { %13026 = vmatprep.subr.bf16.mxu1 %v14134_v38 }
 0x407   :  { %13027 = vmatpush3.bf16.msra.mxu1 %v14008_v39 }
 0x408   :  { %13028 = vmatprep.subr.bf16.mxu1 %v14134_v38 }
 0x40a   :  { %13007 = vmatmul.mubr.bf16.gmra.mrb[16].mxu0 %v18593_v28 }
 0x40b   :  { %13010 = vmatprep.mubr.bf16.mxu0 %v18594_v25  ;;  %13029 = vmatpush3.bf16.msra.mxu1 %v14009_v15 }
 0x40c   :  { %13030 = vmatprep.subr.bf16.mxu1 %v14134_v38 }
 0x40f   :  { %13031 = vmatpush3.bf16.msra.mxu1 %v14010_v9 }
 0x410   :  { %13032 = vmatprep.subr.bf16.mxu1 %v14134_v38 }
 0x412   :  { %13011 = vmatmul.mubr.bf16.gmra.mrb[20].mxu0 %v18595_v47 }
 0x413   :  { %13014 = vmatprep.mubr.bf16.mxu0 %v18596_v8  ;;  %13033 = vmatpush3.bf16.msra.mxu1 %v14011_v23 }
 0x414   :  { %13034 = vmatprep.subr.bf16.mxu1 %v14134_v38 }
 0x417   :  { %13035 = vmatpush3.bf16.msra.mxu1 %v14012_v19 }
 0x418   :  { %13036 = vmatprep.subr.bf16.mxu1 %v14134_v38 }
 0x41a   :  { %13015 = vmatmul.mubr.bf16.gmra.mrb[24].mxu0 %v18599_v16 }
 0x41b   :  { %13018 = vmatprep.mubr.bf16.mxu0 %v5364_v52  ;;  %13037 = vmatpush3.bf16.msra.mxu1 %v14013_v48 }
 0x41c   :  { %13042 = vmatprep.subr.bf16.mxu1 %v14134_v38 }
 0x422   :  { %13019 = vmatmul.mubr.bf16.gmra.mrb[28].mxu0 %v5365_v7 }
 0x4bd   :  { %v12992_v34 = vpop.f32.mrb[0].mxu0 }
 0x4be   :  { %v7680_v44 = vpop.f32.mrb[1].mxu0 }
 0x4bf   :  { %v12993_v7 = vpop.f32.mrb[2].mxu0 }
 0x4c0   :  { %v7683_v52 = vpop.f32.mrb[3].mxu0 }
 0x4c5   :  { %v12996_v5 = vpop.f32.mrb[4].mxu0 }
 0x4c6   :  { %v7696_v11 = vpop.f32.mrb[5].mxu0 }
 0x4c7   :  { %v12997_v40 = vpop.f32.mrb[6].mxu0 }
 0x4c8   :  { %v7699_v54 = vpop.f32.mrb[7].mxu0 }
 0x4cd   :  { %v13000_v59 = vpop.f32.mrb[8].mxu0 }
 0x4ce   :  { %v7845_v1 = vmax.f32 %v12992_v34, %v13000_v59  ;;  %v7712_v14 = vpop.f32.mrb[9].mxu0 }
 0x4cf   :  { %v7839_v55 = vmax.f32 %v7680_v44, %v7712_v14  ;;  %v13001_v4 = vpop.f32.mrb[10].mxu0 }
 0x4d0   :  { %v7848_v37 = vmax.f32 %v12993_v7, %v13001_v4  ;;  %v7715_v61 = vpop.f32.mrb[11].mxu0 }
 0x4d1   :  { %v7842_v27 = vmax.f32 %v7683_v52, %v7715_v61 }
 0x4d5   :  { %v13004_v53 = vpop.f32.mrb[12].mxu0 }
 0x4d6   :  { %v7857_v43 = vmax.f32 %v12996_v5, %v13004_v53  ;;  %v7728_v50 = vpop.f32.mrb[13].mxu0 }
 0x4d7   :  { %v7851_v58 = vmax.f32 %v7696_v11, %v7728_v50  ;;  %v13005_v29 = vpop.f32.mrb[14].mxu0 }
 0x4d8   :  { %v7860_v42 = vmax.f32 %v12997_v40, %v13005_v29  ;;  %v7731_v18 = vpop.f32.mrb[15].mxu0 }
 0x4d9   :  { %v7854_v46 = vmax.f32 %v7699_v54, %v7731_v18 }
 0x4dd   :  { %v13008_v30 = vpop.f32.mrb[16].mxu0 }
 0x4de   :  { %v13417_v32 = vadd.f32 %v13008_v30, %v16816_v6  ;;  %v7744_v60 = vpop.f32.mrb[17].mxu0 }
 0x4df   :  { %v13418_v21 = vadd.f32 %v7744_v60, %v16818_v57  ;;  %v13009_v13 = vpop.f32.mrb[18].mxu0 }
 0x4e0   :  { %v7846_v22 = vmax.f32 %v7845_v1, %v13417_v32  ;;  %v13419_v33 = vadd.f32 %v13009_v13, %v16820_v10  ;;  %v7747_v63 = vpop.f32.mrb[19].mxu0 }
 0x4e1   :  { %v7840_v28 = vmax.f32 %v7839_v55, %v13418_v21  ;;  %v13420_v25 = vadd.f32 %v7747_v63, %v16822_v51 }
 0x4e2   :  { %v7849_v47 = vmax.f32 %v7848_v37, %v13419_v33 }
 0x4e3   :  { %v7843_v8 = vmax.f32 %v7842_v27, %v13420_v25 }
 0x4e5   :  { %v13012_v26 = vpop.f32.mrb[20].mxu0 }
 0x4e6   :  { %v13421_v2 = vadd.f32 %v13012_v26, %v16826_v3  ;;  %v7760_v16 = vpop.f32.mrb[21].mxu0  ;;  %v11050_v3 = vld [vmem:[%s17807_s3] ss:$0 sm:$0xff] }
 0x4e7   :  { %v13422_v36 = vadd.f32 %v7760_v16, %v16828_v20  ;;  %v13013_v6 = vpop.f32.mrb[22].mxu0 }
 0x4e8   :  { %v7858_v24 = vmax.f32 %v7857_v43, %v13421_v2  ;;  %v13423_v57 = vadd.f32 %v13013_v6, %v16830_v49  ;;  %v7763_v39 = vpop.f32.mrb[23].mxu0 }
 0x4e9   :  { %v7852_v15 = vmax.f32 %v7851_v58, %v13422_v36  ;;  %v13424_v10 = vadd.f32 %v7763_v39, %v16832_v41 }
 0x4ea   :  { %v7861_v9 = vmax.f32 %v7860_v42, %v13423_v57 }
 0x4eb   :  { %v7855_v23 = vmax.f32 %v7854_v46, %v13424_v10 }
 0x4ed   :  { %v13016_v19 = vpop.f32.mrb[24].mxu0 }
 0x4ee   :  { %v13425_v51 = vadd.f32 %v13016_v19, %v16836_v17  ;;  %v7776_v48 = vpop.f32.mrb[25].mxu0 }
 0x4ef   :  { %v13426_v20 = vadd.f32 %v7776_v48, %v16838_v45  ;;  %v13017_v34 = vpop.f32.mrb[26].mxu0 }
 0x4f0   :  { %v7847_v44 = vmax.f32 %v7846_v22, %v13425_v51  ;;  %v13427_v49 = vadd.f32 %v13017_v34, %v16840_v12  ;;  %v7779_v7 = vpop.f32.mrb[27].mxu0 }
 0x4f1   :  { %v7841_v52 = vmax.f32 %v7840_v28, %v13426_v20  ;;  %v13428_v41 = vadd.f32 %v7779_v7, %v16842_v56 }
 0x4f2   :  { %v7872_v5 = vadd.f32 %v11050_v3, %v7847_v44  ;;  %v7850_v11 = vmax.f32 %v7849_v47, %v13427_v49 }
 0x4f3   :  { %v7870_v40 = vadd.f32 %v11050_v3, %v7841_v52  ;;  %v7844_v54 = vmax.f32 %v7843_v8, %v13428_v41 }
 0x4f4   :  { %v7873_v17 = vadd.f32 %v11050_v3, %v7850_v11  ;;  %v7880_v14 = vmax.f32 %v7872_v5, 0.0 }
 0x4f5   :  { %v7871_v59 = vadd.f32 %v11050_v3, %v7844_v54  ;;  %v13020_v1 = vpop.f32.mrb[28].mxu0  ;;  %v7878_v37 = vmax.f32 %v7870_v40, 0.0 }
 0x4f6   :  { %v7881_v55 = vmax.f32 %v7873_v17, 0.0  ;;  %v13429_v4 = vadd.f32 %v13020_v1, %v16846_v35  ;;  %v7792_v45 = vpop.f32.mrb[29].mxu0 }
 0x4f7   :  { %v7879_v61 = vmax.f32 %v7871_v59, 0.0  ;;  %v13430_v12 = vadd.f32 %v7792_v45, %v16848_v0  ;;  %v13021_v27 = vpop.f32.mrb[30].mxu0 }
 0x4f8   :  { %v7887_v53 = vpack.c.bf16 %v7881_v55, %v7880_v14  ;;  %v7859_v43 = vmax.f32 %v7858_v24, %v13429_v4  ;;  %v13431_v56 = vadd.f32 %v13021_v27, %v16850_v62  ;;  %v7795_v50 = vpop.f32.mrb[31].mxu0 }
 0x4f9   :  { %v7886_v58 = vpack.c.bf16 %v7879_v61, %v7878_v37  ;;  %v7853_v29 = vmax.f32 %v7852_v15, %v13430_v12  ;;  %v13432_v42 = vadd.f32 %v7795_v50, %v16852_v31 }
 0x4fa   :  { %7891 = vst [vmem:[#allocation3 + $0x8] sm:$0xff] %v7887_v53  ;;  %v7876_v18 = vadd.f32 %v11050_v3, %v7859_v43  ;;  %v7862_v46 = vmax.f32 %v7861_v9, %v13431_v56 }
 0x4fb   :  { %7890 = vst [vmem:[#allocation3] sm:$0xff] %v7886_v58  ;;  %v7874_v35 = vadd.f32 %v11050_v3, %v7853_v29  ;;  %v7856_v30 = vmax.f32 %v7855_v23, %v13432_v42 }
 0x4fc   :  { %v7877_v32 = vadd.f32 %v11050_v3, %v7862_v46  ;;  %v7884_v21 = vmax.f32 %v7876_v18, 0.0 }
 0x4fd   :  { %v7875_v60 = vadd.f32 %v11050_v3, %v7856_v30  ;;  %v7882_v13 = vmax.f32 %v7874_v35, 0.0 }
 0x4fe   :  { %v7885_v0 = vmax.f32 %v7877_v32, 0.0 }
 0x4ff   :  { %v7883_v22 = vmax.f32 %v7875_v60, 0.0  ;;  %v14014_v60 = vld [vmem:[%s17806_s4] sm:$0xff]  }
 0x500   :  { %v7889_v33 = vpack.c.bf16 %v7885_v0, %v7884_v21 }
 0x501   :  { %v8135_v63 = vld [vmem:[#allocation3 + $0x8] sm:$0x2]  ;;  %v7888_v62 = vpack.c.bf16 %v7883_v22, %v7882_v13  ;;  %v17058_v25 = vld [vmem:[#allocation3 + $0x8] sm:$0x4]  ;;  %v17061_v16 = vld [vmem:[#allocation3 + $0x8] sm:$0x1] }
 0x502   :  { %7893 = vst [vmem:[#allocation3 + $0x18] sm:$0xff] %v7889_v33  ;;  %v17056_v28 = vld [vmem:[#allocation3] sm:$0x1]  ;;  %v8160_v31 = vunpack.c.l.b16 %v8135_v63  ;;  %v8134_v8 = vld [vmem:[#allocation3] sm:$0x2]  ;;  %v8400_v36 = vunpack.c.l.b16 %v17058_v25  ;;  %v7936_v19 = vunpack.c.l.b16 %v17061_v16 }
 0x503   :  { %7892 = vst [vmem:[#allocation3 + $0x10] sm:$0xff] %v7888_v62  ;;  %v7935_v47 = vunpack.c.l.b16 %v17056_v28  ;;  %v8374_v26 = vld [vmem:[#allocation3] sm:$0x4]  ;;  %v8159_v2 = vunpack.c.l.b16 %v8134_v8  ;;  %v17064_v6 = vld [vmem:[#allocation3 + $0x8] sm:$0x8] }
 0x504   :  { %v17066_v24 = vld [vmem:[#allocation3 + $0x8] sm:$0x10]  ;;  %v17068_v57 = vld [vmem:[#allocation3 + $0x8] sm:$0x20]  ;;  %v8399_v39 = vunpack.c.l.b16 %v8374_v26  ;;  %v17072_v10 = vld [vmem:[#allocation3] sm:$0x8]  ;;  %v8642_v34 = vunpack.c.l.b16 %v17064_v6 }
 0x505   :  { %v7939_v15 = vrot.slane %v7935_v47, 1  ;;  %v8163_v9 = vrot.slane %v8159_v2, 2  ;;  %v8164_v23 = vrot.slane %v8160_v31, 1  ;;  %v8277_v3 = vrot.slane %v8159_v2, 3  ;;  %v17091_v37 = vld [vmem:[#allocation3 + $0x8] sm:$0x40] }
 0x506   :  { %v8278_v20 = vrot.slane %v8160_v31, 2  ;;  %v8884_v44 = vunpack.c.h.b16 %v17066_v24  ;;  %v8403_v54 = vrot.slane %v8399_v39, 4  ;;  %v8404_v17 = vrot.slane %v8400_v36, 3  ;;  %v17097_v43 = vld [vmem:[#allocation3 + $0x8] sm:$0x80]  ;;  %v14022_v28 = vld [vmem:[%s17806_s4 + $0x80] sm:$0xff]  }
 0x507   :  { %v9124_v59 = vunpack.c.h.b16 %v17068_v57  ;;  %v8641_v1 = vunpack.c.l.b16 %v17072_v10  ;;  %v7941_v14 = vsel %vm7940_vm2, %v7936_v19, %v7939_v15  ;;  %v8165_v4 = vsel %vm7940_vm2, %v8164_v23, %v8163_v9  ;;  %v8858_v25 = vld [vmem:[#allocation3] sm:$0x10] }
 0x508   :  { %v8279_v53 = vsel %vm7940_vm2, %v8278_v20, %v8277_v3  ;;  %v8405_v35 = vsel %vm7940_vm2, %v8404_v17, %v8403_v54  ;;  %v8518_v13 = vrot.slane %v8399_v39, 5  ;;  %v9364_v33 = vunpack.c.h.b16 %v17091_v37  ;;  %v14015_v39 = vld [vmem:[%s17806_s4 + $0x8] sm:$0xff]   ;;  %v9098_v3 = vld [vmem:[#allocation3] sm:$0x20] }
 0x509   :  { %v17075_v51 = vld [vmem:[#allocation3 + $0x18] sm:$0x1]  ;;  %v8137_v48 = vld [vmem:[#allocation3 + $0x18] sm:$0x2]  ;;  %v8377_v45 = vld [vmem:[#allocation3 + $0x18] sm:$0x4]  ;;  %v9606_v63 = vunpack.c.h.b16 %v17097_v43 }
 0x50a   :  { %v7938_v49 = vunpack.c.l.b16 %v17075_v51  ;;  %v17080_v7 = vld [vmem:[#allocation3 + $0x10] sm:$0x1]  ;;  %v8376_v52 = vld [vmem:[#allocation3 + $0x10] sm:$0x4]  ;;  %v17082_v41 = vld [vmem:[#allocation3 + $0x10] sm:$0x8]  ;;  %v8162_v5 = vunpack.c.l.b16 %v8137_v48  ;;  %v8402_v58 = vunpack.c.l.b16 %v8377_v45 }
 0x50b   :  { %v7937_v11 = vunpack.c.l.b16 %v17080_v7  ;;  %v8401_v40 = vunpack.c.l.b16 %v8376_v52  ;;  %v8136_v55 = vld [vmem:[#allocation3 + $0x10] sm:$0x2]  ;;  %v8643_v12 = vunpack.c.l.b16 %v17082_v41  ;;  %v8860_v30 = vld [vmem:[#allocation3 + $0x10] sm:$0x10]  ;;  %v8619_v22 = vld [vmem:[#allocation3 + $0x18] sm:$0x8] }
 0x50c   :  { %v8161_v27 = vunpack.c.l.b16 %v8136_v55  ;;  %v7945_v56 = vrot.slane %v7938_v49, 6  ;;  %v8167_v50 = vrot.slane %v8162_v5, 7  ;;  %v8408_v26 = vrot.slane %v8402_v58, 1  ;;  %v9338_v55 = vld [vmem:[#allocation3] sm:$0x40]  ;;  %v14024_v51 = vld [vmem:[%s17806_s4 + $0x90] sm:$0xff]  }
 0x50d   :  { %v7942_v61 = vrot.slane %v7937_v11, 7  ;;  %v8406_v29 = vrot.slane %v8401_v40, 2  ;;  %v8519_v2 = vrot.slane %v8400_v36, 4  ;;  %v8521_v15 = vrot.slane %v8401_v40, 3 }
 0x50e   :  { %v8166_v18 = vsel %vm7943_vm3, %v8161_v27, %v8165_v4  ;;  %v8280_v46 = vrot.slane %v8161_v27, 1  ;;  %v8885_v10 = vunpack.c.h.b16 %v8860_v30  ;;  %v8523_v9 = vrot.slane %v8402_v58, 2  ;;  %v17131_v4 = vld [vmem:[#allocation3 + $0x10] sm:$0x40] }
 0x50f   :  { %v7944_v42 = vsel %vm7943_vm3, %v7942_v61, %v7941_v14  ;;  %v17109_v21 = vsel %vm7946_vm4, %v8167_v50, %v8166_v18  ;;  %v8407_v0 = vsel %vm7943_vm3, %v8406_v29, %v8405_v35  ;;  %v8644_v23 = vunpack.c.l.b16 %v8619_v22 }
 0x510   :  { %v7947_v32 = vsel %vm7946_vm4, %v7945_v56, %v7944_v42  ;;  %v8281_v31 = vsel %vm7943_vm3, %v8280_v46, %v8279_v53  ;;  %v8645_v48 = vrot.slane %v8641_v1, 6  ;;  %v17124_v20 = vsel %vm7946_vm4, %v8408_v26, %v8407_v0  ;;  %v9580_v0 = vld [vmem:[#allocation3] sm:$0x80] }
 0x511   :  { %v7948_v62 = vpack.c.b16 %v7947_v32, %v7947_v32  ;;  %v17116_v8 = vsel %vm7946_vm4, %v8162_v5, %v8281_v31  ;;  %v8520_v36 = vsel %vm7940_vm2, %v8519_v2, %v8518_v13  ;;  %v8646_v52 = vrot.slane %v8642_v34, 5  ;;  %v8861_v5 = vld [vmem:[#allocation3 + $0x18] sm:$0x10] }
 0x512   :  { %v8648_v41 = vrot.slane %v8643_v12, 4  ;;  %v8883_v40 = vunpack.c.h.b16 %v8858_v25  ;;  %v8522_v54 = vsel %vm7943_vm3, %v8521_v15, %v8520_v36  ;;  %v8650_v17 = vrot.slane %v8644_v23, 3  ;;  %v9582_v25 = vld [vmem:[#allocation3 + $0x10] sm:$0x80]  ;;  %v9341_v36 = vld [vmem:[#allocation3 + $0x18] sm:$0x40] }
 0x513   :  { %13039 = vmatmul.mubr.bf16.vlgmr.msra.gmra.mrb[16].mxu1 %v7948_v62  ;;  %v8760_v14 = vrot.slane %v8641_v1, 7  ;;  %v17134_v45 = vsel %vm7946_vm4, %v8523_v9, %v8522_v54  ;;  %v8647_v61 = vsel %vm7940_vm2, %v8646_v52, %v8645_v48  ;;  %v8761_v27 = vrot.slane %v8642_v34, 6  ;;  %v14016_v1 = vld [vmem:[%s17806_s4 + $0x10] sm:$0xff]   ;;  %v14017_v9 = vld [vmem:[%s17806_s4 + $0x18] sm:$0xff]  }
 0x514   :  { %13043 = vmatpush3.bf16.msra.mxu1 %v14014_v60  ;;  %13058 = vmatprep.mubr.msk.bf16.mxu1 %vm14135_vm1, %v14134_v38  ;;  %v8763_v53 = vrot.slane %v8643_v12, 5  ;;  %v9123_v56 = vunpack.c.h.b16 %v9098_v3  ;;  %v8649_v50 = vsel %vm7943_vm3, %v8648_v41, %v8647_v61  ;;  %v8765_v58 = vrot.slane %v8644_v23, 4  ;;  %v9100_v12 = vld [vmem:[#allocation3 + $0x10] sm:$0x20]  ;;  %v9101_v60 = vld [vmem:[#allocation3 + $0x18] sm:$0x20] }
 0x515   :  { %13044 = vmatprep.subr.bf16.mxu1 %v14134_v38  ;;  %v8886_v29 = vunpack.c.h.b16 %v8861_v5  ;;  %v17144_v42 = vsel %vm7946_vm4, %v8650_v17, %v8649_v50  ;;  %v8762_v18 = vsel %vm7940_vm2, %v8761_v27, %v8760_v14  ;;  %v8887_v6 = vrot.slane %v8884_v44, 7  ;;  %v14018_v27 = vld [vmem:[%s17806_s4 + $0x20] sm:$0xff]  }
 0x516   :  { %v8889_v34 = vrot.slane %v8885_v10, 6  ;;  %v9363_v46 = vunpack.c.h.b16 %v9338_v55  ;;  %v9365_v35 = vunpack.c.h.b16 %v17131_v4  ;;  %v8764_v30 = vsel %vm7943_vm3, %v8763_v53, %v8762_v18  ;;  %v9583_v18 = vld [vmem:[#allocation3 + $0x18] sm:$0x80] }
 0x517   :  { %v9001_v32 = vrot.slane %v8883_v40, 1  ;;  %v17153_v13 = vsel %vm7946_vm4, %v8765_v58, %v8764_v30  ;;  %v8888_v22 = vsel %vm7940_vm2, %v8887_v6, %v8883_v40  ;;  %v8891_v62 = vrot.slane %v8886_v29, 5 }
 0x518   :  { %13045 = vmatpush3.bf16.msra.mxu1 %v14015_v39  ;;  %v9003_v31 = vrot.slane %v8885_v10, 7  ;;  %v8890_v26 = vsel %vm7943_vm3, %v8889_v34, %v8888_v22  ;;  %v9005_v15 = vrot.slane %v8886_v29, 6  ;;  %v9125_v39 = vunpack.c.h.b16 %v9100_v12 }
 0x519   :  { %13046 = vmatprep.subr.bf16.mxu1 %v14134_v38  ;;  %v9002_v2 = vsel %vm7940_vm2, %v8884_v44, %v9001_v32  ;;  %v17164_v23 = vsel %vm7946_vm4, %v8891_v62, %v8890_v26  ;;  %v9126_v10 = vunpack.c.h.b16 %v9101_v60  ;;  %v9127_v3 = vrot.slane %v9123_v56, 2  ;;  %v14019_v32 = vld [vmem:[%s17806_s4 + $0x28] sm:$0xff]  }
 0x51a   :  { %v9004_v48 = vsel %vm7943_vm3, %v9003_v31, %v9002_v2  ;;  %v9605_v52 = vunpack.c.h.b16 %v9580_v0  ;;  %v9128_v44 = vrot.slane %v9124_v59, 1  ;;  %v9241_v41 = vrot.slane %v9123_v56, 3 }
 0x51b   :  { %v17169_v24 = vsel %vm7946_vm4, %v9005_v15, %v9004_v48  ;;  %v9607_v5 = vunpack.c.h.b16 %v9582_v25  ;;  %v9131_v40 = vrot.slane %v9126_v10, 7  ;;  %v9242_v54 = vrot.slane %v9124_v59, 2 }
 0x51c   :  { %13047 = vmatpush3.bf16.msra.mxu1 %v14016_v1  ;;  %v9244_v17 = vrot.slane %v9125_v39, 1  ;;  %v9129_v14 = vsel %vm7940_vm2, %v9128_v44, %v9127_v3  ;;  %v9366_v55 = vunpack.c.h.b16 %v9341_v36  ;;  %v9367_v4 = vrot.slane %v9363_v46, 4 }
 0x51d   :  { %13048 = vmatprep.subr.bf16.mxu1 %v14134_v38  ;;  %v9368_v61 = vrot.slane %v9364_v33, 3  ;;  %v9130_v53 = vsel %vm7943_vm3, %v9125_v39, %v9129_v14  ;;  %v9243_v56 = vsel %vm7940_vm2, %v9242_v54, %v9241_v41  ;;  %v9370_v50 = vrot.slane %v9365_v35, 2  ;;  %v14027_v54 = vld [vmem:[%s17806_s4 + $0xa8] sm:$0xff]   ;;  %v14029_v14 = vld [vmem:[%s17806_s4 + $0xb8] sm:$0xff]  }
 0x51e   :  { %v9482_v57 = vrot.slane %v9363_v46, 5  ;;  %v17185_v59 = vsel %vm7946_vm4, %v9131_v40, %v9130_v53  ;;  %v9245_v58 = vsel %vm7943_vm3, %v9244_v17, %v9243_v56  ;;  %v9372_v1 = vrot.slane %v9366_v55, 1  ;;  %v14026_v40 = vld [vmem:[%s17806_s4 + $0xa0] sm:$0xff]   ;;  %v14028_v17 = vld [vmem:[%s17806_s4 + $0xb0] sm:$0xff]   ;;  %v14035_v56 = vld [vmem:[%s17806_s4 + $0xe8] sm:$0xff]  }
 0x51f   :  { %v9369_v29 = vsel %vm7940_vm2, %v9368_v61, %v9367_v4  ;;  %v17190_v6 = vsel %vm7946_vm4, %v9126_v10, %v9245_v58  ;;  %v9483_v12 = vrot.slane %v9364_v33, 4  ;;  %v9485_v30 = vrot.slane %v9365_v35, 3  ;;  %v14020_v10 = vld [vmem:[%s17806_s4 + $0x30] sm:$0xff]   ;;  %v14031_v61 = vld [vmem:[%s17806_s4 + $0xc8] sm:$0xff]   ;;  %v14034_v53 = vld [vmem:[%s17806_s4 + $0xe0] sm:$0xff]  }
 0x520   :  { %13049 = vmatpush3.bf16.msra.mxu1 %v14017_v9  ;;  %v9371_v34 = vsel %vm7943_vm3, %v9370_v50, %v9369_v29  ;;  %v9487_v0 = vrot.slane %v9366_v55, 2  ;;  %v9608_v22 = vunpack.c.h.b16 %v9583_v18  ;;  %v9609_v62 = vrot.slane %v9605_v52, 6  ;;  %v14030_v55 = vld [vmem:[%s17806_s4 + $0xc0] sm:$0xff]   ;;  %v14036_v50 = vld [vmem:[%s17806_s4 + $0xf0] sm:$0xff]  }
 0x521   :  { %13050 = vmatprep.subr.bf16.mxu1 %v14134_v38  ;;  %v17196_v46 = vsel %vm7946_vm4, %v9372_v1, %v9371_v34  ;;  %v9484_v60 = vsel %vm7940_vm2, %v9483_v12, %v9482_v57  ;;  %v9610_v37 = vrot.slane %v9606_v63, 5  ;;  %v9612_v33 = vrot.slane %v9607_v5, 4  ;;  %v14037_v57 = vld [vmem:[%s17806_s4 + $0xf8] sm:$0xff]   ;;  %v14038_v58 = vld [vmem:[%s17806_s4 + $0x100] sm:$0xff]   ;;  %v14039_v1 = vld [vmem:[%s17806_s4 + $0x108] sm:$0xff]  }
 0x522   :  { %v9486_v31 = vsel %vm7943_vm3, %v9485_v30, %v9484_v60  ;;  %v9724_v25 = vrot.slane %v9605_v52, 7  ;;  %v8038_v35 = vrot.slane %v7936_v19, 7  ;;  %v9725_v2 = vrot.slane %v9606_v63, 6  ;;  %v14021_v52 = vld [vmem:[%s17806_s4 + $0x38] sm:$0xff]   ;;  %v14040_v18 = vld [vmem:[%s17806_s4 + $0x110] sm:$0xff]   ;;  %v14042_v34 = vld [vmem:[%s17806_s4 + $0x120] sm:$0xff]  }
 0x523   :  { %v17209_v26 = vsel %vm7946_vm4, %v9487_v0, %v9486_v31  ;;  %v9727_v15 = vrot.slane %v9607_v5, 5  ;;  %v8040_v39 = vrot.slane %v7937_v11, 6  ;;  %v9611_v9 = vsel %vm7940_vm2, %v9610_v37, %v9609_v62  ;;  %v14023_v5 = vld [vmem:[%s17806_s4 + $0x88] sm:$0xff]   ;;  %v14044_v30 = vld [vmem:[%s17806_s4 + $0x130] sm:$0xff]   ;;  %v14046_v60 = vld [vmem:[%s17806_s4 + $0x140] sm:$0xff]  }
 0x524   :  { %13051 = vmatpush3.bf16.msra.mxu1 %v14018_v27  ;;  %v9614_v48 = vrot.slane %v9608_v22, 3  ;;  %v9613_v16 = vsel %vm7943_vm3, %v9612_v33, %v9611_v9  ;;  %v9726_v19 = vsel %vm7940_vm2, %v9725_v2, %v9724_v25  ;;  %v9729_v3 = vrot.slane %v9608_v22, 4  ;;  %v14032_v27 = vld [vmem:[%s17806_s4 + $0xd0] sm:$0xff]   ;;  %v14043_v12 = vld [vmem:[%s17806_s4 + $0x128] sm:$0xff]   ;;  %v14050_v31 = vld [vmem:[%s17806_s4 + $0x160] sm:$0xff]  }
 0x525   :  { %13052 = vmatprep.subr.bf16.mxu1 %v14134_v38  ;;  %v9728_v7 = vsel %vm7943_vm3, %v9727_v15, %v9726_v19  ;;  %v8039_v11 = vsel %vm7940_vm2, %v8038_v35, %v7935_v47  ;;  %v8042_v44 = vrot.slane %v7938_v49, 5  ;;  %v14025_v49 = vld [vmem:[%s17806_s4 + $0x98] sm:$0xff]   ;;  %v8169_v4 = vpack.c.b16 %v17109_v21, %v17109_v21  ;;  %v14047_v22 = vld [vmem:[%s17806_s4 + $0x148] sm:$0xff]   ;;  %v14048_v62 = vld [vmem:[%s17806_s4 + $0x150] sm:$0xff]  }
 0x526   :  { %v17223_v43 = vsel %vm7946_vm4, %v9614_v48, %v9613_v16  ;;  %v17230_v63 = vsel %vm7946_vm4, %v9729_v3, %v9728_v7  ;;  %v8041_v36 = vsel %vm7943_vm3, %v8040_v39, %v8039_v11  ;;  %v14033_v21 = vld [vmem:[%s17806_s4 + $0xd8] sm:$0xff]   ;;  %v8283_v29 = vpack.c.b16 %v17116_v8, %v17116_v8  ;;  %v14051_v37 = vld [vmem:[%s17806_s4 + $0x168] sm:$0xff]   ;;  %v14052_v33 = vld [vmem:[%s17806_s4 + $0x170] sm:$0xff]  }
 0x527   :  { %v8043_v41 = vsel %vm7946_vm4, %v8042_v44, %v8041_v36  ;;  %v14041_v8 = vld [vmem:[%s17806_s4 + $0x118] sm:$0xff]   ;;  %v8410_v0 = vpack.c.b16 %v17124_v20, %v17124_v20  ;;  %v14054_v35 = vld [vmem:[%s17806_s4 + $0x180] sm:$0xff]   ;;  %v8525_v2 = vpack.c.b16 %v17134_v45, %v17134_v45  ;;  %v14055_v15 = vld [vmem:[%s17806_s4 + $0x188] sm:$0xff]   ;;  %v8652_v3 = vpack.c.b16 %v17144_v42, %v17144_v42 }
 0x528   :  { %13053 = vmatpush3.bf16.msra.mxu1 %v14019_v32  ;;  %v8044_v47 = vpack.c.b16 %v8043_v41, %v8043_v41  ;;  %v14045_v32 = vld [vmem:[%s17806_s4 + $0x138] sm:$0xff]   ;;  %v14056_v39 = vld [vmem:[%s17806_s4 + $0x190] sm:$0xff]   ;;  %v14058_v9 = vld [vmem:[%s17806_s4 + $0x1a0] sm:$0xff]  }
 0x529   :  { %13054 = vmatprep.subr.bf16.mxu1 %v14134_v38  ;;  %v14049_v20 = vld [vmem:[%s17806_s4 + $0x158] sm:$0xff]   ;;  %v14059_v48 = vld [vmem:[%s17806_s4 + $0x1a8] sm:$0xff]   ;;  %v14062_v19 = vld [vmem:[%s17806_s4 + $0x1c0] sm:$0xff]  }
 0x52a   :  { %v14053_v25 = vld [vmem:[%s17806_s4 + $0x178] sm:$0xff]   ;;  %v14063_v7 = vld [vmem:[%s17806_s4 + $0x1c8] sm:$0xff]   ;;  %v14064_v11 = vld [vmem:[%s17806_s4 + $0x1d0] sm:$0xff]  }
 0x52b   :  { %v14057_v45 = vld [vmem:[%s17806_s4 + $0x198] sm:$0xff]   ;;  %v14066_v36 = vld [vmem:[%s17806_s4 + $0x1e0] sm:$0xff]  }
 0x52c   :  { %13055 = vmatpush3.bf16.msra.mxu1 %v14020_v10  ;;  %v14060_v10 = vld [vmem:[%s17806_s4 + $0x1b0] sm:$0xff]   ;;  %v14061_v16 = vld [vmem:[%s17806_s4 + $0x1b8] sm:$0xff]  }
 0x52d   :  { %13056 = vmatprep.subr.bf16.mxu1 %v14134_v38  ;;  %v14065_v42 = vld [vmem:[%s17806_s4 + $0x1d8] sm:$0xff]  }
 0x530   :  { %13057 = vmatpush3.bf16.msra.mxu1 %v14021_v52  ;;  %v14067_v52 = vld [vmem:[%s17806_s4 + $0x1e8] sm:$0xff]  }
 0x531   :  { %13062 = vmatprep.subr.bf16.mxu1 %v14134_v38 }
 0x533   :  { %13059 = vmatmul.mubr.bf16.vlgmr.msra.gmra.mrb[20].mxu1 %v8044_v47  ;;  %v14068_v47 = vld [vmem:[%s17806_s4 + $0x1f0] sm:$0xff]  }
 0x534   :  { %13063 = vmatpush3.bf16.msra.mxu1 %v14022_v28  ;;  %13078 = vmatprep.mubr.msk.bf16.mxu1 %vm14135_vm1, %v14134_v38 }
 0x535   :  { %13064 = vmatprep.subr.bf16.mxu1 %v14134_v38 }
 0x538   :  { %13065 = vmatpush3.bf16.msra.mxu1 %v14023_v5 }
 0x539   :  { %13066 = vmatprep.subr.bf16.mxu1 %v14134_v38 }
 0x53c   :  { %13067 = vmatpush3.bf16.msra.mxu1 %v14024_v51  ;;  %v14069_v51 = vld [vmem:[%s17806_s4 + $0x1f8] sm:$0xff]  }
 0x53d   :  { %13068 = vmatprep.subr.bf16.mxu1 %v14134_v38 }
 0x540   :  { %13069 = vmatpush3.bf16.msra.mxu1 %v14025_v49  ;;  %v14070_v49 = vld [vmem:[%s17806_s4 + $0x200] sm:$0xff]  }
 0x541   :  { %13070 = vmatprep.subr.bf16.mxu1 %v14134_v38 }
 0x544   :  { %13071 = vmatpush3.bf16.msra.mxu1 %v14026_v40  ;;  %v8767_v40 = vpack.c.b16 %v17153_v13, %v17153_v13  ;;  %v14073_v13 = vld [vmem:[%s17806_s4 + $0x218] sm:$0xff]  }
 0x545   :  { %13072 = vmatprep.subr.bf16.mxu1 %v14134_v38 }
 0x548   :  { %13073 = vmatpush3.bf16.msra.mxu1 %v14027_v54  ;;  %v14071_v54 = vld [vmem:[%s17806_s4 + $0x208] sm:$0xff]  }
 0x549   :  { %13074 = vmatprep.subr.bf16.mxu1 %v14134_v38 }
 0x54c   :  { %13075 = vmatpush3.bf16.msra.mxu1 %v14028_v17  ;;  %v14072_v17 = vld [vmem:[%s17806_s4 + $0x210] sm:$0xff]  }
 0x54d   :  { %13076 = vmatprep.subr.bf16.mxu1 %v14134_v38 }
 0x550   :  { %13077 = vmatpush3.bf16.msra.mxu1 %v14029_v14  ;;  %v14074_v14 = vld [vmem:[%s17806_s4 + $0x220] sm:$0xff]  }
 0x551   :  { %13082 = vmatprep.subr.bf16.mxu1 %v14134_v38 }
 0x553   :  { %13079 = vmatmul.mubr.bf16.vlgmr.msra.gmra.mrb[24].mxu1 %v8169_v4 }
 0x554   :  { %13083 = vmatpush3.bf16.msra.mxu1 %v14030_v55  ;;  %13098 = vmatprep.mubr.msk.bf16.mxu1 %vm14135_vm1, %v14134_v38  ;;  %v14075_v55 = vld [vmem:[%s17806_s4 + $0x228] sm:$0xff]  }
 0x555   :  { %13084 = vmatprep.subr.bf16.mxu1 %v14134_v38 }
 0x558   :  { %13085 = vmatpush3.bf16.msra.mxu1 %v14031_v61 }
 0x559   :  { %13086 = vmatprep.subr.bf16.mxu1 %v14134_v38 }
 0x55c   :  { %13087 = vmatpush3.bf16.msra.mxu1 %v14032_v27 }
 0x55d   :  { %13088 = vmatprep.subr.bf16.mxu1 %v14134_v38 }
 0x560   :  { %13089 = vmatpush3.bf16.msra.mxu1 %v14033_v21 }
 0x561   :  { %13090 = vmatprep.subr.bf16.mxu1 %v14134_v38 }
 0x564   :  { %13091 = vmatpush3.bf16.msra.mxu1 %v14034_v53  ;;  %v14076_v53 = vld [vmem:[%s17806_s4 + $0x230] sm:$0xff]  }
 0x565   :  { %13092 = vmatprep.subr.bf16.mxu1 %v14134_v38 }
 0x568   :  { %13093 = vmatpush3.bf16.msra.mxu1 %v14035_v56 }
 0x569   :  { %13094 = vmatprep.subr.bf16.mxu1 %v14134_v38 }
 0x56c   :  { %13095 = vmatpush3.bf16.msra.mxu1 %v14036_v50  ;;  %v14077_v50 = vld [vmem:[%s17806_s4 + $0x238] sm:$0xff]  }
 0x56d   :  { %13096 = vmatprep.subr.bf16.mxu1 %v14134_v38 }
 0x570   :  { %13097 = vmatpush3.bf16.msra.mxu1 %v14037_v57  ;;  %v14078_v57 = vld [vmem:[%s17806_s4 + $0x240] sm:$0xff]  }
 0x571   :  { %13102 = vmatprep.subr.bf16.mxu1 %v14134_v38 }
 0x573   :  { %13099 = vmatmul.mubr.bf16.vlgmr.msra.gmra.mrb[28].mxu1 %v8283_v29  ;;  %v14079_v29 = vld [vmem:[%s17806_s4 + $0x248] sm:$0xff]  }
 0x574   :  { %13103 = vmatpush3.bf16.msra.mxu1 %v14038_v58  ;;  %13118 = vmatprep.mubr.msk.bf16.mxu1 %vm14135_vm1, %v14134_v38  ;;  %v8893_v58 = vpack.c.b16 %v17164_v23, %v17164_v23  ;;  %v14081_v23 = vld [vmem:[%s17806_s4 + $0x258] sm:$0xff]  }
 0x575   :  { %13104 = vmatprep.subr.bf16.mxu1 %v14134_v38 }
 0x578   :  { %13105 = vmatpush3.bf16.msra.mxu1 %v14039_v1  ;;  %v14080_v1 = vld [vmem:[%s17806_s4 + $0x250] sm:$0xff]  }
 0x579   :  { %13106 = vmatprep.subr.bf16.mxu1 %v14134_v38 }
 0x57c   :  { %13107 = vmatpush3.bf16.msra.mxu1 %v14040_v18  ;;  %v14082_v18 = vld [vmem:[%s17806_s4 + $0x260] sm:$0xff]  }
 0x57d   :  { %13108 = vmatprep.subr.bf16.mxu1 %v14134_v38 }
 0x580   :  { %13109 = vmatpush3.bf16.msra.mxu1 %v14041_v8  ;;  %v14083_v8 = vld [vmem:[%s17806_s4 + $0x268] sm:$0xff]  }
 0x581   :  { %13110 = vmatprep.subr.bf16.mxu1 %v14134_v38 }
 0x584   :  { %13111 = vmatpush3.bf16.msra.mxu1 %v14042_v34 }
 0x585   :  { %13112 = vmatprep.subr.bf16.mxu1 %v14134_v38 }
 0x588   :  { %13113 = vmatpush3.bf16.msra.mxu1 %v14043_v12 }
 0x589   :  { %13114 = vmatprep.subr.bf16.mxu1 %v14134_v38 }
 0x58c   :  { %13115 = vmatpush3.bf16.msra.mxu1 %v14044_v30 }
 0x58d   :  { %13116 = vmatprep.subr.bf16.mxu1 %v14134_v38 }
 0x590   :  { %13117 = vmatpush3.bf16.msra.mxu1 %v14045_v32 }
 0x591   :  { %13122 = vmatprep.subr.bf16.mxu1 %v14134_v38 }
 0x593   :  { %13119 = vmatmul.mubr.bf16.vlgmr.msra.gmra.mrb[32].mxu1 %v8410_v0 }
 0x594   :  { %13123 = vmatpush3.bf16.msra.mxu1 %v14046_v60  ;;  %13138 = vmatprep.mubr.msk.bf16.mxu1 %vm14135_vm1, %v14134_v38  ;;  %v14084_v60 = vld [vmem:[%s17806_s4 + $0x270] sm:$0xff]  }
 0x595   :  { %13124 = vmatprep.subr.bf16.mxu1 %v14134_v38 }
 0x598   :  { %13125 = vmatpush3.bf16.msra.mxu1 %v14047_v22  ;;  %v14085_v22 = vld [vmem:[%s17806_s4 + $0x278] sm:$0xff]  }
 0x599   :  { %13126 = vmatprep.subr.bf16.mxu1 %v14134_v38 }
 0x59c   :  { %13127 = vmatpush3.bf16.msra.mxu1 %v14048_v62  ;;  %v14086_v62 = vld [vmem:[%s17806_s4 + $0x280] sm:$0xff]  }
 0x59d   :  { %13128 = vmatprep.subr.bf16.mxu1 %v14134_v38 }
 0x5a0   :  { %13129 = vmatpush3.bf16.msra.mxu1 %v14049_v20  ;;  %v9007_v20 = vpack.c.b16 %v17169_v24, %v17169_v24  ;;  %v14089_v24 = vld [vmem:[%s17806_s4 + $0x298] sm:$0xff]  }
 0x5a1   :  { %13130 = vmatprep.subr.bf16.mxu1 %v14134_v38 }
 0x5a4   :  { %13131 = vmatpush3.bf16.msra.mxu1 %v14050_v31  ;;  %v14087_v31 = vld [vmem:[%s17806_s4 + $0x288] sm:$0xff]  }
 0x5a5   :  { %13132 = vmatprep.subr.bf16.mxu1 %v14134_v38 }
 0x5a8   :  { %13133 = vmatpush3.bf16.msra.mxu1 %v14051_v37  ;;  %v14088_v37 = vld [vmem:[%s17806_s4 + $0x290] sm:$0xff]  }
 0x5a9   :  { %13134 = vmatprep.subr.bf16.mxu1 %v14134_v38 }
 0x5ac   :  { %13135 = vmatpush3.bf16.msra.mxu1 %v14052_v33  ;;  %v14090_v33 = vld [vmem:[%s17806_s4 + $0x2a0] sm:$0xff]  }
 0x5ad   :  { %13136 = vmatprep.subr.bf16.mxu1 %v14134_v38 }
 0x5b0   :  { %13137 = vmatpush3.bf16.msra.mxu1 %v14053_v25  ;;  %v14091_v25 = vld [vmem:[%s17806_s4 + $0x2a8] sm:$0xff]  }
 0x5b1   :  { %13142 = vmatprep.subr.bf16.mxu1 %v14134_v38 }
 0x5b3   :  { %13139 = vmatmul.mubr.bf16.vlgmr.msra.gmra.mrb[36].mxu1 %v8525_v2 }
 0x5b4   :  { %13143 = vmatpush3.bf16.msra.mxu1 %v14054_v35  ;;  %13158 = vmatprep.mubr.msk.bf16.mxu1 %vm14135_vm1, %v14134_v38 }
 0x5b5   :  { %13144 = vmatprep.subr.bf16.mxu1 %v14134_v38 }
 0x5b8   :  { %13145 = vmatpush3.bf16.msra.mxu1 %v14055_v15 }
 0x5b9   :  { %13146 = vmatprep.subr.bf16.mxu1 %v14134_v38 }
 0x5bc   :  { %13147 = vmatpush3.bf16.msra.mxu1 %v14056_v39 }
 0x5bd   :  { %13148 = vmatprep.subr.bf16.mxu1 %v14134_v38 }
 0x5c0   :  { %13149 = vmatpush3.bf16.msra.mxu1 %v14057_v45  ;;  %v14092_v45 = vld [vmem:[%s17806_s4 + $0x2b0] sm:$0xff]  }
 0x5c1   :  { %13150 = vmatprep.subr.bf16.mxu1 %v14134_v38 }
 0x5c4   :  { %13151 = vmatpush3.bf16.msra.mxu1 %v14058_v9 }
 0x5c5   :  { %13152 = vmatprep.subr.bf16.mxu1 %v14134_v38 }
 0x5c8   :  { %13153 = vmatpush3.bf16.msra.mxu1 %v14059_v48  ;;  %v14093_v48 = vld [vmem:[%s17806_s4 + $0x2b8] sm:$0xff]  }
 0x5c9   :  { %13154 = vmatprep.subr.bf16.mxu1 %v14134_v38 }
 0x5cc   :  { %13155 = vmatpush3.bf16.msra.mxu1 %v14060_v10  ;;  %v14094_v10 = vld [vmem:[%s17806_s4 + $0x2c0] sm:$0xff]  }
 0x5cd   :  { %13156 = vmatprep.subr.bf16.mxu1 %v14134_v38 }
 0x5d0   :  { %13157 = vmatpush3.bf16.msra.mxu1 %v14061_v16  ;;  %v9133_v16 = vpack.c.b16 %v17185_v59, %v17185_v59  ;;  %v14097_v59 = vld [vmem:[%s17806_s4 + $0x2d8] sm:$0xff]  }
 0x5d1   :  { %13162 = vmatprep.subr.bf16.mxu1 %v14134_v38 }
 0x5d3   :  { %13159 = vmatmul.mubr.bf16.vlgmr.msra.gmra.mrb[40].mxu1 %v8652_v3  ;;  %v14096_v3 = vld [vmem:[%s17806_s4 + $0x2d0] sm:$0xff]  }
 0x5d4   :  { %13163 = vmatpush3.bf16.msra.mxu1 %v14062_v19  ;;  %13178 = vmatprep.mubr.msk.bf16.mxu1 %vm14135_vm1, %v14134_v38  ;;  %v14095_v19 = vld [vmem:[%s17806_s4 + $0x2c8] sm:$0xff]  }
 0x5d5   :  { %13164 = vmatprep.subr.bf16.mxu1 %v14134_v38 }
 0x5d8   :  { %13165 = vmatpush3.bf16.msra.mxu1 %v14063_v7  ;;  %v14098_v7 = vld [vmem:[%s17806_s4 + $0x2e0] sm:$0xff]  }
 0x5d9   :  { %13166 = vmatprep.subr.bf16.mxu1 %v14134_v38 }
 0x5dc   :  { %13167 = vmatpush3.bf16.msra.mxu1 %v14064_v11  ;;  %v14099_v11 = vld [vmem:[%s17806_s4 + $0x2e8] sm:$0xff]  }
 0x5dd   :  { %13168 = vmatprep.subr.bf16.mxu1 %v14134_v38 }
 0x5e0   :  { %13169 = vmatpush3.bf16.msra.mxu1 %v14065_v42 }
 0x5e1   :  { %13170 = vmatprep.subr.bf16.mxu1 %v14134_v38 }
 0x5e4   :  { %13171 = vmatpush3.bf16.msra.mxu1 %v14066_v36 }
 0x5e5   :  { %13172 = vmatprep.subr.bf16.mxu1 %v14134_v38 }
 0x5e6   :  { %v8032_v44 = vpop.f32.mrb[16].mxu1 }
 0x5e7   :  { %v13040_v41 = vpop.f32.mrb[17].mxu1 }
 0x5e8   :  { %13173 = vmatpush3.bf16.msra.mxu1 %v14067_v52  ;;  %v8035_v28 = vpop.f32.mrb[18].mxu1  ;;  %v14100_v41 = vld [vmem:[%s17806_s4 + $0x2f0] sm:$0xff]  }
 0x5e9   :  { %v13041_v5 = vpop.f32.mrb[19].mxu1  ;;  %13174 = vmatprep.subr.bf16.mxu1 %v14134_v38 }
 0x5ea   :  { %v14102_v5 = vld [vmem:[%s17806_s4 + $0x300] sm:$0xff]  }
 0x5ec   :  { %13175 = vmatpush3.bf16.msra.mxu1 %v14068_v47  ;;  %v14101_v47 = vld [vmem:[%s17806_s4 + $0x2f8] sm:$0xff]  }
 0x5ed   :  { %13176 = vmatprep.subr.bf16.mxu1 %v14134_v38 }
 0x5f0   :  { %13177 = vmatpush3.bf16.msra.mxu1 %v14069_v51  ;;  %v9247_v51 = vpack.c.b16 %v17190_v6, %v17190_v6  ;;  %v14105_v6 = vld [vmem:[%s17806_s4 + $0x318] sm:$0xff]  }
 0x5f1   :  { %13182 = vmatprep.subr.bf16.mxu1 %v14134_v38 }
 0x5f3   :  { %13179 = vmatmul.mubr.bf16.vlgmr.msra.gmra.mrb[44].mxu1 %v8767_v40  ;;  %v14104_v40 = vld [vmem:[%s17806_s4 + $0x310] sm:$0xff]  }
 0x5f4   :  { %13183 = vmatpush3.bf16.msra.mxu1 %v14070_v49  ;;  %13198 = vmatprep.mubr.msk.bf16.mxu1 %vm14135_vm1, %v14134_v38  ;;  %v14103_v49 = vld [vmem:[%s17806_s4 + $0x308] sm:$0xff]  }
 0x5f5   :  { %13184 = vmatprep.subr.bf16.mxu1 %v14134_v38 }
 0x5f8   :  { %13185 = vmatpush3.bf16.msra.mxu1 %v14071_v54  ;;  %v14106_v54 = vld [vmem:[%s17806_s4 + $0x320] sm:$0xff]  }
 0x5f9   :  { %13186 = vmatprep.subr.bf16.mxu1 %v14134_v38 }
 0x5fc   :  { %13187 = vmatpush3.bf16.msra.mxu1 %v14072_v17  ;;  %v14107_v17 = vld [vmem:[%s17806_s4 + $0x328] sm:$0xff]  }
 0x5fd   :  { %13188 = vmatprep.subr.bf16.mxu1 %v14134_v38 }
 0x600   :  { %13189 = vmatpush3.bf16.msra.mxu1 %v14073_v13 }
 0x601   :  { %13190 = vmatprep.subr.bf16.mxu1 %v14134_v38 }
 0x604   :  { %13191 = vmatpush3.bf16.msra.mxu1 %v14074_v14 }
 0x605   :  { %13192 = vmatprep.subr.bf16.mxu1 %v14134_v38 }
 0x606   :  { %v8128_v4 = vpop.f32.mrb[20].mxu1 }
 0x607   :  { %v8129_v61 = vadd.f32 %v8128_v4, %v8032_v44  ;;  %v13060_v27 = vpop.f32.mrb[21].mxu1 }
 0x608   :  { %v8131_v21 = vpop.f32.mrb[22].mxu1  ;;  %13193 = vmatpush3.bf16.msra.mxu1 %v14075_v55 }
 0x609   :  { %v13061_v56 = vpop.f32.mrb[23].mxu1  ;;  %13194 = vmatprep.subr.bf16.mxu1 %v14134_v38  ;;  %v14109_v21 = vld [vmem:[%s17806_s4 + $0x338] sm:$0xff]  }
 0x60a   :  { %v9374_v56 = vpack.c.b16 %v17196_v46, %v17196_v46  ;;  %v14113_v46 = vld [vmem:[%s17806_s4 + $0x358] sm:$0xff]  }
 0x60c   :  { %13195 = vmatpush3.bf16.msra.mxu1 %v14076_v53  ;;  %v14110_v53 = vld [vmem:[%s17806_s4 + $0x340] sm:$0xff]  }
 0x60d   :  { %13196 = vmatprep.subr.bf16.mxu1 %v14134_v38 }
 0x610   :  { %13197 = vmatpush3.bf16.msra.mxu1 %v14077_v50  ;;  %v14111_v50 = vld [vmem:[%s17806_s4 + $0x348] sm:$0xff]  }
 0x611   :  { %13202 = vmatprep.subr.bf16.mxu1 %v14134_v38 }
 0x613   :  { %13199 = vmatmul.mubr.bf16.vlgmr.msra.gmra.mrb[48].mxu1 %v8893_v58  ;;  %v14114_v58 = vld [vmem:[%s17806_s4 + $0x360] sm:$0xff]  }
 0x614   :  { %13203 = vmatpush3.bf16.msra.mxu1 %v14078_v57  ;;  %13218 = vmatprep.mubr.msk.bf16.mxu1 %vm14135_vm1, %v14134_v38  ;;  %v14112_v57 = vld [vmem:[%s17806_s4 + $0x350] sm:$0xff]  }
 0x615   :  { %13204 = vmatprep.subr.bf16.mxu1 %v14134_v38 }
 0x618   :  { %13205 = vmatpush3.bf16.msra.mxu1 %v14079_v29  ;;  %v14115_v29 = vld [vmem:[%s17806_s4 + $0x368] sm:$0xff]  }
 0x619   :  { %13206 = vmatprep.subr.bf16.mxu1 %v14134_v38 }
 0x61c   :  { %13207 = vmatpush3.bf16.msra.mxu1 %v14080_v1 }
 0x61d   :  { %13208 = vmatprep.subr.bf16.mxu1 %v14134_v38 }
 0x620   :  { %13209 = vmatpush3.bf16.msra.mxu1 %v14081_v23 }
 0x621   :  { %13210 = vmatprep.subr.bf16.mxu1 %v14134_v38 }
 0x624   :  { %13211 = vmatpush3.bf16.msra.mxu1 %v14082_v18 }
 0x625   :  { %13212 = vmatprep.subr.bf16.mxu1 %v14134_v38 }
 0x626   :  { %v8253_v34 = vpop.f32.mrb[24].mxu1 }
 0x627   :  { %v8259_v12 = vadd.f32 %v8253_v34, %v8129_v61  ;;  %v13080_v30 = vpop.f32.mrb[25].mxu1  ;;  %v14108_v61 = vld [vmem:[%s17806_s4 + $0x330] sm:$0xff]  }
 0x628   :  { %v8256_v32 = vpop.f32.mrb[26].mxu1  ;;  %13213 = vmatpush3.bf16.msra.mxu1 %v14083_v8  ;;  %v14116_v34 = vld [vmem:[%s17806_s4 + $0x370] sm:$0xff]   ;;  %v14117_v30 = vld [vmem:[%s17806_s4 + $0x378] sm:$0xff]  }
 0x629   :  { %v13081_v0 = vpop.f32.mrb[27].mxu1  ;;  %13214 = vmatprep.subr.bf16.mxu1 %v14134_v38  ;;  %v14118_v32 = vld [vmem:[%s17806_s4 + $0x380] sm:$0xff]  }
 0x62a   :  { %v14119_v0 = vld [vmem:[%s17806_s4 + $0x388] sm:$0xff]  }
 0x62c   :  { %13215 = vmatpush3.bf16.msra.mxu1 %v14084_v60  ;;  %v9489_v60 = vpack.c.b16 %v17209_v26, %v17209_v26  ;;  %v14121_v26 = vld [vmem:[%s17806_s4 + $0x398] sm:$0xff]  }
 0x62d   :  { %13216 = vmatprep.subr.bf16.mxu1 %v14134_v38 }
 0x630   :  { %13217 = vmatpush3.bf16.msra.mxu1 %v14085_v22  ;;  %v14120_v22 = vld [vmem:[%s17806_s4 + $0x390] sm:$0xff]  }
 0x631   :  { %13222 = vmatprep.subr.bf16.mxu1 %v14134_v38 }
 0x633   :  { %13219 = vmatmul.mubr.bf16.vlgmr.msra.gmra.mrb[52].mxu1 %v9007_v20  ;;  %v14123_v20 = vld [vmem:[%s17806_s4 + $0x3a8] sm:$0xff]  }
 0x634   :  { %13223 = vmatpush3.bf16.msra.mxu1 %v14086_v62  ;;  %13238 = vmatprep.mubr.msk.bf16.mxu1 %vm14135_vm1, %v14134_v38  ;;  %v14122_v62 = vld [vmem:[%s17806_s4 + $0x3a0] sm:$0xff]  }
 0x635   :  { %13224 = vmatprep.subr.bf16.mxu1 %v14134_v38 }
 0x638   :  { %13225 = vmatpush3.bf16.msra.mxu1 %v14087_v31 }
 0x639   :  { %13226 = vmatprep.subr.bf16.mxu1 %v14134_v38 }
 0x63c   :  { %13227 = vmatpush3.bf16.msra.mxu1 %v14088_v37 }
 0x63d   :  { %13228 = vmatprep.subr.bf16.mxu1 %v14134_v38 }
 0x640   :  { %13229 = vmatpush3.bf16.msra.mxu1 %v14089_v24 }
 0x641   :  { %13230 = vmatprep.subr.bf16.mxu1 %v14134_v38 }
 0x644   :  { %13231 = vmatpush3.bf16.msra.mxu1 %v14090_v33 }
 0x645   :  { %13232 = vmatprep.subr.bf16.mxu1 %v14134_v38 }
 0x646   :  { %v8367_v35 = vpop.f32.mrb[28].mxu1 }
 0x647   :  { %v8373_v2 = vadd.f32 %v8367_v35, %v8259_v12  ;;  %v13100_v15 = vpop.f32.mrb[29].mxu1 }
 0x648   :  { %v8370_v39 = vpop.f32.mrb[30].mxu1  ;;  %13233 = vmatpush3.bf16.msra.mxu1 %v14091_v25  ;;  %v14124_v25 = vld [vmem:[%s17806_s4 + $0x3b0] sm:$0xff]   ;;  %v14126_v15 = vld [vmem:[%s17806_s4 + $0x3c0] sm:$0xff]  }
 0x649   :  { %v13101_v9 = vpop.f32.mrb[31].mxu1  ;;  %13234 = vmatprep.subr.bf16.mxu1 %v14134_v38  ;;  %v9616_v39 = vpack.c.b16 %v17223_v43, %v17223_v43  ;;  %v14129_v43 = vld [vmem:[%s17806_s4 + $0x3d8] sm:$0xff]  }
 0x64a   :  { %v14128_v9 = vld [vmem:[%s17806_s4 + $0x3d0] sm:$0xff]  }
 0x64c   :  { %13235 = vmatpush3.bf16.msra.mxu1 %v14092_v45  ;;  %v14127_v45 = vld [vmem:[%s17806_s4 + $0x3c8] sm:$0xff]  }
 0x64d   :  { %13236 = vmatprep.subr.bf16.mxu1 %v14134_v38 }
 0x650   :  { %13237 = vmatpush3.bf16.msra.mxu1 %v14093_v48  ;;  %v14130_v48 = vld [vmem:[%s17806_s4 + $0x3e0] sm:$0xff]  }
 0x651   :  { %13242 = vmatprep.subr.bf16.mxu1 %v14134_v38 }
 0x653   :  { %13239 = vmatmul.mubr.bf16.vlgmr.msra.gmra.mrb[56].mxu1 %v9133_v16 }
 0x654   :  { %13243 = vmatpush3.bf16.msra.mxu1 %v14094_v10  ;;  %13258 = vmatprep.mubr.msk.bf16.mxu1 %vm14135_vm1, %v14134_v38  ;;  %v14131_v10 = vld [vmem:[%s17806_s4 + $0x3e8] sm:$0xff]  }
 0x655   :  { %13244 = vmatprep.subr.bf16.mxu1 %v14134_v38 }
 0x658   :  { %13245 = vmatpush3.bf16.msra.mxu1 %v14095_v19 }
 0x659   :  { %13246 = vmatprep.subr.bf16.mxu1 %v14134_v38 }
 0x65c   :  { %13247 = vmatpush3.bf16.msra.mxu1 %v14096_v3 }
 0x65d   :  { %13248 = vmatprep.subr.bf16.mxu1 %v14134_v38 }
 0x660   :  { %13249 = vmatpush3.bf16.msra.mxu1 %v14097_v59 }
 0x661   :  { %13250 = vmatprep.subr.bf16.mxu1 %v14134_v38 }
 0x664   :  { %13251 = vmatpush3.bf16.msra.mxu1 %v14098_v7  ;;  %v14132_v7 = vld [vmem:[%s17806_s4 + $0x3f0] sm:$0xff]  }
 0x665   :  { %13252 = vmatprep.subr.bf16.mxu1 %v14134_v38 }
 0x666   :  { %v8494_v42 = vpop.f32.mrb[32].mxu1 }
 0x667   :  { %v8500_v36 = vadd.f32 %v8494_v42, %v8373_v2  ;;  %v13120_v52 = vpop.f32.mrb[33].mxu1  ;;  %v14125_v2 = vld [vmem:[%s17806_s4 + $0x3b8] sm:$0xff]  }
 0x668   :  { %v8497_v44 = vpop.f32.mrb[34].mxu1  ;;  %13253 = vmatpush3.bf16.msra.mxu1 %v14099_v11  ;;  %v14133_v42 = vld [vmem:[%s17806_s4 + $0x3f8] sm:$0xff]  }
 0x669   :  { %v13121_v28 = vpop.f32.mrb[35].mxu1  ;;  %13254 = vmatprep.subr.bf16.mxu1 %v14134_v38 }
 0x66c   :  { %13255 = vmatpush3.bf16.msra.mxu1 %v14100_v41 }
 0x66d   :  { %13256 = vmatprep.subr.bf16.mxu1 %v14134_v38 }
 0x670   :  { %13257 = vmatpush3.bf16.msra.mxu1 %v14101_v47 }
 0x671   :  { %13262 = vmatprep.subr.bf16.mxu1 %v14134_v38 }
 0x673   :  { %13259 = vmatmul.mubr.bf16.vlgmr.msra.gmra.mrb[60].mxu1 %v9247_v51 }
 0x674   :  { %13263 = vmatpush3.bf16.msra.mxu1 %v14102_v5  ;;  %13278 = vmatprep.mubr.msk.bf16.mxu1 %vm14135_vm1, %v14134_v38 }
 0x675   :  { %13264 = vmatprep.subr.bf16.mxu1 %v14134_v38 }
 0x678   :  { %13265 = vmatpush3.bf16.msra.mxu1 %v14103_v49 }
 0x679   :  { %13266 = vmatprep.subr.bf16.mxu1 %v14134_v38 }
 0x67c   :  { %13267 = vmatpush3.bf16.msra.mxu1 %v14104_v40 }
 0x67d   :  { %13268 = vmatprep.subr.bf16.mxu1 %v14134_v38 }
 0x680   :  { %13269 = vmatpush3.bf16.msra.mxu1 %v14105_v6 }
 0x681   :  { %13270 = vmatprep.subr.bf16.mxu1 %v14134_v38 }
 0x684   :  { %13271 = vmatpush3.bf16.msra.mxu1 %v14106_v54  ;;  %v14136_v54 = vmov 0.0|0.0  }
 0x685   :  { %13272 = vmatprep.subr.bf16.mxu1 %v14134_v38 }
 0x686   :  { %v8609_v13 = vpop.f32.mrb[36].mxu1 }
 0x687   :  { %v8615_v14 = vadd.f32 %v8609_v13, %v8500_v36  ;;  %v13140_v55 = vpop.f32.mrb[37].mxu1  ;;  %v9731_v36 = vpack.c.b16 %v17230_v63, %v17230_v63  ;;  %v9831_v63 = vld [vmem:[%s17808_s6] sm:$0xff] }
 0x688   :  { %v8612_v4 = vpop.f32.mrb[38].mxu1  ;;  %13273 = vmatpush3.bf16.msra.mxu1 %v14107_v17  ;;  %v9833_v17 = vld [vmem:[%s17808_s6 + $0x10] sm:$0xff] }
 0x689   :  { %v13141_v27 = vpop.f32.mrb[39].mxu1  ;;  %13274 = vmatprep.subr.bf16.mxu1 %v14134_v38  ;;  %v9835_v4 = vld [vmem:[%s17808_s6 + $0x20] sm:$0xff] }
 0x68c   :  { %13275 = vmatpush3.bf16.msra.mxu1 %v14108_v61  ;;  %v9836_v61 = vld [vmem:[%s17808_s6 + $0x28] sm:$0xff] }
 0x68d   :  { %13276 = vmatprep.subr.bf16.mxu1 %v14134_v38  ;;  %v13384_v27 = vpack.c.bf16 %v9836_v61, %v9835_v4 }
 0x690   :  { %13277 = vmatpush3.bf16.msra.mxu1 %v14109_v21  ;;  %v9837_v21 = vld [vmem:[%s17808_s6 + $0x30] sm:$0xff] }
 0x691   :  { %13282 = vmatprep.subr.bf16.mxu1 %v14134_v38 }
 0x693   :  { %13279 = vmatmul.mubr.bf16.vlgmr.msra.gmra.mrb[64].mxu1 %v9374_v56 }
 0x694   :  { %13283 = vmatpush3.bf16.msra.mxu1 %v14110_v53  ;;  %13298 = vmatprep.mubr.msk.bf16.mxu1 %vm14135_vm1, %v14134_v38  ;;  %v9838_v53 = vld [vmem:[%s17808_s6 + $0x38] sm:$0xff] }
 0x695   :  { %13284 = vmatprep.subr.bf16.mxu1 %v14134_v38  ;;  %v13387_v56 = vpack.c.bf16 %v9838_v53, %v9837_v21 }
 0x698   :  { %13285 = vmatpush3.bf16.msra.mxu1 %v14111_v50  ;;  %v9839_v50 = vld [vmem:[%s17808_s6 + $0x40] sm:$0xff] }
 0x699   :  { %13286 = vmatprep.subr.bf16.mxu1 %v14134_v38 }
 0x69c   :  { %13287 = vmatpush3.bf16.msra.mxu1 %v14112_v57  ;;  %v9840_v57 = vld [vmem:[%s17808_s6 + $0x48] sm:$0xff] }
 0x69d   :  { %13288 = vmatprep.subr.bf16.mxu1 %v14134_v38 }
 0x6a0   :  { %13289 = vmatpush3.bf16.msra.mxu1 %v14113_v46  ;;  %v13390_v46 = vpack.c.bf16 %v9840_v57, %v9839_v50 }
 0x6a1   :  { %13290 = vmatprep.subr.bf16.mxu1 %v14134_v38 }
 0x6a4   :  { %13291 = vmatpush3.bf16.msra.mxu1 %v14114_v58  ;;  %v9841_v58 = vld [vmem:[%s17808_s6 + $0x50] sm:$0xff] }
 0x6a5   :  { %13292 = vmatprep.subr.bf16.mxu1 %v14134_v38 }
 0x6a6   :  { %v8736_v1 = vpop.f32.mrb[40].mxu1 }
 0x6a7   :  { %v8742_v23 = vadd.f32 %v8736_v1, %v8615_v14  ;;  %v13160_v18 = vpop.f32.mrb[41].mxu1  ;;  %v9834_v14 = vld [vmem:[%s17808_s6 + $0x18] sm:$0xff] }
 0x6a8   :  { %v8739_v8 = vpop.f32.mrb[42].mxu1  ;;  %13293 = vmatpush3.bf16.msra.mxu1 %v14115_v29  ;;  %v13381_v55 = vpack.c.bf16 %v9834_v14, %v9833_v17  ;;  %v9842_v29 = vld [vmem:[%s17808_s6 + $0x58] sm:$0xff] }
 0x6a9   :  { %v13161_v12 = vpop.f32.mrb[43].mxu1  ;;  %13294 = vmatprep.subr.bf16.mxu1 %v14134_v38  ;;  %v13393_v1 = vpack.c.bf16 %v9842_v29, %v9841_v58 }
 0x6ac   :  { %13295 = vmatpush3.bf16.msra.mxu1 %v14116_v34 }
 0x6ad   :  { %13296 = vmatprep.subr.bf16.mxu1 %v14134_v38 }
 0x6b0   :  { %13297 = vmatpush3.bf16.msra.mxu1 %v14117_v30  ;;  %v9843_v30 = vld [vmem:[%s17808_s6 + $0x60] sm:$0xff] }
 0x6b1   :  { %13302 = vmatprep.subr.bf16.mxu1 %v14134_v38 }
 0x6b3   :  { %13299 = vmatmul.mubr.bf16.vlgmr.msra.gmra.mrb[68].mxu1 %v9489_v60  ;;  %v9845_v60 = vld [vmem:[%s17808_s6 + $0x70] sm:$0xff] }
 0x6b4   :  { %13303 = vmatpush3.bf16.msra.mxu1 %v14118_v32  ;;  %13318 = vmatprep.mubr.msk.bf16.mxu1 %vm14135_vm1, %v14134_v38  ;;  %v9844_v32 = vld [vmem:[%s17808_s6 + $0x68] sm:$0xff] }
 0x6b5   :  { %13304 = vmatprep.subr.bf16.mxu1 %v14134_v38 }
 0x6b8   :  { %13305 = vmatpush3.bf16.msra.mxu1 %v14119_v0  ;;  %v13396_v0 = vpack.c.bf16 %v9844_v32, %v9843_v30 }
 0x6b9   :  { %13306 = vmatprep.subr.bf16.mxu1 %v14134_v38 }
 0x6bc   :  { %13307 = vmatpush3.bf16.msra.mxu1 %v14120_v22  ;;  %v9846_v22 = vld [vmem:[%s17808_s6 + $0x78] sm:$0xff] }
 0x6bd   :  { %13308 = vmatprep.subr.bf16.mxu1 %v14134_v38 }
 0x6c0   :  { %13309 = vmatpush3.bf16.msra.mxu1 %v14121_v26  ;;  %v13399_v26 = vpack.c.bf16 %v9846_v22, %v9845_v60 }
 0x6c1   :  { %13310 = vmatprep.subr.bf16.mxu1 %v14134_v38 }
 0x6c4   :  { %13311 = vmatpush3.bf16.msra.mxu1 %v14122_v62 }
 0x6c5   :  { %13312 = vmatprep.subr.bf16.mxu1 %v14134_v38 }
 0x6c6   :  { %v8851_v31 = vpop.f32.mrb[44].mxu1 }
 0x6c7   :  { %v8857_v37 = vadd.f32 %v8851_v31, %v8742_v23  ;;  %v13180_v24 = vpop.f32.mrb[45].mxu1 }
 0x6c8   :  { %v8854_v33 = vpop.f32.mrb[46].mxu1  ;;  %13313 = vmatpush3.bf16.msra.mxu1 %v14123_v20 }
 0x6c9   :  { %v13181_v35 = vpop.f32.mrb[47].mxu1  ;;  %13314 = vmatprep.subr.bf16.mxu1 %v14134_v38 }
 0x6cc   :  { %13315 = vmatpush3.bf16.msra.mxu1 %v14124_v25 }
 0x6cd   :  { %13316 = vmatprep.subr.bf16.mxu1 %v14134_v38 }
 0x6d0   :  { %13317 = vmatpush3.bf16.msra.mxu1 %v14125_v2 }
 0x6d1   :  { %13322 = vmatprep.subr.bf16.mxu1 %v14134_v38 }
 0x6d3   :  { %13319 = vmatmul.mubr.bf16.vlgmr.msra.gmra.mrb[72].mxu1 %v9616_v39 }
 0x6d4   :  { %13323 = vmatpush3.bf16.msra.mxu1 %v14126_v15  ;;  %13338 = vmatprep.mubr.msk.bf16.mxu1 %vm14135_vm1, %v14134_v38 }
 0x6d5   :  { %13324 = vmatprep.subr.bf16.mxu1 %v14134_v38 }
 0x6d8   :  { %13325 = vmatpush3.bf16.msra.mxu1 %v14127_v45 }
 0x6d9   :  { %13326 = vmatprep.subr.bf16.mxu1 %v14134_v38 }
 0x6dc   :  { %13327 = vmatpush3.bf16.msra.mxu1 %v14128_v9 }
 0x6dd   :  { %13328 = vmatprep.subr.bf16.mxu1 %v14134_v38 }
 0x6e0   :  { %13329 = vmatpush3.bf16.msra.mxu1 %v14129_v43 }
 0x6e1   :  { %13330 = vmatprep.subr.bf16.mxu1 %v14134_v38 }
 0x6e4   :  { %13331 = vmatpush3.bf16.msra.mxu1 %v14130_v48 }
 0x6e5   :  { %13332 = vmatprep.subr.bf16.mxu1 %v14134_v38 }
 0x6e6   :  { %v8977_v16 = vpop.f32.mrb[48].mxu1 }
 0x6e7   :  { %v8983_v19 = vadd.f32 %v8977_v16, %v8857_v37  ;;  %v13200_v3 = vpop.f32.mrb[49].mxu1  ;;  %v11419_v16 = vld [vmem:[%s17809_s5] ss:$0 sm:$0xff] }
 0x6e8   :  { %v8980_v59 = vpop.f32.mrb[50].mxu1  ;;  %13333 = vmatpush3.bf16.msra.mxu1 %v14131_v10 }
 0x6e9   :  { %v13201_v11 = vpop.f32.mrb[51].mxu1  ;;  %13334 = vmatprep.subr.bf16.mxu1 %v14134_v38 }
 0x6ec   :  { %13335 = vmatpush3.bf16.msra.mxu1 %v14132_v7 }
 0x6ed   :  { %13336 = vmatprep.subr.bf16.mxu1 %v14134_v38 }
 0x6f0   :  { %13337 = vmatpush3.bf16.msra.mxu1 %v14133_v42 }
 0x6f1   :  { %13377 = vmatprep.subr.bf16.mxu1 %v14136_v54 }
 0x6f3   :  { %13339 = vmatmul.mubr.bf16.vlgmr.msra.gmra.mrb[76].mxu1 %v9731_v36  ;;  %v11420_v36 = vld [vmem:[%s17810_s7] ss:$0 sm:$0xff] }
 0x6f4   :  { %13374 = vmatprep.mubr.msk.f32.mxu1 %vm14135_vm1, %v14134_v38  ;;  %v9832_v38 = vld [vmem:[%s17808_s6 + $0x8] sm:$0xff] }
 0x6f5   :  { %v13378_v13 = vpack.c.bf16 %v9832_v38, %v9831_v63 }
 0x6f7   :  { %13379 = vmatpush3.bf16.msra.mxu1 %v13378_v13 }
 0x6f8   :  { %13380 = vmatprep.subr.bf16.mxu1 %v14136_v54 }
 0x6fb   :  { %13382 = vmatpush3.bf16.msra.mxu1 %v13381_v55 }
 0x6fc   :  { %13383 = vmatprep.subr.bf16.mxu1 %v14136_v54 }
 0x6ff   :  { %13385 = vmatpush3.bf16.msra.mxu1 %v13384_v27 }
 0x700   :  { %13386 = vmatprep.subr.bf16.mxu1 %v14136_v54 }
 0x703   :  { %13388 = vmatpush3.bf16.msra.mxu1 %v13387_v56 }
 0x704   :  { %13389 = vmatprep.subr.bf16.mxu1 %v14136_v54 }
 0x706   :  { %v9091_v52 = vpop.f32.mrb[52].mxu1 }
 0x707   :  { %v9097_v44 = vadd.f32 %v9091_v52, %v8983_v19  ;;  %v13220_v41 = vpop.f32.mrb[53].mxu1  ;;  %13391 = vmatpush3.bf16.msra.mxu1 %v13390_v46 }
 0x708   :  { %v9094_v28 = vpop.f32.mrb[54].mxu1  ;;  %13392 = vmatprep.subr.bf16.mxu1 %v14136_v54 }
 0x709   :  { %v13221_v47 = vpop.f32.mrb[55].mxu1 }
 0x70a   :  { %v9924_v47 = vlaneseq }
 0x70b   :  { %13394 = vmatpush3.bf16.msra.mxu1 %v13393_v1 }
 0x70c   :  { %13395 = vmatprep.subr.bf16.mxu1 %v14136_v54 }
 0x70f   :  { %13397 = vmatpush3.bf16.msra.mxu1 %v13396_v0 }
 0x710   :  { %13398 = vmatprep.subr.bf16.mxu1 %v14136_v54 }
 0x713   :  { %13400 = vmatpush3.bf16.msra.mxu1 %v13399_v26 }
 0x726   :  { %v9217_v5 = vpop.f32.mrb[56].mxu1 }
 0x727   :  { %v9223_v51 = vadd.f32 %v9217_v5, %v9097_v44  ;;  %v13240_v49 = vpop.f32.mrb[57].mxu1  ;;  %v9925_v5 = vand.u32 127, %v9924_v47 }
 0x728   :  { %v9220_v40 = vpop.f32.mrb[58].mxu1 }
 0x729   :  { %v13241_v6 = vpop.f32.mrb[59].mxu1 }
 0x746   :  { %v9331_v23 = vpop.f32.mrb[60].mxu1 }
 0x747   :  { %v9337_v18 = vadd.f32 %v9331_v23, %v9223_v51  ;;  %v13260_v8 = vpop.f32.mrb[61].mxu1 }
 0x748   :  { %v9334_v34 = vpop.f32.mrb[62].mxu1 }
 0x749   :  { %v13261_v12 = vpop.f32.mrb[63].mxu1 }
 0x766   :  { %v9458_v62 = vpop.f32.mrb[64].mxu1 }
 0x767   :  { %v9464_v20 = vadd.f32 %v9458_v62, %v9337_v18  ;;  %v13280_v31 = vpop.f32.mrb[65].mxu1 }
 0x768   :  { %v9461_v37 = vpop.f32.mrb[66].mxu1 }
 0x769   :  { %v13281_v24 = vpop.f32.mrb[67].mxu1 }
 0x786   :  { %v9573_v33 = vpop.f32.mrb[68].mxu1 }
 0x787   :  { %v9579_v25 = vadd.f32 %v9573_v33, %v9464_v20  ;;  %v13300_v35 = vpop.f32.mrb[69].mxu1 }
 0x788   :  { %v9576_v2 = vpop.f32.mrb[70].mxu1 }
 0x789   :  { %v13301_v15 = vpop.f32.mrb[71].mxu1 }
 0x7a6   :  { %v9700_v39 = vpop.f32.mrb[72].mxu1 }
 0x7a7   :  { %v9706_v45 = vadd.f32 %v9700_v39, %v9579_v25  ;;  %v13320_v9 = vpop.f32.mrb[73].mxu1 }
 0x7a8   :  { %v9703_v43 = vpop.f32.mrb[74].mxu1 }
 0x7a9   :  { %v13321_v48 = vpop.f32.mrb[75].mxu1 }
 0x7c6   :  { %v9815_v10 = vpop.f32.mrb[76].mxu1 }
 0x7c7   :  { %v9821_v19 = vadd.f32 %v9815_v10, %v9706_v45  ;;  %v13340_v3 = vpop.f32.mrb[77].mxu1 }
 0x7c8   :  { %v9818_v59 = vpop.f32.mrb[78].mxu1 }
 0x7c9   :  { %v9829_v7 = vadd.f32 %v11419_v16, %v9821_v19  ;;  %v13341_v11 = vpop.f32.mrb[79].mxu1 }
 0x7cb   :  { %v9830_v42 = vmax.f32 %v9829_v7, 0.0 }
 0x7cd   :  { %13375 = vmatmul.mubr.f32.vlgmr.msra.gmra.mrb[80].mxu1 %v9830_v42 }
 0x8a0   :  { %v9920_v52 = vpop.f32.mrb[80].mxu1 }
 0x8a1   :  { %v9921_v44 = vadd.f32 %v11420_v36, %v9920_v52  ;;  %v13376_v41 = vpop.f32.mrb[81].mxu1 }
 0x8a3   :  { %v9927_v28 = vsel %vm9926_vm5, %v9921_v44, -inf }
 0x8a4   :  { %9928 = vmax.xlane.f32.xlu0 %v9927_v28 }
 0x931   :  { %v9929_v51 = vpop.xlane.xlu0 %9928 }
 0x932   :  { %vm9930_vm6 = vcmp.eq.f32.partialorder %v9921_v44, %v9929_v51 }
 0x933   :  { %v9931_v49 = vsel %vm9930_vm6, %v9925_v5, 128 }
 0x934   :  { %v9932_v40 = vsel %vm9926_vm5, %v9931_v49, 2147483647 }
 0x935   :  { %v9934_v6 = vshra.s32 %v9932_v40, 16  ;;  %v9933_v63 = vand.u32 65535, %v9932_v40 }
 0x937   :  { %v9936_v54 = vcvt.s32.f32 %v9934_v6  ;;  %v9935_v17 = vcvt.s32.f32 %v9933_v63 }
 0x939   :  { %9937 = vmin.xlane.f32.xlu0 %v9936_v54 }
 0x9c6   :  { %v9938_v38 = vpop.xlane.xlu0 %9937 }
 0x9c7   :  { %vm9939_vm7 = vcmp.eq.f32.partialorder %v9936_v54, %v9938_v38  ;;  %v9944_v14 = vcvt.f32.s32 %v9938_v38 }
 0x9c8   :  { %v9940_v13 = vsel %vm9939_vm7, %v9935_v17, inf }
 0x9c9   :  { %9941 = vmin.xlane.f32.xlu1 %v9940_v13  ;;  %v9945_v4 = vshll.u32 %v9944_v14, 16 }
 0xa56   :  { %v9942_v55 = vpop.xlane.xlu1 %9941 }
 0xa57   :  { %v9943_v61 = vcvt.f32.s32 %v9942_v55 }
 0xa59   :  { %v9946_v27 = vadd.s32 %v9945_v4, %v9943_v61 }
 0xa5b   :  { %9947 = vst [vmem:[%s17811_s8] sm:$0xf] %v9946_v27 }

</bundles_post_ra>
